<compile_context>
chip_gen: v7x
topology: tpu7x:2x2x1
jax: 0.10.0
libtpu: 0.0.40
codegen_flags: <defaults>
</compile_context>

<pallas_src>
import functools

import numpy as np
import jax
import jax.numpy as jnp
from jax.experimental import pallas as pl
from jax.experimental.pallas import tpu as pltpu

COMPUTE_DTYPE = jnp.bfloat16      # MXU input dtype (accumulation is f32).


# ----------------------------------------------------------------------------
# Fused LeNet kernel: one grid step == one image.
# ----------------------------------------------------------------------------
def _lenet_kernel(x_ref,
                  bd1_ref, b1_ref, r1e_ref, r1o_ref, p1e_ref, p1o_ref,
                  bd2_ref, b2_ref, r2e_ref, r2o_ref, p2e_ref, p2o_ref,
                  w3_ref, b3_ref, wf1_ref, bf1_ref, wf2_ref, bf2_ref,
                  o_ref):
    f32 = jnp.float32
    cdt = bd1_ref.dtype                       # MXU compute dtype (bf16)
    dot = functools.partial(jnp.dot, preferred_element_type=f32)

    # ---- conv1 (1->6, 5x5, padding pre-applied) + bias + ReLU -> (28, 28*6)
    acc1 = jnp.zeros((28, 28 * 6), f32)
    for i in range(5):
        for j in range(5):
            s = x_ref[i:i + 28, j:j + 28].astype(cdt)          # (28, 28)
            acc1 = acc1 + dot(s, bd1_ref[i * 5 + j])           # (28, 168)
    y1 = jnp.maximum(acc1 + b1_ref[...], 0.0)

    # ---- 2x2 max-pool -> (14, 14*6): max of 0/1 selection matmuls
    w1m = jnp.maximum(dot(y1, r1e_ref[...]), dot(y1, r1o_ref[...]))    # (28, 84)
    a2 = jnp.maximum(dot(p1e_ref[...], w1m), dot(p1o_ref[...], w1m))   # (14, 84)

    # ---- conv2 (6->16, 5x5, valid) + bias + ReLU -> (10, 10*16)
    acc2 = jnp.zeros((10, 10 * 16), f32)
    for i in range(5):
        for j in range(5):
            s = a2[i:i + 10, j * 6:j * 6 + 60].astype(cdt)     # (10, 60)
            acc2 = acc2 + dot(s, bd2_ref[i * 5 + j])           # (10, 160)
    y2 = jnp.maximum(acc2 + b2_ref[...], 0.0)

    # ---- 2x2 max-pool -> (5, 5*16)
    w2m = jnp.maximum(dot(y2, r2e_ref[...]), dot(y2, r2o_ref[...]))    # (10, 80)
    a3 = jnp.maximum(dot(p2e_ref[...], w2m), dot(p2o_ref[...], w2m))   # (5, 80)

    # ---- conv3 (16->120, 5x5, valid -> 1x1) + bias + ReLU -> (1, 120)
    acc3 = jnp.zeros((1, 120), f32)
    for i in range(5):
        acc3 = acc3 + dot(a3[i:i + 1, :].astype(cdt), w3_ref[i])
    a4 = jnp.maximum(acc3 + b3_ref[...], 0.0)

    # ---- fc1 (120->84) + ReLU, fc2 (84->10) : raw logits (no softmax)
    a5 = jnp.maximum(dot(a4.astype(cdt), wf1_ref[...]) + bf1_ref[...], 0.0)
    logits = dot(a5.astype(cdt), wf2_ref[...]) + bf2_ref[...]
    o_ref[...] = logits.astype(o_ref.dtype)


# ----------------------------------------------------------------------------
# One-time weight preparation (outside the jitted forward).
# ----------------------------------------------------------------------------
def _sel_cols(n_out, c, parity):
    """(2*n_out*c, n_out*c) 0/1 matrix selecting lane groups (2q+parity)."""
    m = np.zeros((2 * n_out * c, n_out * c), np.float32)
    for q in range(n_out):
        for cc in range(c):
            m[(2 * q + parity) * c + cc, q * c + cc] = 1.0
    return jnp.asarray(m)


def _sel_rows(n_out, parity):
    """(n_out, 2*n_out) 0/1 matrix selecting rows (2p+parity)."""
    m = np.zeros((n_out, 2 * n_out), np.float32)
    for p in range(n_out):
        m[p, 2 * p + parity] = 1.0
    return jnp.asarray(m)


def prepare_params(params, compute_dtype=COMPUTE_DTYPE):
    """Transform PyTorch-layout weights into VMEM-resident kernel operands."""
    f32 = jnp.float32
    w1, b1 = params["w1"].astype(f32), params["b1"].astype(f32)   # (6,1,5,5)
    w2, b2 = params["w2"].astype(f32), params["b2"].astype(f32)   # (16,6,5,5)
    w3, b3 = params["w3"].astype(f32), params["b3"].astype(f32)   # (120,16,5,5)
    wf1, bf1 = params["wf1"].astype(f32), params["bf1"].astype(f32)  # (84,120)
    wf2, bf2 = params["wf2"].astype(f32), params["bf2"].astype(f32)  # (10,84)

    # conv1: 25 block-diagonal slabs (28, 168) = kron(I_28, w1[:,0,i,j][None,:])
    eye28 = jnp.eye(28, dtype=f32)
    bd1 = jnp.stack([jnp.kron(eye28, w1[:, 0, i, j].reshape(1, 6))
                     for i in range(5) for j in range(5)])        # (25, 28, 168)
    # conv2: 25 block-diagonal slabs (60, 160) = kron(I_10, w2[:,:,i,j].T)
    eye10 = jnp.eye(10, dtype=f32)
    bd2 = jnp.stack([jnp.kron(eye10, w2[:, :, i, j].T)
                     for i in range(5) for j in range(5)])        # (25, 60, 160)
    # conv3 consumes the full 5x5x16 patch: (5, 80, 120), [i, j*16+c, co]
    w3s = jnp.transpose(w3, (2, 3, 1, 0)).reshape(5, 5 * 16, 120)

    return {
        "bd1": bd1.astype(compute_dtype),
        "b1row": jnp.tile(b1, 28).reshape(1, 168),
        "r1e": _sel_cols(14, 6, 0), "r1o": _sel_cols(14, 6, 1),
        "p1e": _sel_rows(14, 0), "p1o": _sel_rows(14, 1),
        "bd2": bd2.astype(compute_dtype),
        "b2row": jnp.tile(b2, 10).reshape(1, 160),
        "r2e": _sel_cols(5, 16, 0), "r2o": _sel_cols(5, 16, 1),
        "p2e": _sel_rows(5, 0), "p2o": _sel_rows(5, 1),
        "w3s": w3s.astype(compute_dtype),
        "b3row": b3.reshape(1, 120),
        "wf1t": wf1.T.astype(compute_dtype),
        "bf1row": bf1.reshape(1, 84),
        "wf2t": wf2.T.astype(compute_dtype),
        "bf2row": bf2.reshape(1, 10),
    }


_CONST_ORDER = ("bd1", "b1row", "r1e", "r1o", "p1e", "p1o",
                "bd2", "b2row", "r2e", "r2o", "p2e", "p2o",
                "w3s", "b3row", "wf1t", "bf1row", "wf2t", "bf2row")


# ----------------------------------------------------------------------------
# Forward: one fused pallas_call, grid over the batch.
# ----------------------------------------------------------------------------
def lenet_forward(x, prepared):
    """x: (N, 1, 28, 28) f32 -> logits (N, 10) f32 (no softmax, as in torch)."""
    assert x.shape[1:] == (1, 28, 28), "LeNet geometry requires (N, 1, 28, 28)"
    N = x.shape[0]
    # conv1's padding=2 baked into the input once: 28 + 2 + 2 = 32.
    xp = jnp.pad(x[:, 0, :, :], ((0, 0), (2, 2), (2, 2)))          # (N, 32, 32)

    consts = [prepared[k] for k in _CONST_ORDER]

    def _const_spec(a):
        zeros = (0,) * a.ndim
        return pl.BlockSpec(a.shape, lambda n: zeros)

    out = pl.pallas_call(
        _lenet_kernel,
        out_shape=jax.ShapeDtypeStruct((N, 1, 10), jnp.float32),
        grid=(N,),
        in_specs=[pl.BlockSpec((None, 32, 32), lambda n: (n, 0, 0))]
                 + [_const_spec(a) for a in consts],
        out_specs=pl.BlockSpec((None, 1, 10), lambda n: (n, 0, 0)),
        compiler_params=pltpu.CompilerParams(
            dimension_semantics=("parallel",)),
    )(xp, *consts)
    return out.reshape(N, 10)


# ----------------------------------------------------------------------------
# Pure-JAX f32 reference (matches the torch forward) and init.
# ----------------------------------------------------------------------------
def lenet_reference(x, params):
    dn = ("NCHW", "OIHW", "NCHW")
    hi = jax.lax.Precision.HIGHEST
    y = jax.lax.conv_general_dilated(x, params["w1"], (1, 1), ((2, 2), (2, 2)),
                                     dimension_numbers=dn, precision=hi)
    y = jax.nn.relu(y + params["b1"].reshape(1, -1, 1, 1))
    y = jax.lax.reduce_window(y, -jnp.inf, jax.lax.max,
                              (1, 1, 2, 2), (1, 1, 2, 2), "VALID")
    y = jax.lax.conv_general_dilated(y, params["w2"], (1, 1), "VALID",
                                     dimension_numbers=dn, precision=hi)
    y = jax.nn.relu(y + params["b2"].reshape(1, -1, 1, 1))
    y = jax.lax.reduce_window(y, -jnp.inf, jax.lax.max,
                              (1, 1, 2, 2), (1, 1, 2, 2), "VALID")
    y = jax.lax.conv_general_dilated(y, params["w3"], (1, 1), "VALID",
                                     dimension_numbers=dn, precision=hi)
    y = jax.nn.relu(y + params["b3"].reshape(1, -1, 1, 1))
    y = y.reshape(y.shape[0], -1)
    y = jax.nn.relu(jnp.dot(y, params["wf1"].T, precision=hi) + params["bf1"])
    return jnp.dot(y, params["wf2"].T, precision=hi) + params["bf2"]


def init_params(key):
    """Deterministic init matching the torch layer shapes."""
    ks = jax.random.split(key, 10)
    uni = lambda k, shape, fan_in: jax.random.uniform(
        k, shape, jnp.float32, -1.0, 1.0) / jnp.sqrt(jnp.float32(fan_in))
    return {
        "w1": uni(ks[0], (6, 1, 5, 5), 25), "b1": uni(ks[1], (6,), 25),
        "w2": uni(ks[2], (16, 6, 5, 5), 150), "b2": uni(ks[3], (16,), 150),
        "w3": uni(ks[4], (120, 16, 5, 5), 400), "b3": uni(ks[5], (120,), 400),
        "wf1": uni(ks[6], (84, 120), 120), "bf1": uni(ks[7], (84,), 120),
        "wf2": uni(ks[8], (10, 84), 84), "bf2": uni(ks[9], (10,), 84),
    }


if __name__ == "__main__":
    key = jax.random.PRNGKey(0)
    k_x, k_p = jax.random.split(key)

    # LeNet geometry needs a 28x28 single-channel input (flatten -> 120).
    x = jax.random.normal(k_x, (2, 1, 28, 28), dtype=jnp.float32)
    params = init_params(k_p)
    prepared = prepare_params(params)          # one-time weight transform

    fwd = jax.jit(lenet_forward)
    logits = fwd(x, prepared)
    jax.block_until_ready(logits)

    assert logits.shape == (2, 10) and logits.dtype == jnp.float32

    # Loose check vs a pure-JAX f32 reference (kernel uses bf16 MXU inputs).
    ref = lenet_reference(x, params)
    max_err = float(jnp.max(jnp.abs(logits - ref)))
    assert max_err < 1e-1, f"max |kernel - reference| = {max_err}"

    print("KERNEL_OK")
</pallas_src>

<mosaic_0001>
module attributes {stable_mosaic.version = 11 : i64} {
  func.func @_lenet_kernel(%arg0: i32, %arg1: memref<1x32x32xf32, #tpu.memory_space<vmem>>, %arg2: memref<25x28x168xbf16, #tpu.memory_space<vmem>>, %arg3: memref<1x168xf32, #tpu.memory_space<vmem>>, %arg4: memref<168x84xf32, #tpu.memory_space<vmem>>, %arg5: memref<168x84xf32, #tpu.memory_space<vmem>>, %arg6: memref<14x28xf32, #tpu.memory_space<vmem>>, %arg7: memref<14x28xf32, #tpu.memory_space<vmem>>, %arg8: memref<25x60x160xbf16, #tpu.memory_space<vmem>>, %arg9: memref<1x160xf32, #tpu.memory_space<vmem>>, %arg10: memref<160x80xf32, #tpu.memory_space<vmem>>, %arg11: memref<160x80xf32, #tpu.memory_space<vmem>>, %arg12: memref<5x10xf32, #tpu.memory_space<vmem>>, %arg13: memref<5x10xf32, #tpu.memory_space<vmem>>, %arg14: memref<5x80x120xbf16, #tpu.memory_space<vmem>>, %arg15: memref<1x120xf32, #tpu.memory_space<vmem>>, %arg16: memref<120x84xbf16, #tpu.memory_space<vmem>>, %arg17: memref<1x84xf32, #tpu.memory_space<vmem>>, %arg18: memref<84x10xbf16, #tpu.memory_space<vmem>>, %arg19: memref<1x10xf32, #tpu.memory_space<vmem>>, %arg20: memref<1x1x10xf32, #tpu.memory_space<vmem>>) attributes {dimension_semantics = [#tpu.dimension_semantics<parallel>], iteration_bounds = array<i64: 2>, scalar_prefetch = 0 : i64, scratch_operands = 0 : i64, tpu.core_type = #tpu.core_type<tc>, window_params = [{transform_indices = @transform_0, window_bounds = array<i64: 1, 32, 32>}, {pipeline_mode = #tpu.pipeline_mode<synchronous>, transform_indices = @transform_1, window_bounds = array<i64: 25, 28, 168>}, {pipeline_mode = #tpu.pipeline_mode<synchronous>, transform_indices = @transform_2, window_bounds = array<i64: 1, 168>}, {pipeline_mode = #tpu.pipeline_mode<synchronous>, transform_indices = @transform_3, window_bounds = array<i64: 168, 84>}, {pipeline_mode = #tpu.pipeline_mode<synchronous>, transform_indices = @transform_4, window_bounds = array<i64: 168, 84>}, {pipeline_mode = #tpu.pipeline_mode<synchronous>, transform_indices = @transform_5, window_bounds = array<i64: 14, 28>}, {pipeline_mode = #tpu.pipeline_mode<synchronous>, transform_indices = @transform_6, window_bounds = array<i64: 14, 28>}, {pipeline_mode = #tpu.pipeline_mode<synchronous>, transform_indices = @transform_7, window_bounds = array<i64: 25, 60, 160>}, {pipeline_mode = #tpu.pipeline_mode<synchronous>, transform_indices = @transform_8, window_bounds = array<i64: 1, 160>}, {pipeline_mode = #tpu.pipeline_mode<synchronous>, transform_indices = @transform_9, window_bounds = array<i64: 160, 80>}, {pipeline_mode = #tpu.pipeline_mode<synchronous>, transform_indices = @transform_10, window_bounds = array<i64: 160, 80>}, {pipeline_mode = #tpu.pipeline_mode<synchronous>, transform_indices = @transform_11, window_bounds = array<i64: 5, 10>}, {pipeline_mode = #tpu.pipeline_mode<synchronous>, transform_indices = @transform_12, window_bounds = array<i64: 5, 10>}, {pipeline_mode = #tpu.pipeline_mode<synchronous>, transform_indices = @transform_13, window_bounds = array<i64: 5, 80, 120>}, {pipeline_mode = #tpu.pipeline_mode<synchronous>, transform_indices = @transform_14, window_bounds = array<i64: 1, 120>}, {pipeline_mode = #tpu.pipeline_mode<synchronous>, transform_indices = @transform_15, window_bounds = array<i64: 120, 84>}, {pipeline_mode = #tpu.pipeline_mode<synchronous>, transform_indices = @transform_16, window_bounds = array<i64: 1, 84>}, {pipeline_mode = #tpu.pipeline_mode<synchronous>, transform_indices = @transform_17, window_bounds = array<i64: 84, 10>}, {pipeline_mode = #tpu.pipeline_mode<synchronous>, transform_indices = @transform_18, window_bounds = array<i64: 1, 10>}, {transform_indices = @transform_19, window_bounds = array<i64: 1, 1, 10>}]} {
    %cst = arith.constant 0.000000e+00 : f32
    %0 = vector.broadcast %cst : f32 to vector<28x168xf32>
    %c0 = arith.constant 0 : index
    %c0_0 = arith.constant 0 : index
    %c0_1 = arith.constant 0 : index
    %1 = vector.load %arg1[%c0, %c0_0, %c0_1] : memref<1x32x32xf32, #tpu.memory_space<vmem>>, vector<1x28x28xf32>
    %2 = vector.shape_cast %1 : vector<1x28x28xf32> to vector<28x28xf32>
    %3 = arith.truncf %2 : vector<28x28xf32> to vector<28x28xbf16>
    %c0_2 = arith.constant 0 : index
    %c0_3 = arith.constant 0 : index
    %c0_4 = arith.constant 0 : index
    %4 = vector.load %arg2[%c0_2, %c0_3, %c0_4] : memref<25x28x168xbf16, #tpu.memory_space<vmem>>, vector<1x28x168xbf16>
    %5 = vector.shape_cast %4 : vector<1x28x168xbf16> to vector<28x168xbf16>
    %cst_5 = arith.constant dense<0.000000e+00> : vector<28x168xf32>
    %6 = tpu.matmul %3, %5, %cst_5 {dimension_numbers = #tpu.dot_dimension_numbers<[1], [0], [0], [1], [0, 0, 1, 1], [], []>} : vector<28x28xbf16>, vector<28x168xbf16>, vector<28x168xf32> -> vector<28x168xf32>
    %7 = arith.addf %0, %6 : vector<28x168xf32>
    %c0_6 = arith.constant 0 : index
    %c0_7 = arith.constant 0 : index
    %c1 = arith.constant 1 : index
    %8 = vector.load %arg1[%c0_6, %c0_7, %c1] : memref<1x32x32xf32, #tpu.memory_space<vmem>>, vector<1x28x28xf32>
    %9 = vector.shape_cast %8 : vector<1x28x28xf32> to vector<28x28xf32>
    %10 = arith.truncf %9 : vector<28x28xf32> to vector<28x28xbf16>
    %c1_8 = arith.constant 1 : index
    %c0_9 = arith.constant 0 : index
    %c0_10 = arith.constant 0 : index
    %11 = vector.load %arg2[%c1_8, %c0_9, %c0_10] : memref<25x28x168xbf16, #tpu.memory_space<vmem>>, vector<1x28x168xbf16>
    %12 = vector.shape_cast %11 : vector<1x28x168xbf16> to vector<28x168xbf16>
    %cst_11 = arith.constant dense<0.000000e+00> : vector<28x168xf32>
    %13 = tpu.matmul %10, %12, %cst_11 {dimension_numbers = #tpu.dot_dimension_numbers<[1], [0], [0], [1], [0, 0, 1, 1], [], []>} : vector<28x28xbf16>, vector<28x168xbf16>, vector<28x168xf32> -> vector<28x168xf32>
    %14 = arith.addf %7, %13 : vector<28x168xf32>
    %c0_12 = arith.constant 0 : index
    %c0_13 = arith.constant 0 : index
    %c2 = arith.constant 2 : index
    %15 = vector.load %arg1[%c0_12, %c0_13, %c2] : memref<1x32x32xf32, #tpu.memory_space<vmem>>, vector<1x28x28xf32>
    %16 = vector.shape_cast %15 : vector<1x28x28xf32> to vector<28x28xf32>
    %17 = arith.truncf %16 : vector<28x28xf32> to vector<28x28xbf16>
    %c2_14 = arith.constant 2 : index
    %c0_15 = arith.constant 0 : index
    %c0_16 = arith.constant 0 : index
    %18 = vector.load %arg2[%c2_14, %c0_15, %c0_16] : memref<25x28x168xbf16, #tpu.memory_space<vmem>>, vector<1x28x168xbf16>
    %19 = vector.shape_cast %18 : vector<1x28x168xbf16> to vector<28x168xbf16>
    %cst_17 = arith.constant dense<0.000000e+00> : vector<28x168xf32>
    %20 = tpu.matmul %17, %19, %cst_17 {dimension_numbers = #tpu.dot_dimension_numbers<[1], [0], [0], [1], [0, 0, 1, 1], [], []>} : vector<28x28xbf16>, vector<28x168xbf16>, vector<28x168xf32> -> vector<28x168xf32>
    %21 = arith.addf %14, %20 : vector<28x168xf32>
    %c0_18 = arith.constant 0 : index
    %c0_19 = arith.constant 0 : index
    %c3 = arith.constant 3 : index
    %22 = vector.load %arg1[%c0_18, %c0_19, %c3] : memref<1x32x32xf32, #tpu.memory_space<vmem>>, vector<1x28x28xf32>
    %23 = vector.shape_cast %22 : vector<1x28x28xf32> to vector<28x28xf32>
    %24 = arith.truncf %23 : vector<28x28xf32> to vector<28x28xbf16>
    %c3_20 = arith.constant 3 : index
    %c0_21 = arith.constant 0 : index
    %c0_22 = arith.constant 0 : index
    %25 = vector.load %arg2[%c3_20, %c0_21, %c0_22] : memref<25x28x168xbf16, #tpu.memory_space<vmem>>, vector<1x28x168xbf16>
    %26 = vector.shape_cast %25 : vector<1x28x168xbf16> to vector<28x168xbf16>
    %cst_23 = arith.constant dense<0.000000e+00> : vector<28x168xf32>
    %27 = tpu.matmul %24, %26, %cst_23 {dimension_numbers = #tpu.dot_dimension_numbers<[1], [0], [0], [1], [0, 0, 1, 1], [], []>} : vector<28x28xbf16>, vector<28x168xbf16>, vector<28x168xf32> -> vector<28x168xf32>
    %28 = arith.addf %21, %27 : vector<28x168xf32>
    %c0_24 = arith.constant 0 : index
    %c0_25 = arith.constant 0 : index
    %c4 = arith.constant 4 : index
    %29 = vector.load %arg1[%c0_24, %c0_25, %c4] : memref<1x32x32xf32, #tpu.memory_space<vmem>>, vector<1x28x28xf32>
    %30 = vector.shape_cast %29 : vector<1x28x28xf32> to vector<28x28xf32>
    %31 = arith.truncf %30 : vector<28x28xf32> to vector<28x28xbf16>
    %c4_26 = arith.constant 4 : index
    %c0_27 = arith.constant 0 : index
    %c0_28 = arith.constant 0 : index
    %32 = vector.load %arg2[%c4_26, %c0_27, %c0_28] : memref<25x28x168xbf16, #tpu.memory_space<vmem>>, vector<1x28x168xbf16>
    %33 = vector.shape_cast %32 : vector<1x28x168xbf16> to vector<28x168xbf16>
    %cst_29 = arith.constant dense<0.000000e+00> : vector<28x168xf32>
    %34 = tpu.matmul %31, %33, %cst_29 {dimension_numbers = #tpu.dot_dimension_numbers<[1], [0], [0], [1], [0, 0, 1, 1], [], []>} : vector<28x28xbf16>, vector<28x168xbf16>, vector<28x168xf32> -> vector<28x168xf32>
    %35 = arith.addf %28, %34 : vector<28x168xf32>
    %c0_30 = arith.constant 0 : index
    %c1_31 = arith.constant 1 : index
    %c0_32 = arith.constant 0 : index
    %36 = vector.load %arg1[%c0_30, %c1_31, %c0_32] : memref<1x32x32xf32, #tpu.memory_space<vmem>>, vector<1x28x28xf32>
    %37 = vector.shape_cast %36 : vector<1x28x28xf32> to vector<28x28xf32>
    %38 = arith.truncf %37 : vector<28x28xf32> to vector<28x28xbf16>
    %c5 = arith.constant 5 : index
    %c0_33 = arith.constant 0 : index
    %c0_34 = arith.constant 0 : index
    %39 = vector.load %arg2[%c5, %c0_33, %c0_34] : memref<25x28x168xbf16, #tpu.memory_space<vmem>>, vector<1x28x168xbf16>
    %40 = vector.shape_cast %39 : vector<1x28x168xbf16> to vector<28x168xbf16>
    %cst_35 = arith.constant dense<0.000000e+00> : vector<28x168xf32>
    %41 = tpu.matmul %38, %40, %cst_35 {dimension_numbers = #tpu.dot_dimension_numbers<[1], [0], [0], [1], [0, 0, 1, 1], [], []>} : vector<28x28xbf16>, vector<28x168xbf16>, vector<28x168xf32> -> vector<28x168xf32>
    %42 = arith.addf %35, %41 : vector<28x168xf32>
    %c0_36 = arith.constant 0 : index
    %c1_37 = arith.constant 1 : index
    %c1_38 = arith.constant 1 : index
    %43 = vector.load %arg1[%c0_36, %c1_37, %c1_38] : memref<1x32x32xf32, #tpu.memory_space<vmem>>, vector<1x28x28xf32>
    %44 = vector.shape_cast %43 : vector<1x28x28xf32> to vector<28x28xf32>
    %45 = arith.truncf %44 : vector<28x28xf32> to vector<28x28xbf16>
    %c6 = arith.constant 6 : index
    %c0_39 = arith.constant 0 : index
    %c0_40 = arith.constant 0 : index
    %46 = vector.load %arg2[%c6, %c0_39, %c0_40] : memref<25x28x168xbf16, #tpu.memory_space<vmem>>, vector<1x28x168xbf16>
    %47 = vector.shape_cast %46 : vector<1x28x168xbf16> to vector<28x168xbf16>
    %cst_41 = arith.constant dense<0.000000e+00> : vector<28x168xf32>
    %48 = tpu.matmul %45, %47, %cst_41 {dimension_numbers = #tpu.dot_dimension_numbers<[1], [0], [0], [1], [0, 0, 1, 1], [], []>} : vector<28x28xbf16>, vector<28x168xbf16>, vector<28x168xf32> -> vector<28x168xf32>
    %49 = arith.addf %42, %48 : vector<28x168xf32>
    %c0_42 = arith.constant 0 : index
    %c1_43 = arith.constant 1 : index
    %c2_44 = arith.constant 2 : index
    %50 = vector.load %arg1[%c0_42, %c1_43, %c2_44] : memref<1x32x32xf32, #tpu.memory_space<vmem>>, vector<1x28x28xf32>
    %51 = vector.shape_cast %50 : vector<1x28x28xf32> to vector<28x28xf32>
    %52 = arith.truncf %51 : vector<28x28xf32> to vector<28x28xbf16>
    %c7 = arith.constant 7 : index
    %c0_45 = arith.constant 0 : index
    %c0_46 = arith.constant 0 : index
    %53 = vector.load %arg2[%c7, %c0_45, %c0_46] : memref<25x28x168xbf16, #tpu.memory_space<vmem>>, vector<1x28x168xbf16>
    %54 = vector.shape_cast %53 : vector<1x28x168xbf16> to vector<28x168xbf16>
    %cst_47 = arith.constant dense<0.000000e+00> : vector<28x168xf32>
    %55 = tpu.matmul %52, %54, %cst_47 {dimension_numbers = #tpu.dot_dimension_numbers<[1], [0], [0], [1], [0, 0, 1, 1], [], []>} : vector<28x28xbf16>, vector<28x168xbf16>, vector<28x168xf32> -> vector<28x168xf32>
    %56 = arith.addf %49, %55 : vector<28x168xf32>
    %c0_48 = arith.constant 0 : index
    %c1_49 = arith.constant 1 : index
    %c3_50 = arith.constant 3 : index
    %57 = vector.load %arg1[%c0_48, %c1_49, %c3_50] : memref<1x32x32xf32, #tpu.memory_space<vmem>>, vector<1x28x28xf32>
    %58 = vector.shape_cast %57 : vector<1x28x28xf32> to vector<28x28xf32>
    %59 = arith.truncf %58 : vector<28x28xf32> to vector<28x28xbf16>
    %c8 = arith.constant 8 : index
    %c0_51 = arith.constant 0 : index
    %c0_52 = arith.constant 0 : index
    %60 = vector.load %arg2[%c8, %c0_51, %c0_52] : memref<25x28x168xbf16, #tpu.memory_space<vmem>>, vector<1x28x168xbf16>
    %61 = vector.shape_cast %60 : vector<1x28x168xbf16> to vector<28x168xbf16>
    %cst_53 = arith.constant dense<0.000000e+00> : vector<28x168xf32>
    %62 = tpu.matmul %59, %61, %cst_53 {dimension_numbers = #tpu.dot_dimension_numbers<[1], [0], [0], [1], [0, 0, 1, 1], [], []>} : vector<28x28xbf16>, vector<28x168xbf16>, vector<28x168xf32> -> vector<28x168xf32>
    %63 = arith.addf %56, %62 : vector<28x168xf32>
    %c0_54 = arith.constant 0 : index
    %c1_55 = arith.constant 1 : index
    %c4_56 = arith.constant 4 : index
    %64 = vector.load %arg1[%c0_54, %c1_55, %c4_56] : memref<1x32x32xf32, #tpu.memory_space<vmem>>, vector<1x28x28xf32>
    %65 = vector.shape_cast %64 : vector<1x28x28xf32> to vector<28x28xf32>
    %66 = arith.truncf %65 : vector<28x28xf32> to vector<28x28xbf16>
    %c9 = arith.constant 9 : index
    %c0_57 = arith.constant 0 : index
    %c0_58 = arith.constant 0 : index
    %67 = vector.load %arg2[%c9, %c0_57, %c0_58] : memref<25x28x168xbf16, #tpu.memory_space<vmem>>, vector<1x28x168xbf16>
    %68 = vector.shape_cast %67 : vector<1x28x168xbf16> to vector<28x168xbf16>
    %cst_59 = arith.constant dense<0.000000e+00> : vector<28x168xf32>
    %69 = tpu.matmul %66, %68, %cst_59 {dimension_numbers = #tpu.dot_dimension_numbers<[1], [0], [0], [1], [0, 0, 1, 1], [], []>} : vector<28x28xbf16>, vector<28x168xbf16>, vector<28x168xf32> -> vector<28x168xf32>
    %70 = arith.addf %63, %69 : vector<28x168xf32>
    %c0_60 = arith.constant 0 : index
    %c2_61 = arith.constant 2 : index
    %c0_62 = arith.constant 0 : index
    %71 = vector.load %arg1[%c0_60, %c2_61, %c0_62] : memref<1x32x32xf32, #tpu.memory_space<vmem>>, vector<1x28x28xf32>
    %72 = vector.shape_cast %71 : vector<1x28x28xf32> to vector<28x28xf32>
    %73 = arith.truncf %72 : vector<28x28xf32> to vector<28x28xbf16>
    %c10 = arith.constant 10 : index
    %c0_63 = arith.constant 0 : index
    %c0_64 = arith.constant 0 : index
    %74 = vector.load %arg2[%c10, %c0_63, %c0_64] : memref<25x28x168xbf16, #tpu.memory_space<vmem>>, vector<1x28x168xbf16>
    %75 = vector.shape_cast %74 : vector<1x28x168xbf16> to vector<28x168xbf16>
    %cst_65 = arith.constant dense<0.000000e+00> : vector<28x168xf32>
    %76 = tpu.matmul %73, %75, %cst_65 {dimension_numbers = #tpu.dot_dimension_numbers<[1], [0], [0], [1], [0, 0, 1, 1], [], []>} : vector<28x28xbf16>, vector<28x168xbf16>, vector<28x168xf32> -> vector<28x168xf32>
    %77 = arith.addf %70, %76 : vector<28x168xf32>
    %c0_66 = arith.constant 0 : index
    %c2_67 = arith.constant 2 : index
    %c1_68 = arith.constant 1 : index
    %78 = vector.load %arg1[%c0_66, %c2_67, %c1_68] : memref<1x32x32xf32, #tpu.memory_space<vmem>>, vector<1x28x28xf32>
    %79 = vector.shape_cast %78 : vector<1x28x28xf32> to vector<28x28xf32>
    %80 = arith.truncf %79 : vector<28x28xf32> to vector<28x28xbf16>
    %c11 = arith.constant 11 : index
    %c0_69 = arith.constant 0 : index
    %c0_70 = arith.constant 0 : index
    %81 = vector.load %arg2[%c11, %c0_69, %c0_70] : memref<25x28x168xbf16, #tpu.memory_space<vmem>>, vector<1x28x168xbf16>
    %82 = vector.shape_cast %81 : vector<1x28x168xbf16> to vector<28x168xbf16>
    %cst_71 = arith.constant dense<0.000000e+00> : vector<28x168xf32>
    %83 = tpu.matmul %80, %82, %cst_71 {dimension_numbers = #tpu.dot_dimension_numbers<[1], [0], [0], [1], [0, 0, 1, 1], [], []>} : vector<28x28xbf16>, vector<28x168xbf16>, vector<28x168xf32> -> vector<28x168xf32>
    %84 = arith.addf %77, %83 : vector<28x168xf32>
    %c0_72 = arith.constant 0 : index
    %c2_73 = arith.constant 2 : index
    %c2_74 = arith.constant 2 : index
    %85 = vector.load %arg1[%c0_72, %c2_73, %c2_74] : memref<1x32x32xf32, #tpu.memory_space<vmem>>, vector<1x28x28xf32>
    %86 = vector.shape_cast %85 : vector<1x28x28xf32> to vector<28x28xf32>
    %87 = arith.truncf %86 : vector<28x28xf32> to vector<28x28xbf16>
    %c12 = arith.constant 12 : index
    %c0_75 = arith.constant 0 : index
    %c0_76 = arith.constant 0 : index
    %88 = vector.load %arg2[%c12, %c0_75, %c0_76] : memref<25x28x168xbf16, #tpu.memory_space<vmem>>, vector<1x28x168xbf16>
    %89 = vector.shape_cast %88 : vector<1x28x168xbf16> to vector<28x168xbf16>
    %cst_77 = arith.constant dense<0.000000e+00> : vector<28x168xf32>
    %90 = tpu.matmul %87, %89, %cst_77 {dimension_numbers = #tpu.dot_dimension_numbers<[1], [0], [0], [1], [0, 0, 1, 1], [], []>} : vector<28x28xbf16>, vector<28x168xbf16>, vector<28x168xf32> -> vector<28x168xf32>
    %91 = arith.addf %84, %90 : vector<28x168xf32>
    %c0_78 = arith.constant 0 : index
    %c2_79 = arith.constant 2 : index
    %c3_80 = arith.constant 3 : index
    %92 = vector.load %arg1[%c0_78, %c2_79, %c3_80] : memref<1x32x32xf32, #tpu.memory_space<vmem>>, vector<1x28x28xf32>
    %93 = vector.shape_cast %92 : vector<1x28x28xf32> to vector<28x28xf32>
    %94 = arith.truncf %93 : vector<28x28xf32> to vector<28x28xbf16>
    %c13 = arith.constant 13 : index
    %c0_81 = arith.constant 0 : index
    %c0_82 = arith.constant 0 : index
    %95 = vector.load %arg2[%c13, %c0_81, %c0_82] : memref<25x28x168xbf16, #tpu.memory_space<vmem>>, vector<1x28x168xbf16>
    %96 = vector.shape_cast %95 : vector<1x28x168xbf16> to vector<28x168xbf16>
    %cst_83 = arith.constant dense<0.000000e+00> : vector<28x168xf32>
    %97 = tpu.matmul %94, %96, %cst_83 {dimension_numbers = #tpu.dot_dimension_numbers<[1], [0], [0], [1], [0, 0, 1, 1], [], []>} : vector<28x28xbf16>, vector<28x168xbf16>, vector<28x168xf32> -> vector<28x168xf32>
    %98 = arith.addf %91, %97 : vector<28x168xf32>
    %c0_84 = arith.constant 0 : index
    %c2_85 = arith.constant 2 : index
    %c4_86 = arith.constant 4 : index
    %99 = vector.load %arg1[%c0_84, %c2_85, %c4_86] : memref<1x32x32xf32, #tpu.memory_space<vmem>>, vector<1x28x28xf32>
    %100 = vector.shape_cast %99 : vector<1x28x28xf32> to vector<28x28xf32>
    %101 = arith.truncf %100 : vector<28x28xf32> to vector<28x28xbf16>
    %c14 = arith.constant 14 : index
    %c0_87 = arith.constant 0 : index
    %c0_88 = arith.constant 0 : index
    %102 = vector.load %arg2[%c14, %c0_87, %c0_88] : memref<25x28x168xbf16, #tpu.memory_space<vmem>>, vector<1x28x168xbf16>
    %103 = vector.shape_cast %102 : vector<1x28x168xbf16> to vector<28x168xbf16>
    %cst_89 = arith.constant dense<0.000000e+00> : vector<28x168xf32>
    %104 = tpu.matmul %101, %103, %cst_89 {dimension_numbers = #tpu.dot_dimension_numbers<[1], [0], [0], [1], [0, 0, 1, 1], [], []>} : vector<28x28xbf16>, vector<28x168xbf16>, vector<28x168xf32> -> vector<28x168xf32>
    %105 = arith.addf %98, %104 : vector<28x168xf32>
    %c0_90 = arith.constant 0 : index
    %c3_91 = arith.constant 3 : index
    %c0_92 = arith.constant 0 : index
    %106 = vector.load %arg1[%c0_90, %c3_91, %c0_92] : memref<1x32x32xf32, #tpu.memory_space<vmem>>, vector<1x28x28xf32>
    %107 = vector.shape_cast %106 : vector<1x28x28xf32> to vector<28x28xf32>
    %108 = arith.truncf %107 : vector<28x28xf32> to vector<28x28xbf16>
    %c15 = arith.constant 15 : index
    %c0_93 = arith.constant 0 : index
    %c0_94 = arith.constant 0 : index
    %109 = vector.load %arg2[%c15, %c0_93, %c0_94] : memref<25x28x168xbf16, #tpu.memory_space<vmem>>, vector<1x28x168xbf16>
    %110 = vector.shape_cast %109 : vector<1x28x168xbf16> to vector<28x168xbf16>
    %cst_95 = arith.constant dense<0.000000e+00> : vector<28x168xf32>
    %111 = tpu.matmul %108, %110, %cst_95 {dimension_numbers = #tpu.dot_dimension_numbers<[1], [0], [0], [1], [0, 0, 1, 1], [], []>} : vector<28x28xbf16>, vector<28x168xbf16>, vector<28x168xf32> -> vector<28x168xf32>
    %112 = arith.addf %105, %111 : vector<28x168xf32>
    %c0_96 = arith.constant 0 : index
    %c3_97 = arith.constant 3 : index
    %c1_98 = arith.constant 1 : index
    %113 = vector.load %arg1[%c0_96, %c3_97, %c1_98] : memref<1x32x32xf32, #tpu.memory_space<vmem>>, vector<1x28x28xf32>
    %114 = vector.shape_cast %113 : vector<1x28x28xf32> to vector<28x28xf32>
    %115 = arith.truncf %114 : vector<28x28xf32> to vector<28x28xbf16>
    %c16 = arith.constant 16 : index
    %c0_99 = arith.constant 0 : index
    %c0_100 = arith.constant 0 : index
    %116 = vector.load %arg2[%c16, %c0_99, %c0_100] : memref<25x28x168xbf16, #tpu.memory_space<vmem>>, vector<1x28x168xbf16>
    %117 = vector.shape_cast %116 : vector<1x28x168xbf16> to vector<28x168xbf16>
    %cst_101 = arith.constant dense<0.000000e+00> : vector<28x168xf32>
    %118 = tpu.matmul %115, %117, %cst_101 {dimension_numbers = #tpu.dot_dimension_numbers<[1], [0], [0], [1], [0, 0, 1, 1], [], []>} : vector<28x28xbf16>, vector<28x168xbf16>, vector<28x168xf32> -> vector<28x168xf32>
    %119 = arith.addf %112, %118 : vector<28x168xf32>
    %c0_102 = arith.constant 0 : index
    %c3_103 = arith.constant 3 : index
    %c2_104 = arith.constant 2 : index
    %120 = vector.load %arg1[%c0_102, %c3_103, %c2_104] : memref<1x32x32xf32, #tpu.memory_space<vmem>>, vector<1x28x28xf32>
    %121 = vector.shape_cast %120 : vector<1x28x28xf32> to vector<28x28xf32>
    %122 = arith.truncf %121 : vector<28x28xf32> to vector<28x28xbf16>
    %c17 = arith.constant 17 : index
    %c0_105 = arith.constant 0 : index
    %c0_106 = arith.constant 0 : index
    %123 = vector.load %arg2[%c17, %c0_105, %c0_106] : memref<25x28x168xbf16, #tpu.memory_space<vmem>>, vector<1x28x168xbf16>
    %124 = vector.shape_cast %123 : vector<1x28x168xbf16> to vector<28x168xbf16>
    %cst_107 = arith.constant dense<0.000000e+00> : vector<28x168xf32>
    %125 = tpu.matmul %122, %124, %cst_107 {dimension_numbers = #tpu.dot_dimension_numbers<[1], [0], [0], [1], [0, 0, 1, 1], [], []>} : vector<28x28xbf16>, vector<28x168xbf16>, vector<28x168xf32> -> vector<28x168xf32>
    %126 = arith.addf %119, %125 : vector<28x168xf32>
    %c0_108 = arith.constant 0 : index
    %c3_109 = arith.constant 3 : index
    %c3_110 = arith.constant 3 : index
    %127 = vector.load %arg1[%c0_108, %c3_109, %c3_110] : memref<1x32x32xf32, #tpu.memory_space<vmem>>, vector<1x28x28xf32>
    %128 = vector.shape_cast %127 : vector<1x28x28xf32> to vector<28x28xf32>
    %129 = arith.truncf %128 : vector<28x28xf32> to vector<28x28xbf16>
    %c18 = arith.constant 18 : index
    %c0_111 = arith.constant 0 : index
    %c0_112 = arith.constant 0 : index
    %130 = vector.load %arg2[%c18, %c0_111, %c0_112] : memref<25x28x168xbf16, #tpu.memory_space<vmem>>, vector<1x28x168xbf16>
    %131 = vector.shape_cast %130 : vector<1x28x168xbf16> to vector<28x168xbf16>
    %cst_113 = arith.constant dense<0.000000e+00> : vector<28x168xf32>
    %132 = tpu.matmul %129, %131, %cst_113 {dimension_numbers = #tpu.dot_dimension_numbers<[1], [0], [0], [1], [0, 0, 1, 1], [], []>} : vector<28x28xbf16>, vector<28x168xbf16>, vector<28x168xf32> -> vector<28x168xf32>
    %133 = arith.addf %126, %132 : vector<28x168xf32>
    %c0_114 = arith.constant 0 : index
    %c3_115 = arith.constant 3 : index
    %c4_116 = arith.constant 4 : index
    %134 = vector.load %arg1[%c0_114, %c3_115, %c4_116] : memref<1x32x32xf32, #tpu.memory_space<vmem>>, vector<1x28x28xf32>
    %135 = vector.shape_cast %134 : vector<1x28x28xf32> to vector<28x28xf32>
    %136 = arith.truncf %135 : vector<28x28xf32> to vector<28x28xbf16>
    %c19 = arith.constant 19 : index
    %c0_117 = arith.constant 0 : index
    %c0_118 = arith.constant 0 : index
    %137 = vector.load %arg2[%c19, %c0_117, %c0_118] : memref<25x28x168xbf16, #tpu.memory_space<vmem>>, vector<1x28x168xbf16>
    %138 = vector.shape_cast %137 : vector<1x28x168xbf16> to vector<28x168xbf16>
    %cst_119 = arith.constant dense<0.000000e+00> : vector<28x168xf32>
    %139 = tpu.matmul %136, %138, %cst_119 {dimension_numbers = #tpu.dot_dimension_numbers<[1], [0], [0], [1], [0, 0, 1, 1], [], []>} : vector<28x28xbf16>, vector<28x168xbf16>, vector<28x168xf32> -> vector<28x168xf32>
    %140 = arith.addf %133, %139 : vector<28x168xf32>
    %c0_120 = arith.constant 0 : index
    %c4_121 = arith.constant 4 : index
    %c0_122 = arith.constant 0 : index
    %141 = vector.load %arg1[%c0_120, %c4_121, %c0_122] : memref<1x32x32xf32, #tpu.memory_space<vmem>>, vector<1x28x28xf32>
    %142 = vector.shape_cast %141 : vector<1x28x28xf32> to vector<28x28xf32>
    %143 = arith.truncf %142 : vector<28x28xf32> to vector<28x28xbf16>
    %c20 = arith.constant 20 : index
    %c0_123 = arith.constant 0 : index
    %c0_124 = arith.constant 0 : index
    %144 = vector.load %arg2[%c20, %c0_123, %c0_124] : memref<25x28x168xbf16, #tpu.memory_space<vmem>>, vector<1x28x168xbf16>
    %145 = vector.shape_cast %144 : vector<1x28x168xbf16> to vector<28x168xbf16>
    %cst_125 = arith.constant dense<0.000000e+00> : vector<28x168xf32>
    %146 = tpu.matmul %143, %145, %cst_125 {dimension_numbers = #tpu.dot_dimension_numbers<[1], [0], [0], [1], [0, 0, 1, 1], [], []>} : vector<28x28xbf16>, vector<28x168xbf16>, vector<28x168xf32> -> vector<28x168xf32>
    %147 = arith.addf %140, %146 : vector<28x168xf32>
    %c0_126 = arith.constant 0 : index
    %c4_127 = arith.constant 4 : index
    %c1_128 = arith.constant 1 : index
    %148 = vector.load %arg1[%c0_126, %c4_127, %c1_128] : memref<1x32x32xf32, #tpu.memory_space<vmem>>, vector<1x28x28xf32>
    %149 = vector.shape_cast %148 : vector<1x28x28xf32> to vector<28x28xf32>
    %150 = arith.truncf %149 : vector<28x28xf32> to vector<28x28xbf16>
    %c21 = arith.constant 21 : index
    %c0_129 = arith.constant 0 : index
    %c0_130 = arith.constant 0 : index
    %151 = vector.load %arg2[%c21, %c0_129, %c0_130] : memref<25x28x168xbf16, #tpu.memory_space<vmem>>, vector<1x28x168xbf16>
    %152 = vector.shape_cast %151 : vector<1x28x168xbf16> to vector<28x168xbf16>
    %cst_131 = arith.constant dense<0.000000e+00> : vector<28x168xf32>
    %153 = tpu.matmul %150, %152, %cst_131 {dimension_numbers = #tpu.dot_dimension_numbers<[1], [0], [0], [1], [0, 0, 1, 1], [], []>} : vector<28x28xbf16>, vector<28x168xbf16>, vector<28x168xf32> -> vector<28x168xf32>
    %154 = arith.addf %147, %153 : vector<28x168xf32>
    %c0_132 = arith.constant 0 : index
    %c4_133 = arith.constant 4 : index
    %c2_134 = arith.constant 2 : index
    %155 = vector.load %arg1[%c0_132, %c4_133, %c2_134] : memref<1x32x32xf32, #tpu.memory_space<vmem>>, vector<1x28x28xf32>
    %156 = vector.shape_cast %155 : vector<1x28x28xf32> to vector<28x28xf32>
    %157 = arith.truncf %156 : vector<28x28xf32> to vector<28x28xbf16>
    %c22 = arith.constant 22 : index
    %c0_135 = arith.constant 0 : index
    %c0_136 = arith.constant 0 : index
    %158 = vector.load %arg2[%c22, %c0_135, %c0_136] : memref<25x28x168xbf16, #tpu.memory_space<vmem>>, vector<1x28x168xbf16>
    %159 = vector.shape_cast %158 : vector<1x28x168xbf16> to vector<28x168xbf16>
    %cst_137 = arith.constant dense<0.000000e+00> : vector<28x168xf32>
    %160 = tpu.matmul %157, %159, %cst_137 {dimension_numbers = #tpu.dot_dimension_numbers<[1], [0], [0], [1], [0, 0, 1, 1], [], []>} : vector<28x28xbf16>, vector<28x168xbf16>, vector<28x168xf32> -> vector<28x168xf32>
    %161 = arith.addf %154, %160 : vector<28x168xf32>
    %c0_138 = arith.constant 0 : index
    %c4_139 = arith.constant 4 : index
    %c3_140 = arith.constant 3 : index
    %162 = vector.load %arg1[%c0_138, %c4_139, %c3_140] : memref<1x32x32xf32, #tpu.memory_space<vmem>>, vector<1x28x28xf32>
    %163 = vector.shape_cast %162 : vector<1x28x28xf32> to vector<28x28xf32>
    %164 = arith.truncf %163 : vector<28x28xf32> to vector<28x28xbf16>
    %c23 = arith.constant 23 : index
    %c0_141 = arith.constant 0 : index
    %c0_142 = arith.constant 0 : index
    %165 = vector.load %arg2[%c23, %c0_141, %c0_142] : memref<25x28x168xbf16, #tpu.memory_space<vmem>>, vector<1x28x168xbf16>
    %166 = vector.shape_cast %165 : vector<1x28x168xbf16> to vector<28x168xbf16>
    %cst_143 = arith.constant dense<0.000000e+00> : vector<28x168xf32>
    %167 = tpu.matmul %164, %166, %cst_143 {dimension_numbers = #tpu.dot_dimension_numbers<[1], [0], [0], [1], [0, 0, 1, 1], [], []>} : vector<28x28xbf16>, vector<28x168xbf16>, vector<28x168xf32> -> vector<28x168xf32>
    %168 = arith.addf %161, %167 : vector<28x168xf32>
    %c0_144 = arith.constant 0 : index
    %c4_145 = arith.constant 4 : index
    %c4_146 = arith.constant 4 : index
    %169 = vector.load %arg1[%c0_144, %c4_145, %c4_146] : memref<1x32x32xf32, #tpu.memory_space<vmem>>, vector<1x28x28xf32>
    %170 = vector.shape_cast %169 : vector<1x28x28xf32> to vector<28x28xf32>
    %171 = arith.truncf %170 : vector<28x28xf32> to vector<28x28xbf16>
    %c24 = arith.constant 24 : index
    %c0_147 = arith.constant 0 : index
    %c0_148 = arith.constant 0 : index
    %172 = vector.load %arg2[%c24, %c0_147, %c0_148] : memref<25x28x168xbf16, #tpu.memory_space<vmem>>, vector<1x28x168xbf16>
    %173 = vector.shape_cast %172 : vector<1x28x168xbf16> to vector<28x168xbf16>
    %cst_149 = arith.constant dense<0.000000e+00> : vector<28x168xf32>
    %174 = tpu.matmul %171, %173, %cst_149 {dimension_numbers = #tpu.dot_dimension_numbers<[1], [0], [0], [1], [0, 0, 1, 1], [], []>} : vector<28x28xbf16>, vector<28x168xbf16>, vector<28x168xf32> -> vector<28x168xf32>
    %175 = arith.addf %168, %174 : vector<28x168xf32>
    %c0_150 = arith.constant 0 : index
    %c0_151 = arith.constant 0 : index
    %176 = vector.load %arg3[%c0_150, %c0_151] : memref<1x168xf32, #tpu.memory_space<vmem>>, vector<1x168xf32>
    %177 = vector.broadcast %176 : vector<1x168xf32> to vector<28x168xf32>
    %178 = arith.addf %175, %177 : vector<28x168xf32>
    %cst_152 = arith.constant 0.000000e+00 : f32
    %179 = vector.broadcast %cst_152 : f32 to vector<28x168xf32>
    %180 = arith.maximumf %178, %179 : vector<28x168xf32>
    %c0_153 = arith.constant 0 : index
    %c0_154 = arith.constant 0 : index
    %181 = vector.load %arg4[%c0_153, %c0_154] : memref<168x84xf32, #tpu.memory_space<vmem>>, vector<168x84xf32>
    %cst_155 = arith.constant dense<0.000000e+00> : vector<28x84xf32>
    %182 = tpu.matmul %180, %181, %cst_155 {dimension_numbers = #tpu.dot_dimension_numbers<[1], [0], [0], [1], [0, 0, 1, 1], [], []>} : vector<28x168xf32>, vector<168x84xf32>, vector<28x84xf32> -> vector<28x84xf32>
    %c0_156 = arith.constant 0 : index
    %c0_157 = arith.constant 0 : index
    %183 = vector.load %arg5[%c0_156, %c0_157] : memref<168x84xf32, #tpu.memory_space<vmem>>, vector<168x84xf32>
    %cst_158 = arith.constant dense<0.000000e+00> : vector<28x84xf32>
    %184 = tpu.matmul %180, %183, %cst_158 {dimension_numbers = #tpu.dot_dimension_numbers<[1], [0], [0], [1], [0, 0, 1, 1], [], []>} : vector<28x168xf32>, vector<168x84xf32>, vector<28x84xf32> -> vector<28x84xf32>
    %185 = arith.maximumf %182, %184 : vector<28x84xf32>
    %c0_159 = arith.constant 0 : index
    %c0_160 = arith.constant 0 : index
    %186 = vector.load %arg6[%c0_159, %c0_160] : memref<14x28xf32, #tpu.memory_space<vmem>>, vector<14x28xf32>
    %cst_161 = arith.constant dense<0.000000e+00> : vector<14x84xf32>
    %187 = tpu.matmul %186, %185, %cst_161 {dimension_numbers = #tpu.dot_dimension_numbers<[1], [0], [0], [1], [0, 0, 1, 1], [], []>} : vector<14x28xf32>, vector<28x84xf32>, vector<14x84xf32> -> vector<14x84xf32>
    %c0_162 = arith.constant 0 : index
    %c0_163 = arith.constant 0 : index
    %188 = vector.load %arg7[%c0_162, %c0_163] : memref<14x28xf32, #tpu.memory_space<vmem>>, vector<14x28xf32>
    %cst_164 = arith.constant dense<0.000000e+00> : vector<14x84xf32>
    %189 = tpu.matmul %188, %185, %cst_164 {dimension_numbers = #tpu.dot_dimension_numbers<[1], [0], [0], [1], [0, 0, 1, 1], [], []>} : vector<14x28xf32>, vector<28x84xf32>, vector<14x84xf32> -> vector<14x84xf32>
    %190 = arith.maximumf %187, %189 : vector<14x84xf32>
    %cst_165 = arith.constant 0.000000e+00 : f32
    %191 = vector.broadcast %cst_165 : f32 to vector<10x160xf32>
    %192 = vector.extract_strided_slice %190 {offsets = [0, 0], sizes = [10, 60], strides = [1, 1]} : vector<14x84xf32> to vector<10x60xf32>
    %193 = arith.truncf %192 : vector<10x60xf32> to vector<10x60xbf16>
    %c0_166 = arith.constant 0 : index
    %c0_167 = arith.constant 0 : index
    %c0_168 = arith.constant 0 : index
    %194 = vector.load %arg8[%c0_166, %c0_167, %c0_168] : memref<25x60x160xbf16, #tpu.memory_space<vmem>>, vector<1x60x160xbf16>
    %195 = vector.shape_cast %194 : vector<1x60x160xbf16> to vector<60x160xbf16>
    %cst_169 = arith.constant dense<0.000000e+00> : vector<10x160xf32>
    %196 = tpu.matmul %193, %195, %cst_169 {dimension_numbers = #tpu.dot_dimension_numbers<[1], [0], [0], [1], [0, 0, 1, 1], [], []>} : vector<10x60xbf16>, vector<60x160xbf16>, vector<10x160xf32> -> vector<10x160xf32>
    %197 = arith.addf %191, %196 : vector<10x160xf32>
    %198 = vector.extract_strided_slice %190 {offsets = [0, 6], sizes = [10, 60], strides = [1, 1]} : vector<14x84xf32> to vector<10x60xf32>
    %199 = arith.truncf %198 : vector<10x60xf32> to vector<10x60xbf16>
    %c1_170 = arith.constant 1 : index
    %c0_171 = arith.constant 0 : index
    %c0_172 = arith.constant 0 : index
    %200 = vector.load %arg8[%c1_170, %c0_171, %c0_172] : memref<25x60x160xbf16, #tpu.memory_space<vmem>>, vector<1x60x160xbf16>
    %201 = vector.shape_cast %200 : vector<1x60x160xbf16> to vector<60x160xbf16>
    %cst_173 = arith.constant dense<0.000000e+00> : vector<10x160xf32>
    %202 = tpu.matmul %199, %201, %cst_173 {dimension_numbers = #tpu.dot_dimension_numbers<[1], [0], [0], [1], [0, 0, 1, 1], [], []>} : vector<10x60xbf16>, vector<60x160xbf16>, vector<10x160xf32> -> vector<10x160xf32>
    %203 = arith.addf %197, %202 : vector<10x160xf32>
    %204 = vector.extract_strided_slice %190 {offsets = [0, 12], sizes = [10, 60], strides = [1, 1]} : vector<14x84xf32> to vector<10x60xf32>
    %205 = arith.truncf %204 : vector<10x60xf32> to vector<10x60xbf16>
    %c2_174 = arith.constant 2 : index
    %c0_175 = arith.constant 0 : index
    %c0_176 = arith.constant 0 : index
    %206 = vector.load %arg8[%c2_174, %c0_175, %c0_176] : memref<25x60x160xbf16, #tpu.memory_space<vmem>>, vector<1x60x160xbf16>
    %207 = vector.shape_cast %206 : vector<1x60x160xbf16> to vector<60x160xbf16>
    %cst_177 = arith.constant dense<0.000000e+00> : vector<10x160xf32>
    %208 = tpu.matmul %205, %207, %cst_177 {dimension_numbers = #tpu.dot_dimension_numbers<[1], [0], [0], [1], [0, 0, 1, 1], [], []>} : vector<10x60xbf16>, vector<60x160xbf16>, vector<10x160xf32> -> vector<10x160xf32>
    %209 = arith.addf %203, %208 : vector<10x160xf32>
    %210 = vector.extract_strided_slice %190 {offsets = [0, 18], sizes = [10, 60], strides = [1, 1]} : vector<14x84xf32> to vector<10x60xf32>
    %211 = arith.truncf %210 : vector<10x60xf32> to vector<10x60xbf16>
    %c3_178 = arith.constant 3 : index
    %c0_179 = arith.constant 0 : index
    %c0_180 = arith.constant 0 : index
    %212 = vector.load %arg8[%c3_178, %c0_179, %c0_180] : memref<25x60x160xbf16, #tpu.memory_space<vmem>>, vector<1x60x160xbf16>
    %213 = vector.shape_cast %212 : vector<1x60x160xbf16> to vector<60x160xbf16>
    %cst_181 = arith.constant dense<0.000000e+00> : vector<10x160xf32>
    %214 = tpu.matmul %211, %213, %cst_181 {dimension_numbers = #tpu.dot_dimension_numbers<[1], [0], [0], [1], [0, 0, 1, 1], [], []>} : vector<10x60xbf16>, vector<60x160xbf16>, vector<10x160xf32> -> vector<10x160xf32>
    %215 = arith.addf %209, %214 : vector<10x160xf32>
    %216 = vector.extract_strided_slice %190 {offsets = [0, 24], sizes = [10, 60], strides = [1, 1]} : vector<14x84xf32> to vector<10x60xf32>
    %217 = arith.truncf %216 : vector<10x60xf32> to vector<10x60xbf16>
    %c4_182 = arith.constant 4 : index
    %c0_183 = arith.constant 0 : index
    %c0_184 = arith.constant 0 : index
    %218 = vector.load %arg8[%c4_182, %c0_183, %c0_184] : memref<25x60x160xbf16, #tpu.memory_space<vmem>>, vector<1x60x160xbf16>
    %219 = vector.shape_cast %218 : vector<1x60x160xbf16> to vector<60x160xbf16>
    %cst_185 = arith.constant dense<0.000000e+00> : vector<10x160xf32>
    %220 = tpu.matmul %217, %219, %cst_185 {dimension_numbers = #tpu.dot_dimension_numbers<[1], [0], [0], [1], [0, 0, 1, 1], [], []>} : vector<10x60xbf16>, vector<60x160xbf16>, vector<10x160xf32> -> vector<10x160xf32>
    %221 = arith.addf %215, %220 : vector<10x160xf32>
    %222 = vector.extract_strided_slice %190 {offsets = [1, 0], sizes = [10, 60], strides = [1, 1]} : vector<14x84xf32> to vector<10x60xf32>
    %223 = arith.truncf %222 : vector<10x60xf32> to vector<10x60xbf16>
    %c5_186 = arith.constant 5 : index
    %c0_187 = arith.constant 0 : index
    %c0_188 = arith.constant 0 : index
    %224 = vector.load %arg8[%c5_186, %c0_187, %c0_188] : memref<25x60x160xbf16, #tpu.memory_space<vmem>>, vector<1x60x160xbf16>
    %225 = vector.shape_cast %224 : vector<1x60x160xbf16> to vector<60x160xbf16>
    %cst_189 = arith.constant dense<0.000000e+00> : vector<10x160xf32>
    %226 = tpu.matmul %223, %225, %cst_189 {dimension_numbers = #tpu.dot_dimension_numbers<[1], [0], [0], [1], [0, 0, 1, 1], [], []>} : vector<10x60xbf16>, vector<60x160xbf16>, vector<10x160xf32> -> vector<10x160xf32>
    %227 = arith.addf %221, %226 : vector<10x160xf32>
    %228 = vector.extract_strided_slice %190 {offsets = [1, 6], sizes = [10, 60], strides = [1, 1]} : vector<14x84xf32> to vector<10x60xf32>
    %229 = arith.truncf %228 : vector<10x60xf32> to vector<10x60xbf16>
    %c6_190 = arith.constant 6 : index
    %c0_191 = arith.constant 0 : index
    %c0_192 = arith.constant 0 : index
    %230 = vector.load %arg8[%c6_190, %c0_191, %c0_192] : memref<25x60x160xbf16, #tpu.memory_space<vmem>>, vector<1x60x160xbf16>
    %231 = vector.shape_cast %230 : vector<1x60x160xbf16> to vector<60x160xbf16>
    %cst_193 = arith.constant dense<0.000000e+00> : vector<10x160xf32>
    %232 = tpu.matmul %229, %231, %cst_193 {dimension_numbers = #tpu.dot_dimension_numbers<[1], [0], [0], [1], [0, 0, 1, 1], [], []>} : vector<10x60xbf16>, vector<60x160xbf16>, vector<10x160xf32> -> vector<10x160xf32>
    %233 = arith.addf %227, %232 : vector<10x160xf32>
    %234 = vector.extract_strided_slice %190 {offsets = [1, 12], sizes = [10, 60], strides = [1, 1]} : vector<14x84xf32> to vector<10x60xf32>
    %235 = arith.truncf %234 : vector<10x60xf32> to vector<10x60xbf16>
    %c7_194 = arith.constant 7 : index
    %c0_195 = arith.constant 0 : index
    %c0_196 = arith.constant 0 : index
    %236 = vector.load %arg8[%c7_194, %c0_195, %c0_196] : memref<25x60x160xbf16, #tpu.memory_space<vmem>>, vector<1x60x160xbf16>
    %237 = vector.shape_cast %236 : vector<1x60x160xbf16> to vector<60x160xbf16>
    %cst_197 = arith.constant dense<0.000000e+00> : vector<10x160xf32>
    %238 = tpu.matmul %235, %237, %cst_197 {dimension_numbers = #tpu.dot_dimension_numbers<[1], [0], [0], [1], [0, 0, 1, 1], [], []>} : vector<10x60xbf16>, vector<60x160xbf16>, vector<10x160xf32> -> vector<10x160xf32>
    %239 = arith.addf %233, %238 : vector<10x160xf32>
    %240 = vector.extract_strided_slice %190 {offsets = [1, 18], sizes = [10, 60], strides = [1, 1]} : vector<14x84xf32> to vector<10x60xf32>
    %241 = arith.truncf %240 : vector<10x60xf32> to vector<10x60xbf16>
    %c8_198 = arith.constant 8 : index
    %c0_199 = arith.constant 0 : index
    %c0_200 = arith.constant 0 : index
    %242 = vector.load %arg8[%c8_198, %c0_199, %c0_200] : memref<25x60x160xbf16, #tpu.memory_space<vmem>>, vector<1x60x160xbf16>
    %243 = vector.shape_cast %242 : vector<1x60x160xbf16> to vector<60x160xbf16>
    %cst_201 = arith.constant dense<0.000000e+00> : vector<10x160xf32>
    %244 = tpu.matmul %241, %243, %cst_201 {dimension_numbers = #tpu.dot_dimension_numbers<[1], [0], [0], [1], [0, 0, 1, 1], [], []>} : vector<10x60xbf16>, vector<60x160xbf16>, vector<10x160xf32> -> vector<10x160xf32>
    %245 = arith.addf %239, %244 : vector<10x160xf32>
    %246 = vector.extract_strided_slice %190 {offsets = [1, 24], sizes = [10, 60], strides = [1, 1]} : vector<14x84xf32> to vector<10x60xf32>
    %247 = arith.truncf %246 : vector<10x60xf32> to vector<10x60xbf16>
    %c9_202 = arith.constant 9 : index
    %c0_203 = arith.constant 0 : index
    %c0_204 = arith.constant 0 : index
    %248 = vector.load %arg8[%c9_202, %c0_203, %c0_204] : memref<25x60x160xbf16, #tpu.memory_space<vmem>>, vector<1x60x160xbf16>
    %249 = vector.shape_cast %248 : vector<1x60x160xbf16> to vector<60x160xbf16>
    %cst_205 = arith.constant dense<0.000000e+00> : vector<10x160xf32>
    %250 = tpu.matmul %247, %249, %cst_205 {dimension_numbers = #tpu.dot_dimension_numbers<[1], [0], [0], [1], [0, 0, 1, 1], [], []>} : vector<10x60xbf16>, vector<60x160xbf16>, vector<10x160xf32> -> vector<10x160xf32>
    %251 = arith.addf %245, %250 : vector<10x160xf32>
    %252 = vector.extract_strided_slice %190 {offsets = [2, 0], sizes = [10, 60], strides = [1, 1]} : vector<14x84xf32> to vector<10x60xf32>
    %253 = arith.truncf %252 : vector<10x60xf32> to vector<10x60xbf16>
    %c10_206 = arith.constant 10 : index
    %c0_207 = arith.constant 0 : index
    %c0_208 = arith.constant 0 : index
    %254 = vector.load %arg8[%c10_206, %c0_207, %c0_208] : memref<25x60x160xbf16, #tpu.memory_space<vmem>>, vector<1x60x160xbf16>
    %255 = vector.shape_cast %254 : vector<1x60x160xbf16> to vector<60x160xbf16>
    %cst_209 = arith.constant dense<0.000000e+00> : vector<10x160xf32>
    %256 = tpu.matmul %253, %255, %cst_209 {dimension_numbers = #tpu.dot_dimension_numbers<[1], [0], [0], [1], [0, 0, 1, 1], [], []>} : vector<10x60xbf16>, vector<60x160xbf16>, vector<10x160xf32> -> vector<10x160xf32>
    %257 = arith.addf %251, %256 : vector<10x160xf32>
    %258 = vector.extract_strided_slice %190 {offsets = [2, 6], sizes = [10, 60], strides = [1, 1]} : vector<14x84xf32> to vector<10x60xf32>
    %259 = arith.truncf %258 : vector<10x60xf32> to vector<10x60xbf16>
    %c11_210 = arith.constant 11 : index
    %c0_211 = arith.constant 0 : index
    %c0_212 = arith.constant 0 : index
    %260 = vector.load %arg8[%c11_210, %c0_211, %c0_212] : memref<25x60x160xbf16, #tpu.memory_space<vmem>>, vector<1x60x160xbf16>
    %261 = vector.shape_cast %260 : vector<1x60x160xbf16> to vector<60x160xbf16>
    %cst_213 = arith.constant dense<0.000000e+00> : vector<10x160xf32>
    %262 = tpu.matmul %259, %261, %cst_213 {dimension_numbers = #tpu.dot_dimension_numbers<[1], [0], [0], [1], [0, 0, 1, 1], [], []>} : vector<10x60xbf16>, vector<60x160xbf16>, vector<10x160xf32> -> vector<10x160xf32>
    %263 = arith.addf %257, %262 : vector<10x160xf32>
    %264 = vector.extract_strided_slice %190 {offsets = [2, 12], sizes = [10, 60], strides = [1, 1]} : vector<14x84xf32> to vector<10x60xf32>
    %265 = arith.truncf %264 : vector<10x60xf32> to vector<10x60xbf16>
    %c12_214 = arith.constant 12 : index
    %c0_215 = arith.constant 0 : index
    %c0_216 = arith.constant 0 : index
    %266 = vector.load %arg8[%c12_214, %c0_215, %c0_216] : memref<25x60x160xbf16, #tpu.memory_space<vmem>>, vector<1x60x160xbf16>
    %267 = vector.shape_cast %266 : vector<1x60x160xbf16> to vector<60x160xbf16>
    %cst_217 = arith.constant dense<0.000000e+00> : vector<10x160xf32>
    %268 = tpu.matmul %265, %267, %cst_217 {dimension_numbers = #tpu.dot_dimension_numbers<[1], [0], [0], [1], [0, 0, 1, 1], [], []>} : vector<10x60xbf16>, vector<60x160xbf16>, vector<10x160xf32> -> vector<10x160xf32>
    %269 = arith.addf %263, %268 : vector<10x160xf32>
    %270 = vector.extract_strided_slice %190 {offsets = [2, 18], sizes = [10, 60], strides = [1, 1]} : vector<14x84xf32> to vector<10x60xf32>
    %271 = arith.truncf %270 : vector<10x60xf32> to vector<10x60xbf16>
    %c13_218 = arith.constant 13 : index
    %c0_219 = arith.constant 0 : index
    %c0_220 = arith.constant 0 : index
    %272 = vector.load %arg8[%c13_218, %c0_219, %c0_220] : memref<25x60x160xbf16, #tpu.memory_space<vmem>>, vector<1x60x160xbf16>
    %273 = vector.shape_cast %272 : vector<1x60x160xbf16> to vector<60x160xbf16>
    %cst_221 = arith.constant dense<0.000000e+00> : vector<10x160xf32>
    %274 = tpu.matmul %271, %273, %cst_221 {dimension_numbers = #tpu.dot_dimension_numbers<[1], [0], [0], [1], [0, 0, 1, 1], [], []>} : vector<10x60xbf16>, vector<60x160xbf16>, vector<10x160xf32> -> vector<10x160xf32>
    %275 = arith.addf %269, %274 : vector<10x160xf32>
    %276 = vector.extract_strided_slice %190 {offsets = [2, 24], sizes = [10, 60], strides = [1, 1]} : vector<14x84xf32> to vector<10x60xf32>
    %277 = arith.truncf %276 : vector<10x60xf32> to vector<10x60xbf16>
    %c14_222 = arith.constant 14 : index
    %c0_223 = arith.constant 0 : index
    %c0_224 = arith.constant 0 : index
    %278 = vector.load %arg8[%c14_222, %c0_223, %c0_224] : memref<25x60x160xbf16, #tpu.memory_space<vmem>>, vector<1x60x160xbf16>
    %279 = vector.shape_cast %278 : vector<1x60x160xbf16> to vector<60x160xbf16>
    %cst_225 = arith.constant dense<0.000000e+00> : vector<10x160xf32>
    %280 = tpu.matmul %277, %279, %cst_225 {dimension_numbers = #tpu.dot_dimension_numbers<[1], [0], [0], [1], [0, 0, 1, 1], [], []>} : vector<10x60xbf16>, vector<60x160xbf16>, vector<10x160xf32> -> vector<10x160xf32>
    %281 = arith.addf %275, %280 : vector<10x160xf32>
    %282 = vector.extract_strided_slice %190 {offsets = [3, 0], sizes = [10, 60], strides = [1, 1]} : vector<14x84xf32> to vector<10x60xf32>
    %283 = arith.truncf %282 : vector<10x60xf32> to vector<10x60xbf16>
    %c15_226 = arith.constant 15 : index
    %c0_227 = arith.constant 0 : index
    %c0_228 = arith.constant 0 : index
    %284 = vector.load %arg8[%c15_226, %c0_227, %c0_228] : memref<25x60x160xbf16, #tpu.memory_space<vmem>>, vector<1x60x160xbf16>
    %285 = vector.shape_cast %284 : vector<1x60x160xbf16> to vector<60x160xbf16>
    %cst_229 = arith.constant dense<0.000000e+00> : vector<10x160xf32>
    %286 = tpu.matmul %283, %285, %cst_229 {dimension_numbers = #tpu.dot_dimension_numbers<[1], [0], [0], [1], [0, 0, 1, 1], [], []>} : vector<10x60xbf16>, vector<60x160xbf16>, vector<10x160xf32> -> vector<10x160xf32>
    %287 = arith.addf %281, %286 : vector<10x160xf32>
    %288 = vector.extract_strided_slice %190 {offsets = [3, 6], sizes = [10, 60], strides = [1, 1]} : vector<14x84xf32> to vector<10x60xf32>
    %289 = arith.truncf %288 : vector<10x60xf32> to vector<10x60xbf16>
    %c16_230 = arith.constant 16 : index
    %c0_231 = arith.constant 0 : index
    %c0_232 = arith.constant 0 : index
    %290 = vector.load %arg8[%c16_230, %c0_231, %c0_232] : memref<25x60x160xbf16, #tpu.memory_space<vmem>>, vector<1x60x160xbf16>
    %291 = vector.shape_cast %290 : vector<1x60x160xbf16> to vector<60x160xbf16>
    %cst_233 = arith.constant dense<0.000000e+00> : vector<10x160xf32>
    %292 = tpu.matmul %289, %291, %cst_233 {dimension_numbers = #tpu.dot_dimension_numbers<[1], [0], [0], [1], [0, 0, 1, 1], [], []>} : vector<10x60xbf16>, vector<60x160xbf16>, vector<10x160xf32> -> vector<10x160xf32>
    %293 = arith.addf %287, %292 : vector<10x160xf32>
    %294 = vector.extract_strided_slice %190 {offsets = [3, 12], sizes = [10, 60], strides = [1, 1]} : vector<14x84xf32> to vector<10x60xf32>
    %295 = arith.truncf %294 : vector<10x60xf32> to vector<10x60xbf16>
    %c17_234 = arith.constant 17 : index
    %c0_235 = arith.constant 0 : index
    %c0_236 = arith.constant 0 : index
    %296 = vector.load %arg8[%c17_234, %c0_235, %c0_236] : memref<25x60x160xbf16, #tpu.memory_space<vmem>>, vector<1x60x160xbf16>
    %297 = vector.shape_cast %296 : vector<1x60x160xbf16> to vector<60x160xbf16>
    %cst_237 = arith.constant dense<0.000000e+00> : vector<10x160xf32>
    %298 = tpu.matmul %295, %297, %cst_237 {dimension_numbers = #tpu.dot_dimension_numbers<[1], [0], [0], [1], [0, 0, 1, 1], [], []>} : vector<10x60xbf16>, vector<60x160xbf16>, vector<10x160xf32> -> vector<10x160xf32>
    %299 = arith.addf %293, %298 : vector<10x160xf32>
    %300 = vector.extract_strided_slice %190 {offsets = [3, 18], sizes = [10, 60], strides = [1, 1]} : vector<14x84xf32> to vector<10x60xf32>
    %301 = arith.truncf %300 : vector<10x60xf32> to vector<10x60xbf16>
    %c18_238 = arith.constant 18 : index
    %c0_239 = arith.constant 0 : index
    %c0_240 = arith.constant 0 : index
    %302 = vector.load %arg8[%c18_238, %c0_239, %c0_240] : memref<25x60x160xbf16, #tpu.memory_space<vmem>>, vector<1x60x160xbf16>
    %303 = vector.shape_cast %302 : vector<1x60x160xbf16> to vector<60x160xbf16>
    %cst_241 = arith.constant dense<0.000000e+00> : vector<10x160xf32>
    %304 = tpu.matmul %301, %303, %cst_241 {dimension_numbers = #tpu.dot_dimension_numbers<[1], [0], [0], [1], [0, 0, 1, 1], [], []>} : vector<10x60xbf16>, vector<60x160xbf16>, vector<10x160xf32> -> vector<10x160xf32>
    %305 = arith.addf %299, %304 : vector<10x160xf32>
    %306 = vector.extract_strided_slice %190 {offsets = [3, 24], sizes = [10, 60], strides = [1, 1]} : vector<14x84xf32> to vector<10x60xf32>
    %307 = arith.truncf %306 : vector<10x60xf32> to vector<10x60xbf16>
    %c19_242 = arith.constant 19 : index
    %c0_243 = arith.constant 0 : index
    %c0_244 = arith.constant 0 : index
    %308 = vector.load %arg8[%c19_242, %c0_243, %c0_244] : memref<25x60x160xbf16, #tpu.memory_space<vmem>>, vector<1x60x160xbf16>
    %309 = vector.shape_cast %308 : vector<1x60x160xbf16> to vector<60x160xbf16>
    %cst_245 = arith.constant dense<0.000000e+00> : vector<10x160xf32>
    %310 = tpu.matmul %307, %309, %cst_245 {dimension_numbers = #tpu.dot_dimension_numbers<[1], [0], [0], [1], [0, 0, 1, 1], [], []>} : vector<10x60xbf16>, vector<60x160xbf16>, vector<10x160xf32> -> vector<10x160xf32>
    %311 = arith.addf %305, %310 : vector<10x160xf32>
    %312 = vector.extract_strided_slice %190 {offsets = [4, 0], sizes = [10, 60], strides = [1, 1]} : vector<14x84xf32> to vector<10x60xf32>
    %313 = arith.truncf %312 : vector<10x60xf32> to vector<10x60xbf16>
    %c20_246 = arith.constant 20 : index
    %c0_247 = arith.constant 0 : index
    %c0_248 = arith.constant 0 : index
    %314 = vector.load %arg8[%c20_246, %c0_247, %c0_248] : memref<25x60x160xbf16, #tpu.memory_space<vmem>>, vector<1x60x160xbf16>
    %315 = vector.shape_cast %314 : vector<1x60x160xbf16> to vector<60x160xbf16>
    %cst_249 = arith.constant dense<0.000000e+00> : vector<10x160xf32>
    %316 = tpu.matmul %313, %315, %cst_249 {dimension_numbers = #tpu.dot_dimension_numbers<[1], [0], [0], [1], [0, 0, 1, 1], [], []>} : vector<10x60xbf16>, vector<60x160xbf16>, vector<10x160xf32> -> vector<10x160xf32>
    %317 = arith.addf %311, %316 : vector<10x160xf32>
    %318 = vector.extract_strided_slice %190 {offsets = [4, 6], sizes = [10, 60], strides = [1, 1]} : vector<14x84xf32> to vector<10x60xf32>
    %319 = arith.truncf %318 : vector<10x60xf32> to vector<10x60xbf16>
    %c21_250 = arith.constant 21 : index
    %c0_251 = arith.constant 0 : index
    %c0_252 = arith.constant 0 : index
    %320 = vector.load %arg8[%c21_250, %c0_251, %c0_252] : memref<25x60x160xbf16, #tpu.memory_space<vmem>>, vector<1x60x160xbf16>
    %321 = vector.shape_cast %320 : vector<1x60x160xbf16> to vector<60x160xbf16>
    %cst_253 = arith.constant dense<0.000000e+00> : vector<10x160xf32>
    %322 = tpu.matmul %319, %321, %cst_253 {dimension_numbers = #tpu.dot_dimension_numbers<[1], [0], [0], [1], [0, 0, 1, 1], [], []>} : vector<10x60xbf16>, vector<60x160xbf16>, vector<10x160xf32> -> vector<10x160xf32>
    %323 = arith.addf %317, %322 : vector<10x160xf32>
    %324 = vector.extract_strided_slice %190 {offsets = [4, 12], sizes = [10, 60], strides = [1, 1]} : vector<14x84xf32> to vector<10x60xf32>
    %325 = arith.truncf %324 : vector<10x60xf32> to vector<10x60xbf16>
    %c22_254 = arith.constant 22 : index
    %c0_255 = arith.constant 0 : index
    %c0_256 = arith.constant 0 : index
    %326 = vector.load %arg8[%c22_254, %c0_255, %c0_256] : memref<25x60x160xbf16, #tpu.memory_space<vmem>>, vector<1x60x160xbf16>
    %327 = vector.shape_cast %326 : vector<1x60x160xbf16> to vector<60x160xbf16>
    %cst_257 = arith.constant dense<0.000000e+00> : vector<10x160xf32>
    %328 = tpu.matmul %325, %327, %cst_257 {dimension_numbers = #tpu.dot_dimension_numbers<[1], [0], [0], [1], [0, 0, 1, 1], [], []>} : vector<10x60xbf16>, vector<60x160xbf16>, vector<10x160xf32> -> vector<10x160xf32>
    %329 = arith.addf %323, %328 : vector<10x160xf32>
    %330 = vector.extract_strided_slice %190 {offsets = [4, 18], sizes = [10, 60], strides = [1, 1]} : vector<14x84xf32> to vector<10x60xf32>
    %331 = arith.truncf %330 : vector<10x60xf32> to vector<10x60xbf16>
    %c23_258 = arith.constant 23 : index
    %c0_259 = arith.constant 0 : index
    %c0_260 = arith.constant 0 : index
    %332 = vector.load %arg8[%c23_258, %c0_259, %c0_260] : memref<25x60x160xbf16, #tpu.memory_space<vmem>>, vector<1x60x160xbf16>
    %333 = vector.shape_cast %332 : vector<1x60x160xbf16> to vector<60x160xbf16>
    %cst_261 = arith.constant dense<0.000000e+00> : vector<10x160xf32>
    %334 = tpu.matmul %331, %333, %cst_261 {dimension_numbers = #tpu.dot_dimension_numbers<[1], [0], [0], [1], [0, 0, 1, 1], [], []>} : vector<10x60xbf16>, vector<60x160xbf16>, vector<10x160xf32> -> vector<10x160xf32>
    %335 = arith.addf %329, %334 : vector<10x160xf32>
    %336 = vector.extract_strided_slice %190 {offsets = [4, 24], sizes = [10, 60], strides = [1, 1]} : vector<14x84xf32> to vector<10x60xf32>
    %337 = arith.truncf %336 : vector<10x60xf32> to vector<10x60xbf16>
    %c24_262 = arith.constant 24 : index
    %c0_263 = arith.constant 0 : index
    %c0_264 = arith.constant 0 : index
    %338 = vector.load %arg8[%c24_262, %c0_263, %c0_264] : memref<25x60x160xbf16, #tpu.memory_space<vmem>>, vector<1x60x160xbf16>
    %339 = vector.shape_cast %338 : vector<1x60x160xbf16> to vector<60x160xbf16>
    %cst_265 = arith.constant dense<0.000000e+00> : vector<10x160xf32>
    %340 = tpu.matmul %337, %339, %cst_265 {dimension_numbers = #tpu.dot_dimension_numbers<[1], [0], [0], [1], [0, 0, 1, 1], [], []>} : vector<10x60xbf16>, vector<60x160xbf16>, vector<10x160xf32> -> vector<10x160xf32>
    %341 = arith.addf %335, %340 : vector<10x160xf32>
    %c0_266 = arith.constant 0 : index
    %c0_267 = arith.constant 0 : index
    %342 = vector.load %arg9[%c0_266, %c0_267] : memref<1x160xf32, #tpu.memory_space<vmem>>, vector<1x160xf32>
    %343 = vector.broadcast %342 : vector<1x160xf32> to vector<10x160xf32>
    %344 = arith.addf %341, %343 : vector<10x160xf32>
    %cst_268 = arith.constant 0.000000e+00 : f32
    %345 = vector.broadcast %cst_268 : f32 to vector<10x160xf32>
    %346 = arith.maximumf %344, %345 : vector<10x160xf32>
    %c0_269 = arith.constant 0 : index
    %c0_270 = arith.constant 0 : index
    %347 = vector.load %arg10[%c0_269, %c0_270] : memref<160x80xf32, #tpu.memory_space<vmem>>, vector<160x80xf32>
    %cst_271 = arith.constant dense<0.000000e+00> : vector<10x80xf32>
    %348 = tpu.matmul %346, %347, %cst_271 {dimension_numbers = #tpu.dot_dimension_numbers<[1], [0], [0], [1], [0, 0, 1, 1], [], []>} : vector<10x160xf32>, vector<160x80xf32>, vector<10x80xf32> -> vector<10x80xf32>
    %c0_272 = arith.constant 0 : index
    %c0_273 = arith.constant 0 : index
    %349 = vector.load %arg11[%c0_272, %c0_273] : memref<160x80xf32, #tpu.memory_space<vmem>>, vector<160x80xf32>
    %cst_274 = arith.constant dense<0.000000e+00> : vector<10x80xf32>
    %350 = tpu.matmul %346, %349, %cst_274 {dimension_numbers = #tpu.dot_dimension_numbers<[1], [0], [0], [1], [0, 0, 1, 1], [], []>} : vector<10x160xf32>, vector<160x80xf32>, vector<10x80xf32> -> vector<10x80xf32>
    %351 = arith.maximumf %348, %350 : vector<10x80xf32>
    %c0_275 = arith.constant 0 : index
    %c0_276 = arith.constant 0 : index
    %352 = vector.load %arg12[%c0_275, %c0_276] : memref<5x10xf32, #tpu.memory_space<vmem>>, vector<5x10xf32>
    %cst_277 = arith.constant dense<0.000000e+00> : vector<5x80xf32>
    %353 = tpu.matmul %352, %351, %cst_277 {dimension_numbers = #tpu.dot_dimension_numbers<[1], [0], [0], [1], [0, 0, 1, 1], [], []>} : vector<5x10xf32>, vector<10x80xf32>, vector<5x80xf32> -> vector<5x80xf32>
    %c0_278 = arith.constant 0 : index
    %c0_279 = arith.constant 0 : index
    %354 = vector.load %arg13[%c0_278, %c0_279] : memref<5x10xf32, #tpu.memory_space<vmem>>, vector<5x10xf32>
    %cst_280 = arith.constant dense<0.000000e+00> : vector<5x80xf32>
    %355 = tpu.matmul %354, %351, %cst_280 {dimension_numbers = #tpu.dot_dimension_numbers<[1], [0], [0], [1], [0, 0, 1, 1], [], []>} : vector<5x10xf32>, vector<10x80xf32>, vector<5x80xf32> -> vector<5x80xf32>
    %356 = arith.maximumf %353, %355 : vector<5x80xf32>
    %cst_281 = arith.constant 0.000000e+00 : f32
    %357 = vector.broadcast %cst_281 : f32 to vector<1x120xf32>
    %358 = vector.extract_strided_slice %356 {offsets = [0, 0], sizes = [1, 80], strides = [1, 1]} : vector<5x80xf32> to vector<1x80xf32>
    %359 = arith.truncf %358 : vector<1x80xf32> to vector<1x80xbf16>
    %c0_282 = arith.constant 0 : index
    %c0_283 = arith.constant 0 : index
    %c0_284 = arith.constant 0 : index
    %360 = vector.load %arg14[%c0_282, %c0_283, %c0_284] : memref<5x80x120xbf16, #tpu.memory_space<vmem>>, vector<1x80x120xbf16>
    %361 = vector.shape_cast %360 : vector<1x80x120xbf16> to vector<80x120xbf16>
    %cst_285 = arith.constant dense<0.000000e+00> : vector<1x120xf32>
    %362 = tpu.matmul %359, %361, %cst_285 {dimension_numbers = #tpu.dot_dimension_numbers<[1], [0], [0], [1], [0, 0, 1, 1], [], []>} : vector<1x80xbf16>, vector<80x120xbf16>, vector<1x120xf32> -> vector<1x120xf32>
    %363 = arith.addf %357, %362 : vector<1x120xf32>
    %364 = vector.extract_strided_slice %356 {offsets = [1, 0], sizes = [1, 80], strides = [1, 1]} : vector<5x80xf32> to vector<1x80xf32>
    %365 = arith.truncf %364 : vector<1x80xf32> to vector<1x80xbf16>
    %c1_286 = arith.constant 1 : index
    %c0_287 = arith.constant 0 : index
    %c0_288 = arith.constant 0 : index
    %366 = vector.load %arg14[%c1_286, %c0_287, %c0_288] : memref<5x80x120xbf16, #tpu.memory_space<vmem>>, vector<1x80x120xbf16>
    %367 = vector.shape_cast %366 : vector<1x80x120xbf16> to vector<80x120xbf16>
    %cst_289 = arith.constant dense<0.000000e+00> : vector<1x120xf32>
    %368 = tpu.matmul %365, %367, %cst_289 {dimension_numbers = #tpu.dot_dimension_numbers<[1], [0], [0], [1], [0, 0, 1, 1], [], []>} : vector<1x80xbf16>, vector<80x120xbf16>, vector<1x120xf32> -> vector<1x120xf32>
    %369 = arith.addf %363, %368 : vector<1x120xf32>
    %370 = vector.extract_strided_slice %356 {offsets = [2, 0], sizes = [1, 80], strides = [1, 1]} : vector<5x80xf32> to vector<1x80xf32>
    %371 = arith.truncf %370 : vector<1x80xf32> to vector<1x80xbf16>
    %c2_290 = arith.constant 2 : index
    %c0_291 = arith.constant 0 : index
    %c0_292 = arith.constant 0 : index
    %372 = vector.load %arg14[%c2_290, %c0_291, %c0_292] : memref<5x80x120xbf16, #tpu.memory_space<vmem>>, vector<1x80x120xbf16>
    %373 = vector.shape_cast %372 : vector<1x80x120xbf16> to vector<80x120xbf16>
    %cst_293 = arith.constant dense<0.000000e+00> : vector<1x120xf32>
    %374 = tpu.matmul %371, %373, %cst_293 {dimension_numbers = #tpu.dot_dimension_numbers<[1], [0], [0], [1], [0, 0, 1, 1], [], []>} : vector<1x80xbf16>, vector<80x120xbf16>, vector<1x120xf32> -> vector<1x120xf32>
    %375 = arith.addf %369, %374 : vector<1x120xf32>
    %376 = vector.extract_strided_slice %356 {offsets = [3, 0], sizes = [1, 80], strides = [1, 1]} : vector<5x80xf32> to vector<1x80xf32>
    %377 = arith.truncf %376 : vector<1x80xf32> to vector<1x80xbf16>
    %c3_294 = arith.constant 3 : index
    %c0_295 = arith.constant 0 : index
    %c0_296 = arith.constant 0 : index
    %378 = vector.load %arg14[%c3_294, %c0_295, %c0_296] : memref<5x80x120xbf16, #tpu.memory_space<vmem>>, vector<1x80x120xbf16>
    %379 = vector.shape_cast %378 : vector<1x80x120xbf16> to vector<80x120xbf16>
    %cst_297 = arith.constant dense<0.000000e+00> : vector<1x120xf32>
    %380 = tpu.matmul %377, %379, %cst_297 {dimension_numbers = #tpu.dot_dimension_numbers<[1], [0], [0], [1], [0, 0, 1, 1], [], []>} : vector<1x80xbf16>, vector<80x120xbf16>, vector<1x120xf32> -> vector<1x120xf32>
    %381 = arith.addf %375, %380 : vector<1x120xf32>
    %382 = vector.extract_strided_slice %356 {offsets = [4, 0], sizes = [1, 80], strides = [1, 1]} : vector<5x80xf32> to vector<1x80xf32>
    %383 = arith.truncf %382 : vector<1x80xf32> to vector<1x80xbf16>
    %c4_298 = arith.constant 4 : index
    %c0_299 = arith.constant 0 : index
    %c0_300 = arith.constant 0 : index
    %384 = vector.load %arg14[%c4_298, %c0_299, %c0_300] : memref<5x80x120xbf16, #tpu.memory_space<vmem>>, vector<1x80x120xbf16>
    %385 = vector.shape_cast %384 : vector<1x80x120xbf16> to vector<80x120xbf16>
    %cst_301 = arith.constant dense<0.000000e+00> : vector<1x120xf32>
    %386 = tpu.matmul %383, %385, %cst_301 {dimension_numbers = #tpu.dot_dimension_numbers<[1], [0], [0], [1], [0, 0, 1, 1], [], []>} : vector<1x80xbf16>, vector<80x120xbf16>, vector<1x120xf32> -> vector<1x120xf32>
    %387 = arith.addf %381, %386 : vector<1x120xf32>
    %c0_302 = arith.constant 0 : index
    %c0_303 = arith.constant 0 : index
    %388 = vector.load %arg15[%c0_302, %c0_303] : memref<1x120xf32, #tpu.memory_space<vmem>>, vector<1x120xf32>
    %389 = arith.addf %387, %388 : vector<1x120xf32>
    %cst_304 = arith.constant 0.000000e+00 : f32
    %390 = vector.broadcast %cst_304 : f32 to vector<1x120xf32>
    %391 = arith.maximumf %389, %390 : vector<1x120xf32>
    %392 = arith.truncf %391 : vector<1x120xf32> to vector<1x120xbf16>
    %c0_305 = arith.constant 0 : index
    %c0_306 = arith.constant 0 : index
    %393 = vector.load %arg16[%c0_305, %c0_306] : memref<120x84xbf16, #tpu.memory_space<vmem>>, vector<120x84xbf16>
    %cst_307 = arith.constant dense<0.000000e+00> : vector<1x84xf32>
    %394 = tpu.matmul %392, %393, %cst_307 {dimension_numbers = #tpu.dot_dimension_numbers<[1], [0], [0], [1], [0, 0, 1, 1], [], []>} : vector<1x120xbf16>, vector<120x84xbf16>, vector<1x84xf32> -> vector<1x84xf32>
    %c0_308 = arith.constant 0 : index
    %c0_309 = arith.constant 0 : index
    %395 = vector.load %arg17[%c0_308, %c0_309] : memref<1x84xf32, #tpu.memory_space<vmem>>, vector<1x84xf32>
    %396 = arith.addf %394, %395 : vector<1x84xf32>
    %cst_310 = arith.constant 0.000000e+00 : f32
    %397 = vector.broadcast %cst_310 : f32 to vector<1x84xf32>
    %398 = arith.maximumf %396, %397 : vector<1x84xf32>
    %399 = arith.truncf %398 : vector<1x84xf32> to vector<1x84xbf16>
    %c0_311 = arith.constant 0 : index
    %c0_312 = arith.constant 0 : index
    %400 = vector.load %arg18[%c0_311, %c0_312] : memref<84x10xbf16, #tpu.memory_space<vmem>>, vector<84x10xbf16>
    %cst_313 = arith.constant dense<0.000000e+00> : vector<1x10xf32>
    %401 = tpu.matmul %399, %400, %cst_313 {dimension_numbers = #tpu.dot_dimension_numbers<[1], [0], [0], [1], [0, 0, 1, 1], [], []>} : vector<1x84xbf16>, vector<84x10xbf16>, vector<1x10xf32> -> vector<1x10xf32>
    %c0_314 = arith.constant 0 : index
    %c0_315 = arith.constant 0 : index
    %402 = vector.load %arg19[%c0_314, %c0_315] : memref<1x10xf32, #tpu.memory_space<vmem>>, vector<1x10xf32>
    %403 = arith.addf %401, %402 : vector<1x10xf32>
    %c0_316 = arith.constant 0 : index
    %c0_317 = arith.constant 0 : index
    %c0_318 = arith.constant 0 : index
    %404 = vector.load %arg20[%c0_316, %c0_317, %c0_318] : memref<1x1x10xf32, #tpu.memory_space<vmem>>, vector<1x1x10xf32>
    %405 = vector.shape_cast %404 : vector<1x1x10xf32> to vector<1x10xf32>
    %406 = vector.shape_cast %403 : vector<1x10xf32> to vector<1x1x10xf32>
    tpu.vector_store %arg20[%c0_316, %c0_317, %c0_318], %406 {strides = array<i32>} : memref<1x1x10xf32, #tpu.memory_space<vmem>>, vector<1x1x10xf32>,
    return
  }
  func.func @transform_0(%arg0: i32) -> (i32, i32, i32) {
    %c0_i32 = arith.constant 0 : i32
    %c0_i32_0 = arith.constant 0 : i32
    %c0_i32_1 = arith.constant 0 : i32
    return %arg0, %c0_i32, %c0_i32_0 : i32, i32, i32
  }
  func.func @transform_1(%arg0: i32) -> (i32, i32, i32) {
    %c0_i32 = arith.constant 0 : i32
    %c0_i32_0 = arith.constant 0 : i32
    %c0_i32_1 = arith.constant 0 : i32
    %c0_i32_2 = arith.constant 0 : i32
    return %c0_i32, %c0_i32_0, %c0_i32_1 : i32, i32, i32
  }
  func.func @transform_2(%arg0: i32) -> (i32, i32) {
    %c0_i32 = arith.constant 0 : i32
    %c0_i32_0 = arith.constant 0 : i32
    %c0_i32_1 = arith.constant 0 : i32
    return %c0_i32, %c0_i32_0 : i32, i32
  }
  func.func @transform_3(%arg0: i32) -> (i32, i32) {
    %c0_i32 = arith.constant 0 : i32
    %c0_i32_0 = arith.constant 0 : i32
    %c0_i32_1 = arith.constant 0 : i32
    return %c0_i32, %c0_i32_0 : i32, i32
  }
  func.func @transform_4(%arg0: i32) -> (i32, i32) {
    %c0_i32 = arith.constant 0 : i32
    %c0_i32_0 = arith.constant 0 : i32
    %c0_i32_1 = arith.constant 0 : i32
    return %c0_i32, %c0_i32_0 : i32, i32
  }
  func.func @transform_5(%arg0: i32) -> (i32, i32) {
    %c0_i32 = arith.constant 0 : i32
    %c0_i32_0 = arith.constant 0 : i32
    %c0_i32_1 = arith.constant 0 : i32
    return %c0_i32, %c0_i32_0 : i32, i32
  }
  func.func @transform_6(%arg0: i32) -> (i32, i32) {
    %c0_i32 = arith.constant 0 : i32
    %c0_i32_0 = arith.constant 0 : i32
    %c0_i32_1 = arith.constant 0 : i32
    return %c0_i32, %c0_i32_0 : i32, i32
  }
  func.func @transform_7(%arg0: i32) -> (i32, i32, i32) {
    %c0_i32 = arith.constant 0 : i32
    %c0_i32_0 = arith.constant 0 : i32
    %c0_i32_1 = arith.constant 0 : i32
    %c0_i32_2 = arith.constant 0 : i32
    return %c0_i32, %c0_i32_0, %c0_i32_1 : i32, i32, i32
  }
  func.func @transform_8(%arg0: i32) -> (i32, i32) {
    %c0_i32 = arith.constant 0 : i32
    %c0_i32_0 = arith.constant 0 : i32
    %c0_i32_1 = arith.constant 0 : i32
    return %c0_i32, %c0_i32_0 : i32, i32
  }
  func.func @transform_9(%arg0: i32) -> (i32, i32) {
    %c0_i32 = arith.constant 0 : i32
    %c0_i32_0 = arith.constant 0 : i32
    %c0_i32_1 = arith.constant 0 : i32
    return %c0_i32, %c0_i32_0 : i32, i32
  }
  func.func @transform_10(%arg0: i32) -> (i32, i32) {
    %c0_i32 = arith.constant 0 : i32
    %c0_i32_0 = arith.constant 0 : i32
    %c0_i32_1 = arith.constant 0 : i32
    return %c0_i32, %c0_i32_0 : i32, i32
  }
  func.func @transform_11(%arg0: i32) -> (i32, i32) {
    %c0_i32 = arith.constant 0 : i32
    %c0_i32_0 = arith.constant 0 : i32
    %c0_i32_1 = arith.constant 0 : i32
    return %c0_i32, %c0_i32_0 : i32, i32
  }
  func.func @transform_12(%arg0: i32) -> (i32, i32) {
    %c0_i32 = arith.constant 0 : i32
    %c0_i32_0 = arith.constant 0 : i32
    %c0_i32_1 = arith.constant 0 : i32
    return %c0_i32, %c0_i32_0 : i32, i32
  }
  func.func @transform_13(%arg0: i32) -> (i32, i32, i32) {
    %c0_i32 = arith.constant 0 : i32
    %c0_i32_0 = arith.constant 0 : i32
    %c0_i32_1 = arith.constant 0 : i32
    %c0_i32_2 = arith.constant 0 : i32
    return %c0_i32, %c0_i32_0, %c0_i32_1 : i32, i32, i32
  }
  func.func @transform_14(%arg0: i32) -> (i32, i32) {
    %c0_i32 = arith.constant 0 : i32
    %c0_i32_0 = arith.constant 0 : i32
    %c0_i32_1 = arith.constant 0 : i32
    return %c0_i32, %c0_i32_0 : i32, i32
  }
  func.func @transform_15(%arg0: i32) -> (i32, i32) {
    %c0_i32 = arith.constant 0 : i32
    %c0_i32_0 = arith.constant 0 : i32
    %c0_i32_1 = arith.constant 0 : i32
    return %c0_i32, %c0_i32_0 : i32, i32
  }
  func.func @transform_16(%arg0: i32) -> (i32, i32) {
    %c0_i32 = arith.constant 0 : i32
    %c0_i32_0 = arith.constant 0 : i32
    %c0_i32_1 = arith.constant 0 : i32
    return %c0_i32, %c0_i32_0 : i32, i32
  }
  func.func @transform_17(%arg0: i32) -> (i32, i32) {
    %c0_i32 = arith.constant 0 : i32
    %c0_i32_0 = arith.constant 0 : i32
    %c0_i32_1 = arith.constant 0 : i32
    return %c0_i32, %c0_i32_0 : i32, i32
  }
  func.func @transform_18(%arg0: i32) -> (i32, i32) {
    %c0_i32 = arith.constant 0 : i32
    %c0_i32_0 = arith.constant 0 : i32
    %c0_i32_1 = arith.constant 0 : i32
    return %c0_i32, %c0_i32_0 : i32, i32
  }
  func.func @transform_19(%arg0: i32) -> (i32, i32, i32) {
    %c0_i32 = arith.constant 0 : i32
    %c0_i32_0 = arith.constant 0 : i32
    %c0_i32_1 = arith.constant 0 : i32
    return %arg0, %c0_i32, %c0_i32_0 : i32, i32, i32
  }
}

</mosaic_0001>

<bundles_post_ra>
// kernel: lenet_forward.1
= control target key start
LH: loop header
LB: loop body
LE: loop exit
PB: predicated region body
PF: predicated region fallthrough
CT: control target
= control target key end

     0   :  { %s10528_s0 = inlined_call_operand.vmem [shape: f32[2,32,32], index: 0, kind: input, shape index: {}]   ;;  %s10529_s1 = inlined_call_operand.hbm [shape: bf16[25,28,168], index: 1, kind: input, shape index: {}]   ;;  %s10530_s2 = inlined_call_operand.vmem [shape: f32[1,168], index: 2, kind: input, shape index: {}]   ;;  %s10531_s3 = inlined_call_operand.vmem [shape: f32[168,84], index: 3, kind: input, shape index: {}]   ;;  %s10532_s4 = inlined_call_operand.hbm [shape: f32[168,84], index: 4, kind: input, shape index: {}]   ;;  %s10533_s5 = inlined_call_operand.vmem [shape: f32[14,28], index: 5, kind: input, shape index: {}]   ;;  %s10534_s6 = inlined_call_operand.vmem [shape: f32[14,28], index: 6, kind: input, shape index: {}]   ;;  %s10535_s7 = inlined_call_operand.hbm [shape: bf16[25,60,160], index: 7, kind: input, shape index: {}]   ;;  %s10536_s8 = inlined_call_operand.vmem [shape: f32[1,160], index: 8, kind: input, shape index: {}]   ;;  %s10537_s9 = inlined_call_operand.hbm [shape: f32[160,80], index: 9, kind: input, shape index: {}]   ;;  %s10538_s10 = inlined_call_operand.hbm [shape: f32[160,80], index: 10, kind: input, shape index: {}]   ;;  %s10539_s11 = inlined_call_operand.vmem [shape: f32[5,10], index: 11, kind: input, shape index: {}]   ;;  %s10540_s12 = inlined_call_operand.vmem [shape: f32[5,10], index: 12, kind: input, shape index: {}]   ;;  %s10541_s13 = inlined_call_operand.vmem [shape: bf16[5,80,120], index: 13, kind: input, shape index: {}]   ;;  %s10542_s14 = inlined_call_operand.vmem [shape: f32[1,120], index: 14, kind: input, shape index: {}]   ;;  %s10543_s15 = inlined_call_operand.vmem [shape: bf16[120,84], index: 15, kind: input, shape index: {}]   ;;  %s10544_s16 = inlined_call_operand.vmem [shape: f32[1,84], index: 16, kind: input, shape index: {}]   ;;  %s10545_s17 = inlined_call_operand.vmem [shape: bf16[84,10], index: 17, kind: input, shape index: {}]   ;;  %s10546_s18 = inlined_call_operand.vmem [shape: f32[1,10], index: 18, kind: input, shape index: {}]   ;;  %s10547_s19 = inlined_call_operand.hbm [shape: f32[2,1,10], index: 19, kind: output, shape index: {}]  }
   0x1   :  { %10563 = sst [smem:[#allocation24_spill]] %s10528_s0 }
   0x2   :  { %10564 = sst [smem:[#allocation25_spill]] %s10529_s1 }
   0x3   :  { %10565 = sst [smem:[#allocation26_spill]] %s10530_s2 }
   0x4   :  { %10566 = sst [smem:[#allocation27_spill]] %s10531_s3 }
   0x5   :  { %10567 = sst [smem:[#allocation28_spill]] %s10532_s4 }
   0x6   :  { %10568 = sst [smem:[#allocation29_spill]] %s10537_s9 }
   0x7   :  { %10569 = sst [smem:[#allocation30_spill]] %s10544_s16 }
   0x8   :  { %10570 = sst [smem:[#allocation31_spill]] %s10546_s18 }
   0x9   :  { %10571 = sst [smem:[#allocation32_spill]] %s10547_s19 }
   0xa   :  { %24 = vsyncpa [#allocation3], 0 }
   0xb   :  { %25 = vsyncpa [#allocation6], 0 }
   0xc   :  { %26 = vsyncpa [#allocation9], 0 }
   0xd   :  { %27 = vsyncpa [#allocation4], 0 }
   0xe   :  { %29 = vsyncpa [#allocation4 + $0x1], 0  ;;  %s9483_s0 = smov 0   ;;  %s9485_s30 = smov 0  }
   0xf   :  { %s9487_s20 = smov 0   ;;  %s9489_s21 = smov 0  }
  0x10 LB: > { %10572 = sst [smem:[#allocation16_spill]] %s9348_s0  ;;  %s9504_s1 = sadd.s32 4294967295, %s9360_s21   ;;  %s9360_s21 = sphi %s9489_s21, %s10609_s21   ;;  %s9356_s20 = sphi %s9487_s20, %s10612_s20   ;;  %s9352_s30 = sphi %s9485_s30, %s10611_s30   ;;  %s9348_s0 = sphi %s9483_s0, %s10610_s0  }
  0x11   : > { %10573 = sst [smem:[#allocation17_spill]] %s9352_s30  ;;  %s7357_s22 = sadd.s32 4294967294, %s9360_s21  }
  0x12   : > { %10574 = sst [smem:[#allocation18_spill]] %s9356_s20  ;;  %s9508_s2 = sadd.s32 1, %s9360_s21  }
  0x13   : > { %10575 = sst [smem:[#allocation19_spill]] %s9360_s21  ;;  %s446_s23 = sadd.s32 1, %s9356_s20 }
  0x14   : > { %10576 = sst [smem:[#allocation20_spill]] %s9508_s2  ;;  %s443_s24 = ssub.s32 %s9360_s21, %s9508_s2 }
  0x15   : > { %p456_p0 = scmp.ne.s32.totalorder %s9356_s20, %s9352_s30  ;;  %p444_p1 = scmp.eq.s32.totalorder %s443_s24, 0 }
  0x16   : > { %p457_p2 = scmp.eq.s32.totalorder %s9504_s1, 1  ;;  %p462_p3 = scmp.ne.s32.totalorder %s9352_s30, %s9348_s0 }
  0x17   : > { %p463_p4 = scmp.eq.s32.totalorder %s7357_s22, 1  ;;  %p7358_p7 = scmp.ge.s32.totalorder %s9360_s21, 1 }
  0x18   : > { %s9519_s25 = scalar_select %p444_p1, %s9356_s20, %s446_s23  }
  0x19   : > { %p9521_p5 = por %p457_p2, %p456_p0  ;;  %p9525_p6 = por %p463_p4, %p462_p3 }
  0x1a   : > { %10577 = sst [smem:[#allocation21_spill]] %s9519_s25  ;;  %p470_p8 = scmp.lt.s32.totalorder %s9360_s21, 3 }
  0x1b   : > { %s10578_s3 = scalar_select %p9521_p5, 1, 0 }
  0x1c   : > { %s10580_s26 = scalar_select %p9525_p6, 1, 0 }
  0x1d   : > { %10579 = sst [smem:[#allocation22_spill]] %s10578_s3  ;;  %p10557_p9 = scmp.eq.s32.totalorder %s9504_s1, 0 }
  0x1e   : > { %10581 = sst [smem:[#allocation23_spill]] %s10580_s26  ;;  %p9532_p10 = pnand %p7358_p7, %p470_p8 }
  0x1f   : > { %s9362_s28 = smov [#allocation5]   ;;  %s9363_s23 = smov [#allocation8]  }
  0x20   : > { %s10582_s27 = scalar_select %p9532_p10, 1, 0 }
  0x21   : > { %p8574_p11 = pneg %p9532_p10  ;;  %s501_s29 = sshll.u32 %s9362_s28, 4  ;;  %s9538_s29 = int_to_ptr.vmem [resolvable:$true] %s501_s29 }
  0x22   : > { %s536_s24 = sshll.u32 %s9363_s23, 4  ;;  %s9364_s25 = smov [#allocation2]   ;;  %s9546_s24 = int_to_ptr.vmem [resolvable:$true] %s536_s24 }
  0x23   : > { %p9542_p12 = pnand %p10557_p9, %p8574_p11  ;;  %s9548_s20 = sshll.u32 %s9364_s25, 4  ;;  %s483_s20 = int_to_ptr.vmem [resolvable:$true] %s9548_s20 }
  0x24   : > { %s10584_s4 = sld [smem:[#allocation28_spill]] }
  0x25   : > { %p9558_p0 = pneg %p9542_p12 }
  0x2a   : > { %s9146_s0 = scalar_lea.hbm %s10584_s4, 2688 }
  0x2b   : > { %p9147_p13 = scmp.ne.s32.totalorder %s10584_s4, %s9146_s0  ;;  %p9153_p3 = scmp.lt.u32.totalorder %s9146_s0, %s10584_s4 }
  0x2d   : > { %p9149_p1 = pnand %p9558_p0, %p9147_p13 }
  0x2f   : > { %p9150_p2 = pneg %p9149_p1 }
  0x31   : > { %p9155_p4 = pnand %p9153_p3, %p9150_p2 }
  0x33   : > { %9158 = shalt.err (!%p9155_p4)
}
  0x34   : > { %s9159_s21 = scalar_lea.vmem %s9538_s29, 2688  ;;  %p9167_p9 = scmp.lt.s32.totalorder %s9538_s29, %s9538_s29 }
  0x35   : > { %p9160_p7 = scmp.ne.s32.totalorder %s9538_s29, %s9159_s21  ;;  %p9168_p6 = scmp.lt.s32.totalorder %s9159_s21, %s9159_s21 }
  0x37   : > { %p9162_p8 = pnand %p9160_p7, %p9558_p0  ;;  %p9169_p13 = por %p9168_p6, %p9167_p9 }
  0x39   : > { %p9163_p11 = pneg %p9162_p8 }
  0x3b   : > { %p9170_p1 = pnand %p9169_p13, %p9163_p11 }
  0x3d   : > { %9173 = shalt.err (!%p9170_p1)
}
  0x3e   : > { %s9365_s2 = smov 128   ;;  %s9366_s0 = smov 8  }
  0x3f   : > { %8580 = dma.hbm_to_vmem [thread:$0]  (!%p9542_p12), %s10584_s4, 2688, %s9538_s29, [#allocation6], %s9365_s2, %s9365_s2, %s9366_s0  }
  0x40   : > { %s10586_s9 = sld [smem:[#allocation29_spill]] }
  0x46   : > { %s9174_s21 = scalar_lea.hbm %s10586_s9, 2560 }
  0x47   : > { %p9175_p6 = scmp.ne.s32.totalorder %s10586_s9, %s9174_s21  ;;  %p9181_p3 = scmp.lt.u32.totalorder %s9174_s21, %s10586_s9 }
  0x49   : > { %p9177_p9 = pnand %p9175_p6, %p9558_p0 }
  0x4b   : > { %p9178_p2 = pneg %p9177_p9 }
  0x4d   : > { %p9183_p4 = pnand %p9181_p3, %p9178_p2 }
  0x4f   : > { %9186 = shalt.err (!%p9183_p4)
}
  0x50   : > { %s9187_s29 = scalar_lea.vmem %s9546_s24, 2560  ;;  %p9195_p13 = scmp.lt.s32.totalorder %s9546_s24, %s9546_s24 }
  0x51   : > { %p9188_p7 = scmp.ne.s32.totalorder %s9546_s24, %s9187_s29  ;;  %p9196_p1 = scmp.lt.s32.totalorder %s9187_s29, %s9187_s29 }
  0x53   : > { %p9190_p8 = pnand %p9188_p7, %p9558_p0  ;;  %p9197_p6 = por %p9196_p1, %p9195_p13 }
  0x55   : > { %p9191_p11 = pneg %p9190_p8 }
  0x57   : > { %p9198_p9 = pnand %p9197_p6, %p9191_p11 }
  0x59   : > { %9201 = shalt.err (!%p9198_p9)
}
  0x5a   : > { %8586 = dma.hbm_to_vmem [thread:$0]  (!%p9542_p12), %s10586_s9, 2560, %s9546_s24, [#allocation9], %s9365_s2, %s9365_s2, %s9366_s0  }
  0x5b   : > { %s10587_s26 = sld [smem:[#allocation25_spill]] }
  0x61   : > { %s9202_s28 = scalar_lea.hbm %s10587_s26, 12800 }
  0x62   : > { %p9203_p2 = scmp.ne.s32.totalorder %s10587_s26, %s9202_s28  ;;  %p9209_p7 = scmp.lt.u32.totalorder %s9202_s28, %s10587_s26 }
  0x64   : > { %p9205_p3 = pnand %p9203_p2, %p9558_p0 }
  0x66   : > { %p9206_p4 = pneg %p9205_p3 }
  0x68   : > { %p9211_p8 = pnand %p9209_p7, %p9206_p4 }
  0x6a   : > { %9214 = shalt.err (!%p9211_p8)
}
  0x6b   : > { %s9215_s16 = scalar_lea.vmem %s483_s20, 12800  ;;  %p9223_p6 = scmp.lt.s32.totalorder %s483_s20, %s483_s20 }
  0x6c   : > { %p9216_p11 = scmp.ne.s32.totalorder %s483_s20, %s9215_s16  ;;  %p9224_p9 = scmp.lt.s32.totalorder %s9215_s16, %s9215_s16 }
  0x6e   : > { %p9218_p13 = pnand %p9216_p11, %p9558_p0  ;;  %p9225_p5 = por %p9224_p9, %p9223_p6 }
  0x70   : > { %p9219_p1 = pneg %p9218_p13 }
  0x72   : > { %p9226_p10 = pnand %p9225_p5, %p9219_p1 }
  0x74   : > { %9229 = shalt.err (!%p9226_p10)
}
  0x75   : > { %8577 = dma.hbm_to_vmem [thread:$0]  (!%p9542_p12), %s10587_s26, 12800, %s483_s20, [#allocation3], %s9365_s2, %s9365_s2, %s9366_s0  }
  0x76   : > { %s9367_s30 = smov [#allocation7]   ;;  %s9368_s28 = smov [#allocation10]  }
  0x77   : > { %s520_s3 = sshll.u32 %s9367_s30, 4  ;;  %s549_s23 = sshll.u32 %s9368_s28, 4  ;;  %s521_s3 = int_to_ptr.vmem [resolvable:$true] %s520_s3  ;;  %s550_s23 = int_to_ptr.vmem [resolvable:$true] %s549_s23 }
  0x78   : > { %s9230_s29 = scalar_lea.hbm %s10535_s7, 25600 }
  0x79   : > { %p9231_p5 = scmp.ne.s32.totalorder %s10535_s7, %s9230_s29  ;;  %p9237_p3 = scmp.lt.u32.totalorder %s9230_s29, %s10535_s7 }
  0x7b   : > { %p9233_p10 = pnand %p9231_p5, %p9558_p0 }
  0x7d   : > { %p9234_p2 = pneg %p9233_p10 }
  0x7f   : > { %p9239_p4 = pnand %p9237_p3, %p9234_p2 }
  0x81   : > { %9242 = shalt.err (!%p9239_p4)
}
  0x82   : > { %s9243_s20 = scalar_lea.vmem %s521_s3, 25600  ;;  %p9251_p13 = scmp.lt.s32.totalorder %s521_s3, %s521_s3 }
  0x83   : > { %p9244_p7 = scmp.ne.s32.totalorder %s521_s3, %s9243_s20  ;;  %p9252_p1 = scmp.lt.s32.totalorder %s9243_s20, %s9243_s20 }
  0x85   : > { %p9246_p8 = pnand %p9244_p7, %p9558_p0  ;;  %p9253_p6 = por %p9252_p1, %p9251_p13 }
  0x87   : > { %p9247_p11 = pneg %p9246_p8 }
  0x89   : > { %p9254_p9 = pnand %p9253_p6, %p9247_p11 }
  0x8b   : > { %9257 = shalt.err (!%p9254_p9)
}
  0x8c   : > { %8583 = dma.hbm_to_vmem [thread:$0]  (!%p9542_p12), %s10535_s7, 25600, %s521_s3, [#allocation6], %s9365_s2, %s9365_s2, %s9366_s0  }
  0x8d   : > { %s9258_s28 = scalar_lea.hbm %s10538_s10, 2560 }
  0x8e   : > { %p9259_p5 = scmp.ne.s32.totalorder %s10538_s10, %s9258_s28  ;;  %p9265_p3 = scmp.lt.u32.totalorder %s9258_s28, %s10538_s10 }
  0x90   : > { %p9261_p10 = pnand %p9259_p5, %p9558_p0 }
  0x92   : > { %p9262_p2 = pneg %p9261_p10 }
  0x94   : > { %p9267_p4 = pnand %p9265_p3, %p9262_p2 }
  0x96   : > { %9270 = shalt.err (!%p9267_p4)
}
  0x97   : > { %s9271_s24 = scalar_lea.vmem %s550_s23, 2560  ;;  %p9279_p13 = scmp.lt.s32.totalorder %s550_s23, %s550_s23 }
  0x98   : > { %p9272_p7 = scmp.ne.s32.totalorder %s550_s23, %s9271_s24  ;;  %p9280_p1 = scmp.lt.s32.totalorder %s9271_s24, %s9271_s24 }
  0x9a   : > { %p9274_p8 = pnand %p9272_p7, %p9558_p0  ;;  %p9281_p6 = por %p9280_p1, %p9279_p13 }
  0x9c   : > { %p9275_p11 = pneg %p9274_p8 }
  0x9e   : > { %p9282_p9 = pnand %p9281_p6, %p9275_p11 }
  0xa0   : > { %9285 = shalt.err (!%p9282_p9)
}
  0xa1   : > { %8589 = dma.hbm_to_vmem [thread:$0]  (!%p9542_p12), %s10538_s10, 2560, %s550_s23, [#allocation9], %s9365_s2, %s9365_s2, %s9366_s0  }
  0xa2   : > { %p10588_p5 = scmp.ne.s32.totalorder %s10582_s27, 0 }
  0xa3   : > { %p10589_p0 = scmp.eq.s32.totalorder (!%p10588_p5), %s9504_s1, 0 }
  0xa4   : > { %597 = sbr.rel (%p10588_p5) target bundleno = 3314 (0xcf2), region = 96 }
  0xab   : > { %9331 = dma.done.wait (%p10589_p0), [#allocation3], 12800   ;;  %p10590_p10 = pmov %p10589_p0 }
  0xac   : > { %p10591_p2 = pmov %p10589_p0 }
  0xad   : > { %9333 = vsyncadd (%p10590_p10), [#allocation3], 4294954496 }
  0xae   : > { %9335 = dma.done.wait (%p10591_p2), [#allocation6], 28288   ;;  %p10592_p3 = pmov %p10589_p0 }
  0xaf   : > { %p10593_p4 = pmov %p10589_p0 }
  0xb0   : > { %9337 = vsyncadd (%p10592_p3), [#allocation6], 4294939008 }
  0xb1   : > { %9339 = dma.done.wait (%p10593_p4), [#allocation9], 5120   ;;  %p10594_p12 = pmov %p10589_p0 }
  0xb2   : > { %p668_p7 = scmp.lt.s32.totalorder %s9504_s1, 1  ;;  %v9369_v0 = vmov 0   ;;  %s10595_s0 = sld [smem:[#allocation24_spill]]  ;;  %v8657_v7 = vld [vmem:[#allocation2 + $0x24] ss:$8 sps:$4 sm:$0xff]   ;;  %vm720_vm0 = vcmask 1045504  }
  0xb3   : > { %9341 = vsyncadd (%p10594_p12), [#allocation9], 4294962176  ;;  %759 = vmatprep.mubr.bf16.mxu0 %v9369_v0  ;;  %s9370_s4 = smov 127   ;;  %s9371_s9 = smov 126   ;;  %v8659_v8 = vld [vmem:[#allocation2 + $0x20] ss:$8 sps:$4 sm:$0xff]   ;;  %727 = vmatprep.subr.bf16.mxu0 %v8657_v7 }
  0xb4   : > { %s669_s19 = scalar_select %p668_p7, %s9504_s1, 1  ;;  %v8660_v9 = vld [vmem:[#allocation2 + $0x34] ss:$8 sps:$4 sm:$0x3f]   ;;  %728 = vmatpush1.bf16.msra.mxu0 %v8659_v8  ;;  %v8665_v12 = vld [vmem:[#allocation2 + $0x4] ss:$8 sps:$4 sm:$0xff]  }
  0xb5   : > { %v8662_v10 = vld [vmem:[#allocation2 + $0x30] ss:$8 sps:$4 sm:$0x3f]   ;;  %7377 = vmatprep.subr.msk.bf16.mxu0 %vm720_vm0, %v8660_v9  ;;  %s9372_s18 = smov 125   ;;  %s9373_s30 = smov 124   ;;  %vm713_vm1 = vcmask 228352  }
  0xb6   : > { %s7909_s27 = sshll.u32 %s669_s19, 5  ;;  %v722_v11 = vsel %vm720_vm0, %v8662_v10, 0  ;;  %v8668_v25 = vld [vmem:[#allocation2 + $0x10] ss:$8 sps:$4 sm:$0x3f]   ;;  %s10596_s21 = sld [smem:[#allocation27_spill]] }
  0xb7   : > { %v8663_v26 = vld [vmem:[#allocation2] ss:$8 sps:$4 sm:$0xff]   ;;  %v8666_v27 = vld [vmem:[#allocation2 + $0x14] ss:$8 sps:$4 sm:$0x3f]   ;;  %v805_v29 = vsel %vm720_vm0, %v8668_v25, 0 }
  0xb8   : > { %s9692_s23 = scalar_lea.vmem %s10595_s0, %s7909_s27  ;;  %730 = vmatpush1.bf16.msra.mxu0 %v722_v11  ;;  %v8671_v30 = vld [vmem:[#allocation2 + $0x44] ss:$8 sps:$4 sm:$0xff]   ;;  %v8674_v35 = vld [vmem:[#allocation2 + $0x50] ss:$8 sps:$4 sm:$0x3f]   ;;  %s10598_s0 = sld [smem:[#allocation26_spill]] }
  0xb9   : > { %v674_v1 = vld [vmem:[%s9692_s23] sm:$0xff]  ;;  %v675_v2 = vld [vmem:[%s9692_s23 + $0x8] sm:$0xff]  ;;  %v676_v3 = vld [vmem:[%s9692_s23 + $0x10] sm:$0xff]  ;;  %810 = vmatprep.subr.bf16.mxu0 %v8665_v12  ;;  %v897_v38 = vsel %vm720_vm0, %v8674_v35, 0  ;;  %vm3228_vm2 = vcmask 326656   ;;  %vm3444_vm3 = vcmask 1043456  }
  0xba   : > { %v9697_v4 = vpack.c.bf16 %v675_v2, %v674_v1  ;;  %v677_v5 = vld [vmem:[%s9692_s23 + $0x18] sm:$0xf]  ;;  %v1163_v13 = vld [vmem:[%s9692_s23 + $0x1] sm:$0xff]  ;;  %v1164_v14 = vld [vmem:[%s9692_s23 + $0x9] sm:$0xff]  ;;  %vm9376_vm4 = vmmov 1   ;;  %s9377_s16 = smov 116  }
  0xbb   : > { %v9702_v6 = vpack.c.bf16 %v677_v5, %v676_v3  ;;  %v1165_v15 = vld [vmem:[%s9692_s23 + $0x11] sm:$0xff]  ;;  %v1166_v16 = vld [vmem:[%s9692_s23 + $0x19] sm:$0xf]  ;;  %v9724_v17 = vpack.c.bf16 %v1164_v14, %v1163_v13  ;;  %v1667_v19 = vld [vmem:[%s9692_s23 + $0x2] sm:$0xff]  ;;  %s9378_s24 = smov 122   ;;  %s9379_s3 = smov 104  }
  0xbc   : > { %691 = vrot.lane.b32.xlu0 %v9697_v4, %s9370_s4  ;;  %868 = vrot.lane.b32.xlu1 %v9697_v4, %s9371_s9  ;;  %v9726_v18 = vpack.c.bf16 %v1166_v16, %v1165_v15  ;;  %v1668_v20 = vld [vmem:[%s9692_s23 + $0xa] sm:$0xff]  ;;  %v1669_v22 = vld [vmem:[%s9692_s23 + $0x12] sm:$0xff]  ;;  %s10597_s29 = smov %s10596_s21  ;;  %vm8181_vm5 = vmpackc.low %vm3444_vm3, %vm9376_vm4  ;;  %s9380_s20 = smov 110   ;;  %vm3667_vm6 = vcmask 490496   ;;  %vm6268_vm7 = vcmask 261120   ;;  %vm9381_vm8 = vmmov 0  }
  0xbd   : > { %v9746_v21 = vpack.c.bf16 %v1668_v20, %v1667_v19  ;;  %v1670_v23 = vld [vmem:[%s9692_s23 + $0x1a] sm:$0xf]  ;;  %v2171_v32 = vld [vmem:[%s9692_s23 + $0x3] sm:$0xff]  ;;  %v2172_v33 = vld [vmem:[%s9692_s23 + $0xb] sm:$0xff]  ;;  %vm6452_vm9 = vcmask 1041408   ;;  %vm6448_vm11 = vcmask 80896  }
  0xbe   : > { %v9754_v24 = vpack.c.bf16 %v1670_v23, %v1669_v22  ;;  %v9776_v34 = vpack.c.bf16 %v2172_v33, %v2171_v32  ;;  %v8669_v36 = vld [vmem:[#allocation2 + $0x40] ss:$8 sps:$4 sm:$0xff]   ;;  %v8672_v37 = vld [vmem:[#allocation2 + $0x54] ss:$8 sps:$4 sm:$0x3f]   ;;  %v2676_v7 = vld [vmem:[%s9692_s23 + $0xc] sm:$0xff] }
  0xbf   : > { %v8677_v39 = vld [vmem:[#allocation2 + $0x64] ss:$8 sps:$4 sm:$0xff]   ;;  %v2173_v40 = vld [vmem:[%s9692_s23 + $0x13] sm:$0xff]  ;;  %v2174_v41 = vld [vmem:[%s9692_s23 + $0x1b] sm:$0xf]  ;;  %vm6656_vm12 = vcmask 654336  }
  0xc0   : > { %693 = vrot.lane.b32.xlu0 %v9702_v6, %s9370_s4  ;;  %870 = vrot.lane.b32.xlu1 %v9702_v6, %s9371_s9  ;;  %v9789_v42 = vpack.c.bf16 %v2174_v41, %v2173_v40  ;;  %v8675_v43 = vld [vmem:[#allocation2 + $0x60] ss:$8 sps:$4 sm:$0xff]   ;;  %v8678_v44 = vld [vmem:[#allocation2 + $0x74] ss:$8 sps:$4 sm:$0x3f]   ;;  %vm8258_vm10 = vmpackc.low %vm6452_vm9, %vm9376_vm4  ;;  %vm7096_vm13 = vcmask 982016  }
  0xc1   : > { %v8680_v45 = vld [vmem:[#allocation2 + $0x70] ss:$8 sps:$4 sm:$0x3f]   ;;  %v8683_v48 = vld [vmem:[#allocation2 + $0x84] ss:$8 sps:$4 sm:$0xff]   ;;  %vm7190_vm14 = vcmask 687104  }
  0xc2   : > { %v997_v47 = vsel %vm720_vm0, %v8680_v45, 0  ;;  %v8681_v51 = vld [vmem:[#allocation2 + $0x80] ss:$8 sps:$4 sm:$0xff]   ;;  %v8684_v52 = vld [vmem:[#allocation2 + $0x94] ss:$8 sps:$4 sm:$0x3f]  }
  0xc3   : > { %v8686_v53 = vld [vmem:[#allocation2 + $0x90] ss:$8 sps:$4 sm:$0x3f]   ;;  %v8689_v55 = vld [vmem:[#allocation2 + $0xa4] ss:$8 sps:$4 sm:$0xff]   ;;  %s7906_s28 = sshll.u32 %s9504_s1, 4 }
  0xc4   : > { %968 = vrot.lane.b32.xlu0 %v9697_v4, %s9372_s18  ;;  %970 = vrot.lane.b32.xlu1 %v9702_v6, %s9372_s18  ;;  %v1097_v54 = vsel %vm720_vm0, %v8686_v53, 0  ;;  %v8687_v58 = vld [vmem:[#allocation2 + $0xa0] ss:$8 sps:$4 sm:$0xff]   ;;  %v8690_v59 = vld [vmem:[#allocation2 + $0xb4] ss:$8 sps:$4 sm:$0x3f]  }
  0xc5   : > { %v8692_v60 = vld [vmem:[#allocation2 + $0xb0] ss:$8 sps:$4 sm:$0x3f]   ;;  %v8695_v62 = vld [vmem:[#allocation2 + $0xc4] ss:$8 sps:$4 sm:$0xff]   ;;  %vm7237_vm15 = vcmask 73728  }
  0xc6   : > { %v1199_v61 = vsel %vm720_vm0, %v8692_v60, 0  ;;  %v8693_v1 = vld [vmem:[#allocation2 + $0xc0] ss:$8 sps:$4 sm:$0xff]   ;;  %v8696_v2 = vld [vmem:[#allocation2 + $0xd4] ss:$8 sps:$4 sm:$0x3f]  }
  0xc7   : > { %v8698_v3 = vld [vmem:[#allocation2 + $0xd0] ss:$8 sps:$4 sm:$0x3f]   ;;  %v8701_v5 = vld [vmem:[#allocation2 + $0xe4] ss:$8 sps:$4 sm:$0xff]   ;;  %s9382_s27 = smov [#allocation11]  }
  0xc8   : > { %1068 = vrot.lane.b32.xlu0 %v9697_v4, %s9373_s30  ;;  %1070 = vrot.lane.b32.xlu1 %v9702_v6, %s9373_s30  ;;  %v8699_v10 = vld [vmem:[#allocation2 + $0xe0] ss:$8 sps:$4 sm:$0xff]   ;;  %v8702_v11 = vld [vmem:[#allocation2 + $0xf4] ss:$8 sps:$4 sm:$0x3f]   ;;  %s9290_s22 = sshll.u32 %s9382_s27, 4  ;;  %s9291_s22 = int_to_ptr.vmem [resolvable:$false] %s9290_s22 }
  0xc9   : > { %v8704_v12 = vld [vmem:[#allocation2 + $0xf0] ss:$8 sps:$4 sm:$0x3f]   ;;  %v2678_v14 = vld [vmem:[%s9692_s23 + $0x1c] sm:$0xf]  ;;  %s9292_s2 = scalar_lea.vmem %s9291_s22, 32 }
  0xca   : > { %v2677_v13 = vld [vmem:[%s9692_s23 + $0x14] sm:$0xff]  ;;  %v1401_v15 = vsel %vm720_vm0, %v8704_v12, 0  ;;  %v8707_v16 = vld [vmem:[#allocation2 + $0x104] ss:$8 sps:$4 sm:$0xff]   ;;  %v8705_v20 = vld [vmem:[#allocation2 + $0x100] ss:$8 sps:$4 sm:$0xff]  }
  0xcb   : > { %v8708_v22 = vld [vmem:[#allocation2 + $0x114] ss:$8 sps:$4 sm:$0x3f]   ;;  %v8710_v23 = vld [vmem:[#allocation2 + $0x110] ss:$8 sps:$4 sm:$0x3f]  }
  0xcc   : > { %1272 = vrot.lane.b32.xlu0 %v9724_v17, %s9370_s4  ;;  %1274 = vrot.lane.b32.xlu1 %v9726_v18, %s9370_s4  ;;  %v1501_v25 = vsel %vm720_vm0, %v8710_v23, 0  ;;  %v8719_v33 = vld [vmem:[#allocation2 + $0x144] ss:$8 sps:$4 sm:$0xff]   ;;  %v8726_v45 = vld [vmem:[#allocation2 + $0x174] ss:$8 sps:$4 sm:$0x3f]  }
  0xcd   : > { %v8725_v41 = vld [vmem:[#allocation2 + $0x164] ss:$8 sps:$4 sm:$0xff]   ;;  %v8764_v23 = vld [vmem:[#allocation2 + $0x230] ss:$8 sps:$4 sm:$0x3f]  }
  0xce   : > { %v8737_v53 = vld [vmem:[#allocation2 + $0x1a4] ss:$8 sps:$4 sm:$0xff]  }
  0xd0   : > { %1372 = vrot.lane.b32.xlu0 %v9724_v17, %s9371_s9  ;;  %1374 = vrot.lane.b32.xlu1 %v9726_v18, %s9371_s9 }
  0xd4   : > { %1472 = vrot.lane.b32.xlu0 %v9724_v17, %s9372_s18  ;;  %1474 = vrot.lane.b32.xlu1 %v9726_v18, %s9372_s18 }
  0xd8   : > { %1572 = vrot.lane.b32.xlu0 %v9724_v17, %s9373_s30  ;;  %1574 = vrot.lane.b32.xlu1 %v9726_v18, %s9373_s30 }
  0xdc   : > { %1776 = vrot.lane.b32.xlu0 %v9746_v21, %s9370_s4  ;;  %1778 = vrot.lane.b32.xlu1 %v9754_v24, %s9370_s4 }
  0xe0   : > { %1876 = vrot.lane.b32.xlu0 %v9746_v21, %s9371_s9  ;;  %1878 = vrot.lane.b32.xlu1 %v9754_v24, %s9371_s9 }
  0xe4   : > { %1976 = vrot.lane.b32.xlu0 %v9746_v21, %s9372_s18  ;;  %1978 = vrot.lane.b32.xlu1 %v9754_v24, %s9372_s18 }
  0xe8   : > { %2076 = vrot.lane.b32.xlu0 %v9746_v21, %s9373_s30  ;;  %2078 = vrot.lane.b32.xlu1 %v9754_v24, %s9373_s30 }
  0xec   : > { %2280 = vrot.lane.b32.xlu0 %v9776_v34, %s9370_s4  ;;  %2282 = vrot.lane.b32.xlu1 %v9789_v42, %s9370_s4 }
  0xf0   : > { %2380 = vrot.lane.b32.xlu0 %v9776_v34, %s9371_s9  ;;  %2382 = vrot.lane.b32.xlu1 %v9789_v42, %s9371_s9 }
  0xf4   : > { %2480 = vrot.lane.b32.xlu0 %v9776_v34, %s9372_s18  ;;  %2482 = vrot.lane.b32.xlu1 %v9789_v42, %s9372_s18 }
  0xf8   : > { %2580 = vrot.lane.b32.xlu0 %v9776_v34, %s9373_s30  ;;  %2582 = vrot.lane.b32.xlu1 %v9789_v42, %s9373_s30 }
 0x12e   : > { %v692_v28 = vpop.permute.xlu0 %691  ;;  %v869_v46 = vpop.permute.xlu1 %868 }
 0x12f   : > { %7378 = vmatmul.mubr.msk.bf16.vlgmr.msra.gmra.mrb[0].mxu0 %vm713_vm1, %v692_v28 }
 0x130   : > { %811 = vmatpush1.bf16.msra.mxu0 %v8663_v26  ;;  %769 = vmatprep.mubr.bf16.mxu0 %v9369_v0  ;;  %v8713_v26 = vld [vmem:[#allocation2 + $0x124] ss:$8 sps:$4 sm:$0xff]  }
 0x131   : > { %7384 = vmatprep.subr.msk.bf16.mxu0 %vm720_vm0, %v8666_v27 }
 0x132   : > { %v694_v31 = vpop.permute.xlu0 %693  ;;  %v871_v49 = vpop.permute.xlu1 %870 }
 0x134   : > { %813 = vmatpush1.bf16.msra.mxu0 %v805_v29  ;;  %v8711_v29 = vld [vmem:[#allocation2 + $0x120] ss:$8 sps:$4 sm:$0xff]  }
 0x135   : > { %902 = vmatprep.subr.bf16.mxu0 %v8671_v30  ;;  %v8714_v30 = vld [vmem:[#allocation2 + $0x134] ss:$8 sps:$4 sm:$0x3f]  }
 0x136   : > { %v969_v50 = vpop.permute.xlu0 %968  ;;  %v971_v56 = vpop.permute.xlu1 %970 }
 0x137   : > { %7379 = vmatmul.mubr.msk.bf16.gmra.mrb[4].mxu0 %vm713_vm1, %v694_v31  ;;  %v8716_v31 = vld [vmem:[#allocation2 + $0x130] ss:$8 sps:$4 sm:$0x3f]  }
 0x138   : > { %842 = vmatprep.mubr.bf16.mxu0 %v9369_v0  ;;  %v1601_v32 = vsel %vm720_vm0, %v8716_v31, 0  ;;  %v3210_v31 = vld [vmem:[%s10597_s29 + $0x18] sm:$0xff] }
 0x13a   : > { %v1069_v57 = vpop.permute.xlu0 %1068  ;;  %v1071_v63 = vpop.permute.xlu1 %1070 }
 0x13e   : > { %v1273_v9 = vpop.permute.xlu0 %1272 }
 0x13f   : > { %7385 = vmatmul.mubr.msk.bf16.vlgmr.msra.gmra.mrb[0].mxu0 %vm713_vm1, %v9697_v4  ;;  %v1301_v4 = vsel %vm720_vm0, %v8698_v3, 0  ;;  %v8749_v3 = vld [vmem:[#allocation2 + $0x1e4] ss:$8 sps:$4 sm:$0xff]  }
 0x140   : > { %903 = vmatpush1.bf16.msra.mxu0 %v8669_v36  ;;  %852 = vmatprep.mubr.bf16.mxu0 %v9369_v0 }
 0x141   : > { %7391 = vmatprep.subr.msk.bf16.mxu0 %vm720_vm0, %v8672_v37  ;;  %v8717_v37 = vld [vmem:[#allocation2 + $0x140] ss:$8 sps:$4 sm:$0xff]  }
 0x142   : > { %v1373_v19 = vpop.permute.xlu0 %1372 }
 0x144   : > { %905 = vmatpush1.bf16.msra.mxu0 %v897_v38  ;;  %v8720_v38 = vld [vmem:[#allocation2 + $0x154] ss:$8 sps:$4 sm:$0x3f]  }
 0x145   : > { %1002 = vmatprep.subr.bf16.mxu0 %v8677_v39  ;;  %v8722_v39 = vld [vmem:[#allocation2 + $0x150] ss:$8 sps:$4 sm:$0x3f]  }
 0x146   : > { %v1473_v28 = vpop.permute.xlu0 %1472  ;;  %v1703_v40 = vsel %vm720_vm0, %v8722_v39, 0  ;;  %v8770_v39 = vld [vmem:[#allocation2 + $0x250] ss:$8 sps:$4 sm:$0x3f]  }
 0x147   : > { %7386 = vmatmul.mubr.msk.bf16.gmra.mrb[4].mxu0 %vm713_vm1, %v9702_v6  ;;  %v2675_v6 = vld [vmem:[%s9692_s23 + $0x4] sm:$0xff] }
 0x148   : > { %934 = vmatprep.mubr.bf16.mxu0 %v9369_v0  ;;  %v9834_v8 = vpack.c.bf16 %v2676_v7, %v2675_v6  ;;  %v8747_v6 = vld [vmem:[#allocation2 + $0x1e0] ss:$8 sps:$4 sm:$0xff]   ;;  %v8750_v7 = vld [vmem:[#allocation2 + $0x1f4] ss:$8 sps:$4 sm:$0x3f]  }
 0x14a   : > { %2784 = vrot.lane.b32.xlu0 %v9834_v8, %s9370_s4  ;;  %v1573_v36 = vpop.permute.xlu0 %1572 }
 0x14e   : > { %2884 = vrot.lane.b32.xlu0 %v9834_v8, %s9371_s9 }
 0x14f   : > { %7392 = vmatmul.mubr.msk.bf16.vlgmr.msra.gmra.mrb[0].mxu0 %vm713_vm1, %v869_v46  ;;  %v8728_v46 = vld [vmem:[#allocation2 + $0x170] ss:$8 sps:$4 sm:$0x3f]  }
 0x150   : > { %1003 = vmatpush1.bf16.msra.mxu0 %v8675_v43  ;;  %944 = vmatprep.mubr.bf16.mxu0 %v9369_v0 }
 0x151   : > { %7398 = vmatprep.subr.msk.bf16.mxu0 %vm720_vm0, %v8678_v44  ;;  %v8723_v44 = vld [vmem:[#allocation2 + $0x160] ss:$8 sps:$4 sm:$0xff]  }
 0x152   : > { %2984 = vrot.lane.b32.xlu0 %v9834_v8, %s9372_s18 }
 0x154   : > { %1005 = vmatpush1.bf16.msra.mxu0 %v997_v47  ;;  %v1805_v47 = vsel %vm720_vm0, %v8728_v46, 0 }
 0x155   : > { %1102 = vmatprep.subr.bf16.mxu0 %v8683_v48  ;;  %v8731_v48 = vld [vmem:[#allocation2 + $0x184] ss:$8 sps:$4 sm:$0xff]  }
 0x156   : > { %3084 = vrot.lane.b32.xlu0 %v9834_v8, %s9373_s30 }
 0x157   : > { %7393 = vmatmul.mubr.msk.bf16.gmra.mrb[4].mxu0 %vm713_vm1, %v871_v49  ;;  %v1777_v49 = vpop.permute.xlu0 %1776 }
 0x158   : > { %1034 = vmatprep.mubr.bf16.mxu0 %v9369_v0 }
 0x15f   : > { %7399 = vmatmul.mubr.msk.bf16.vlgmr.msra.gmra.mrb[0].mxu0 %vm713_vm1, %v969_v50  ;;  %v8729_v50 = vld [vmem:[#allocation2 + $0x180] ss:$8 sps:$4 sm:$0xff]  }
 0x160   : > { %1103 = vmatpush1.bf16.msra.mxu0 %v8681_v51  ;;  %1044 = vmatprep.mubr.bf16.mxu0 %v9369_v0  ;;  %v8732_v51 = vld [vmem:[#allocation2 + $0x194] ss:$8 sps:$4 sm:$0x3f]  }
 0x161   : > { %7405 = vmatprep.subr.msk.bf16.mxu0 %vm720_vm0, %v8684_v52  ;;  %v8734_v52 = vld [vmem:[#allocation2 + $0x190] ss:$8 sps:$4 sm:$0x3f]  }
 0x164   : > { %1105 = vmatpush1.bf16.msra.mxu0 %v1097_v54 }
 0x165   : > { %1204 = vmatprep.subr.bf16.mxu0 %v8689_v55  ;;  %v8735_v55 = vld [vmem:[#allocation2 + $0x1a0] ss:$8 sps:$4 sm:$0xff]  }
 0x167   : > { %7400 = vmatmul.mubr.msk.bf16.gmra.mrb[4].mxu0 %vm713_vm1, %v971_v56  ;;  %v8738_v56 = vld [vmem:[#allocation2 + $0x1b4] ss:$8 sps:$4 sm:$0x3f]  }
 0x168   : > { %1134 = vmatprep.mubr.bf16.mxu0 %v9369_v0 }
 0x16f   : > { %7406 = vmatmul.mubr.msk.bf16.vlgmr.msra.gmra.mrb[0].mxu0 %vm713_vm1, %v1069_v57  ;;  %v8740_v57 = vld [vmem:[#allocation2 + $0x1b0] ss:$8 sps:$4 sm:$0x3f]  }
 0x170   : > { %1205 = vmatpush1.bf16.msra.mxu0 %v8687_v58  ;;  %1144 = vmatprep.mubr.bf16.mxu0 %v9369_v0  ;;  %v2005_v58 = vsel %vm720_vm0, %v8740_v57, 0  ;;  %v8776_v57 = vld [vmem:[#allocation2 + $0x270] ss:$8 sps:$4 sm:$0x3f]  }
 0x171   : > { %7412 = vmatprep.subr.msk.bf16.mxu0 %vm720_vm0, %v8690_v59  ;;  %v8743_v59 = vld [vmem:[#allocation2 + $0x1c4] ss:$8 sps:$4 sm:$0xff]  }
 0x174   : > { %1207 = vmatpush1.bf16.msra.mxu0 %v1199_v61 }
 0x175   : > { %1306 = vmatprep.subr.bf16.mxu0 %v8695_v62  ;;  %v8741_v62 = vld [vmem:[#allocation2 + $0x1c0] ss:$8 sps:$4 sm:$0xff]  }
 0x177   : > { %7407 = vmatmul.mubr.msk.bf16.gmra.mrb[4].mxu0 %vm713_vm1, %v1071_v63  ;;  %v8744_v63 = vld [vmem:[#allocation2 + $0x1d4] ss:$8 sps:$4 sm:$0x3f]  }
 0x178   : > { %1236 = vmatprep.mubr.bf16.mxu0 %v9369_v0 }
 0x17f   : > { %7413 = vmatmul.mubr.msk.bf16.vlgmr.msra.gmra.mrb[0].mxu0 %vm713_vm1, %v9724_v17  ;;  %v9846_v17 = vpack.c.bf16 %v2678_v14, %v2677_v13  ;;  %v8753_v13 = vld [vmem:[#allocation2 + $0x200] ss:$8 sps:$4 sm:$0xff]   ;;  %v8756_v14 = vld [vmem:[#allocation2 + $0x214] ss:$8 sps:$4 sm:$0x3f]  }
 0x180   : > { %1307 = vmatpush1.bf16.msra.mxu0 %v8693_v1  ;;  %1246 = vmatprep.mubr.bf16.mxu0 %v9369_v0  ;;  %v8746_v1 = vld [vmem:[#allocation2 + $0x1d0] ss:$8 sps:$4 sm:$0x3f]  }
 0x181   : > { %7419 = vmatprep.subr.msk.bf16.mxu0 %vm720_vm0, %v8696_v2  ;;  %2786 = vrot.lane.b32.xlu1 %v9846_v17, %s9370_s4  ;;  %v2105_v2 = vsel %vm720_vm0, %v8746_v1, 0  ;;  %v3223_v1 = vld [vmem:[%s10597_s29 + $0x80] sm:$0xff] }
 0x184   : > { %1309 = vmatpush1.bf16.msra.mxu0 %v1301_v4 }
 0x185   : > { %1406 = vmatprep.subr.bf16.mxu0 %v8701_v5  ;;  %2886 = vrot.lane.b32.xlu1 %v9846_v17, %s9371_s9 }
 0x187   : > { %7414 = vmatmul.mubr.msk.bf16.gmra.mrb[4].mxu0 %vm713_vm1, %v9726_v18  ;;  %v1275_v18 = vpop.permute.xlu1 %1274 }
 0x188   : > { %1338 = vmatprep.mubr.bf16.mxu0 %v9369_v0 }
 0x189   : > { %2986 = vrot.lane.b32.xlu1 %v9846_v17, %s9372_s18  ;;  %s10601_s18 = sld [smem:[#allocation31_spill]] }
 0x18b   : > { %v1375_v27 = vpop.permute.xlu1 %1374 }
 0x18d   : > { %3086 = vrot.lane.b32.xlu1 %v9846_v17, %s9373_s30  ;;  %s10602_s30 = sld [smem:[#allocation22_spill]] }
 0x18f   : > { %7420 = vmatmul.mubr.msk.bf16.vlgmr.msra.gmra.mrb[0].mxu0 %vm713_vm1, %v1273_v9  ;;  %v1475_v35 = vpop.permute.xlu1 %1474  ;;  %v8752_v9 = vld [vmem:[#allocation2 + $0x1f0] ss:$8 sps:$4 sm:$0x3f]  }
 0x190   : > { %1407 = vmatpush1.bf16.msra.mxu0 %v8699_v10  ;;  %1348 = vmatprep.mubr.bf16.mxu0 %v9369_v0  ;;  %v2207_v10 = vsel %vm720_vm0, %v8752_v9, 0  ;;  %v8782_v9 = vld [vmem:[#allocation2 + $0x290] ss:$8 sps:$4 sm:$0x3f]  }
 0x191   : > { %7426 = vmatprep.subr.msk.bf16.mxu0 %vm720_vm0, %v8702_v11  ;;  %v8755_v11 = vld [vmem:[#allocation2 + $0x204] ss:$8 sps:$4 sm:$0xff]  }
 0x193   : > { %v1575_v43 = vpop.permute.xlu1 %1574  ;;  %p10604_p11 = scmp.ne.s32.totalorder %s10602_s30, 0 }
 0x194   : > { %1409 = vmatpush1.bf16.msra.mxu0 %v1401_v15  ;;  %v8758_v15 = vld [vmem:[#allocation2 + $0x210] ss:$8 sps:$4 sm:$0x3f]  }
 0x195   : > { %1506 = vmatprep.subr.bf16.mxu0 %v8707_v16  ;;  %v2309_v16 = vsel %vm720_vm0, %v8758_v15, 0  ;;  %v8788_v15 = vld [vmem:[#allocation2 + $0x2b0] ss:$8 sps:$4 sm:$0x3f]  }
 0x197   : > { %7421 = vmatmul.mubr.msk.bf16.gmra.mrb[4].mxu0 %vm713_vm1, %v1275_v18  ;;  %v1779_v54 = vpop.permute.xlu1 %1778  ;;  %v8761_v18 = vld [vmem:[#allocation2 + $0x224] ss:$8 sps:$4 sm:$0xff]  }
 0x198   : > { %1438 = vmatprep.mubr.bf16.mxu0 %v9369_v0 }
 0x19b   : > { %v1879_v60 = vpop.permute.xlu1 %1878 }
 0x19f   : > { %7427 = vmatmul.mubr.msk.bf16.vlgmr.msra.gmra.mrb[0].mxu0 %vm713_vm1, %v1373_v19  ;;  %v1979_v4 = vpop.permute.xlu1 %1978 }
 0x1a0   : > { %1507 = vmatpush1.bf16.msra.mxu0 %v8705_v20  ;;  %1448 = vmatprep.mubr.bf16.mxu0 %v9369_v0  ;;  %v8759_v20 = vld [vmem:[#allocation2 + $0x220] ss:$8 sps:$4 sm:$0xff]  }
 0x1a1   : > { %7433 = vmatprep.subr.msk.bf16.mxu0 %vm720_vm0, %v8708_v22  ;;  %v8762_v22 = vld [vmem:[#allocation2 + $0x234] ss:$8 sps:$4 sm:$0x3f]  }
 0x1a3   : > { %v2079_v12 = vpop.permute.xlu1 %2078 }
 0x1a4   : > { %1509 = vmatpush1.bf16.msra.mxu0 %v1501_v25  ;;  %v8767_v25 = vld [vmem:[#allocation2 + $0x244] ss:$8 sps:$4 sm:$0xff]  }
 0x1a5   : > { %1606 = vmatprep.subr.bf16.mxu0 %v8713_v26 }
 0x1a7   : > { %7428 = vmatmul.mubr.msk.bf16.gmra.mrb[4].mxu0 %vm713_vm1, %v1375_v27  ;;  %v2283_v26 = vpop.permute.xlu1 %2282  ;;  %v3208_v27 = vld [vmem:[%s10597_s29 + $0x8] sm:$0xff] }
 0x1a8   : > { %1538 = vmatprep.mubr.bf16.mxu0 %v9369_v0 }
 0x1af   : > { %7434 = vmatmul.mubr.msk.bf16.vlgmr.msra.gmra.mrb[0].mxu0 %vm713_vm1, %v1473_v28  ;;  %v3209_v28 = vld [vmem:[%s10597_s29 + $0x10] sm:$0xff] }
 0x1b0   : > { %1607 = vmatpush1.bf16.msra.mxu0 %v8711_v29  ;;  %1548 = vmatprep.mubr.bf16.mxu0 %v9369_v0  ;;  %v9374_v29 = vmov 0.0|0.0  }
 0x1b1   : > { %7440 = vmatprep.subr.msk.bf16.mxu0 %vm720_vm0, %v8714_v30  ;;  %8116 = vmatprep.subr.bf16.mxu1 %v9374_v29 }
 0x1b4   : > { %1609 = vmatpush1.bf16.msra.mxu0 %v1601_v32  ;;  %v8120_v32 = vpack.c.bf16 %v3210_v31, %v3209_v28 }
 0x1b5   : > { %1708 = vmatprep.subr.bf16.mxu0 %v8719_v33  ;;  %v3211_v33 = vld [vmem:[%s10597_s29 + $0x20] sm:$0xff] }
 0x1b7   : > { %7435 = vmatmul.mubr.msk.bf16.gmra.mrb[4].mxu0 %vm713_vm1, %v1475_v35  ;;  %v3212_v35 = vld [vmem:[%s10597_s29 + $0x28] sm:$0xff] }
 0x1b8   : > { %1638 = vmatprep.mubr.bf16.mxu0 %v9369_v0 }
 0x1bf   : > { %7441 = vmatmul.mubr.msk.bf16.vlgmr.msra.gmra.mrb[0].mxu0 %vm713_vm1, %v1573_v36 }
 0x1c0   : > { %1709 = vmatpush1.bf16.msra.mxu0 %v8717_v37  ;;  %1648 = vmatprep.mubr.bf16.mxu0 %v9369_v0  ;;  %v8765_v37 = vld [vmem:[#allocation2 + $0x240] ss:$8 sps:$4 sm:$0xff]  }
 0x1c1   : > { %7447 = vmatprep.subr.msk.bf16.mxu0 %vm720_vm0, %v8720_v38  ;;  %v8768_v38 = vld [vmem:[#allocation2 + $0x254] ss:$8 sps:$4 sm:$0x3f]  }
 0x1c4   : > { %1711 = vmatpush1.bf16.msra.mxu0 %v1703_v40  ;;  %v8123_v40 = vpack.c.bf16 %v3212_v35, %v3211_v33  ;;  %v8801_v33 = vld [vmem:[#allocation2 + $0x300] ss:$8 sps:$4 sm:$0xff]   ;;  %v8804_v35 = vld [vmem:[#allocation2 + $0x314] ss:$8 sps:$4 sm:$0x3f]  }
 0x1c5   : > { %1810 = vmatprep.subr.bf16.mxu0 %v8725_v41  ;;  %v3213_v41 = vld [vmem:[%s10597_s29 + $0x30] sm:$0xff] }
 0x1c7   : > { %7442 = vmatmul.mubr.msk.bf16.gmra.mrb[4].mxu0 %vm713_vm1, %v1575_v43  ;;  %v3214_v43 = vld [vmem:[%s10597_s29 + $0x38] sm:$0xff] }
 0x1c8   : > { %1740 = vmatprep.mubr.bf16.mxu0 %v9369_v0  ;;  %v8126_v46 = vpack.c.bf16 %v3214_v43, %v3213_v41  ;;  %v3225_v41 = vld [vmem:[%s10597_s29 + $0x90] sm:$0xff]  ;;  %v3226_v43 = vld [vmem:[%s10597_s29 + $0x98] sm:$0xff] }
 0x1cf   : > { %7448 = vmatmul.mubr.msk.bf16.vlgmr.msra.gmra.mrb[0].mxu0 %vm713_vm1, %v9746_v21  ;;  %v1905_v21 = vsel %vm720_vm0, %v8734_v52, 0  ;;  %v3218_v52 = vld [vmem:[%s10597_s29 + $0x58] sm:$0xff] }
 0x1d0   : > { %1811 = vmatpush1.bf16.msra.mxu0 %v8723_v44  ;;  %1750 = vmatprep.mubr.bf16.mxu0 %v9369_v0  ;;  %v2509_v44 = vsel %vm720_vm0, %v8770_v39, 0 }
 0x1d1   : > { %7454 = vmatprep.subr.msk.bf16.mxu0 %vm720_vm0, %v8726_v45  ;;  %v8773_v45 = vld [vmem:[#allocation2 + $0x264] ss:$8 sps:$4 sm:$0xff]  }
 0x1d4   : > { %1813 = vmatpush1.bf16.msra.mxu0 %v1805_v47  ;;  %v3215_v47 = vld [vmem:[%s10597_s29 + $0x40] sm:$0xff] }
 0x1d5   : > { %1910 = vmatprep.subr.bf16.mxu0 %v8731_v48  ;;  %v3216_v48 = vld [vmem:[%s10597_s29 + $0x48] sm:$0xff] }
 0x1d7   : > { %7449 = vmatmul.mubr.msk.bf16.gmra.mrb[4].mxu0 %vm713_vm1, %v9754_v24  ;;  %v1877_v24 = vpop.permute.xlu0 %1876 }
 0x1d8   : > { %1842 = vmatprep.mubr.bf16.mxu0 %v9369_v0 }
 0x1db   : > { %v1977_v61 = vpop.permute.xlu0 %1976 }
 0x1df   : > { %7455 = vmatmul.mubr.msk.bf16.vlgmr.msra.gmra.mrb[0].mxu0 %vm713_vm1, %v1777_v49  ;;  %v2077_v5 = vpop.permute.xlu0 %2076  ;;  %v2383_v49 = vpop.permute.xlu1 %2382 }
 0x1e0   : > { %1911 = vmatpush1.bf16.msra.mxu0 %v8729_v50  ;;  %1852 = vmatprep.mubr.bf16.mxu0 %v9369_v0  ;;  %v8129_v50 = vpack.c.bf16 %v3216_v48, %v3215_v47  ;;  %v3181_v47 = vlaneseq }
 0x1e1   : > { %7461 = vmatprep.subr.msk.bf16.mxu0 %vm720_vm0, %v8732_v51  ;;  %v3217_v51 = vld [vmem:[%s10597_s29 + $0x50] sm:$0xff] }
 0x1e2   : > { %v10049_v48 = vshrl.u32 %v3181_v47, 7  ;;  %v3346_v47 = vld [vmem:[#allocation5 + $0xa0] sm:$0xff] }
 0x1e3   : > { %v2281_v19 = vpop.permute.xlu0 %2280 }
 0x1e4   : > { %1913 = vmatpush1.bf16.msra.mxu0 %v1905_v21  ;;  %v8132_v21 = vpack.c.bf16 %v3218_v52, %v3217_v51  ;;  %v3187_v51 = vsub.s32 1, %v10049_v48 }
 0x1e5   : > { %2010 = vmatprep.subr.bf16.mxu0 %v8737_v53  ;;  %v3219_v53 = vld [vmem:[%s10597_s29 + $0x60] sm:$0xff] }
 0x1e7   : > { %7456 = vmatmul.mubr.msk.bf16.gmra.mrb[4].mxu0 %vm713_vm1, %v1779_v54  ;;  %v2381_v36 = vpop.permute.xlu0 %2380  ;;  %v3220_v54 = vld [vmem:[%s10597_s29 + $0x68] sm:$0xff] }
 0x1e8   : > { %1942 = vmatprep.mubr.bf16.mxu0 %v9369_v0 }
 0x1ef   : > { %7462 = vmatmul.mubr.msk.bf16.vlgmr.msra.gmra.mrb[0].mxu0 %vm713_vm1, %v1877_v24  ;;  %v2481_v24 = vpop.permute.xlu0 %2480 }
 0x1f0   : > { %2011 = vmatpush1.bf16.msra.mxu0 %v8735_v55  ;;  %1952 = vmatprep.mubr.bf16.mxu0 %v9369_v0  ;;  %v8771_v55 = vld [vmem:[#allocation2 + $0x260] ss:$8 sps:$4 sm:$0xff]  }
 0x1f1   : > { %7468 = vmatprep.subr.msk.bf16.mxu0 %vm720_vm0, %v8738_v56  ;;  %v8774_v56 = vld [vmem:[#allocation2 + $0x274] ss:$8 sps:$4 sm:$0x3f]  }
 0x1f4   : > { %2013 = vmatpush1.bf16.msra.mxu0 %v2005_v58  ;;  %v8135_v58 = vpack.c.bf16 %v3220_v54, %v3219_v53 }
 0x1f5   : > { %2110 = vmatprep.subr.bf16.mxu0 %v8743_v59  ;;  %v3221_v59 = vld [vmem:[%s10597_s29 + $0x70] sm:$0xff] }
 0x1f7   : > { %7463 = vmatmul.mubr.msk.bf16.gmra.mrb[4].mxu0 %vm713_vm1, %v1879_v60  ;;  %v3222_v60 = vld [vmem:[%s10597_s29 + $0x78] sm:$0xff] }
 0x1f8   : > { %2042 = vmatprep.mubr.bf16.mxu0 %v9369_v0 }
 0x1ff   : > { %7469 = vmatmul.mubr.msk.bf16.vlgmr.msra.gmra.mrb[0].mxu0 %vm713_vm1, %v1977_v61  ;;  %v2609_v61 = vsel %vm720_vm0, %v8776_v57, 0 }
 0x200   : > { %2111 = vmatpush1.bf16.msra.mxu0 %v8741_v62  ;;  %2052 = vmatprep.mubr.bf16.mxu0 %v9369_v0  ;;  %v8779_v62 = vld [vmem:[#allocation2 + $0x284] ss:$8 sps:$4 sm:$0xff]  }
 0x201   : > { %7475 = vmatprep.subr.msk.bf16.mxu0 %vm720_vm0, %v8744_v63  ;;  %v8138_v63 = vpack.c.bf16 %v3222_v60, %v3221_v59 }
 0x204   : > { %2113 = vmatpush1.bf16.msra.mxu0 %v2105_v2  ;;  %v3224_v2 = vld [vmem:[%s10597_s29 + $0x88] sm:$0xff] }
 0x205   : > { %2212 = vmatprep.subr.bf16.mxu0 %v8749_v3  ;;  %v2483_v3 = vpop.permute.xlu1 %2482 }
 0x207   : > { %7470 = vmatmul.mubr.msk.bf16.gmra.mrb[4].mxu0 %vm713_vm1, %v1979_v4  ;;  %v8141_v4 = vpack.c.bf16 %v3224_v2, %v3223_v1  ;;  %v3328_v2 = vld [vmem:[#allocation5 + $0x10] sm:$0xff] }
 0x208   : > { %2142 = vmatprep.mubr.bf16.mxu0 %v9369_v0 }
 0x20f   : > { %7476 = vmatmul.mubr.msk.bf16.vlgmr.msra.gmra.mrb[0].mxu0 %vm713_vm1, %v2077_v5  ;;  %v2581_v5 = vpop.permute.xlu0 %2580 }
 0x210   : > { %2213 = vmatpush1.bf16.msra.mxu0 %v8747_v6  ;;  %2152 = vmatprep.mubr.bf16.mxu0 %v9369_v0  ;;  %v8777_v6 = vld [vmem:[#allocation2 + $0x280] ss:$8 sps:$4 sm:$0xff]  }
 0x211   : > { %7482 = vmatprep.subr.msk.bf16.mxu0 %vm720_vm0, %v8750_v7  ;;  %v8780_v7 = vld [vmem:[#allocation2 + $0x294] ss:$8 sps:$4 sm:$0x3f]  }
 0x214   : > { %2215 = vmatpush1.bf16.msra.mxu0 %v2207_v10  ;;  %v2711_v10 = vsel %vm720_vm0, %v8782_v9, 0 }
 0x215   : > { %2314 = vmatprep.subr.bf16.mxu0 %v8755_v11  ;;  %v8785_v11 = vld [vmem:[#allocation2 + $0x2a4] ss:$8 sps:$4 sm:$0xff]  }
 0x217   : > { %7477 = vmatmul.mubr.msk.bf16.gmra.mrb[4].mxu0 %vm713_vm1, %v2079_v12  ;;  %v2583_v12 = vpop.permute.xlu1 %2582 }
 0x218   : > { %2244 = vmatprep.mubr.bf16.mxu0 %v9369_v0 }
 0x21f   : > { %7483 = vmatmul.mubr.msk.bf16.vlgmr.msra.gmra.mrb[0].mxu0 %vm713_vm1, %v9776_v34  ;;  %v2409_v34 = vsel %vm720_vm0, %v8764_v23, 0  ;;  %v8794_v23 = vld [vmem:[#allocation2 + $0x2d0] ss:$8 sps:$4 sm:$0x3f]  }
 0x220   : > { %2315 = vmatpush1.bf16.msra.mxu0 %v8753_v13  ;;  %2254 = vmatprep.mubr.bf16.mxu0 %v9369_v0  ;;  %v8783_v13 = vld [vmem:[#allocation2 + $0x2a0] ss:$8 sps:$4 sm:$0xff]  }
 0x221   : > { %7489 = vmatprep.subr.msk.bf16.mxu0 %vm720_vm0, %v8756_v14  ;;  %v8786_v14 = vld [vmem:[#allocation2 + $0x2b4] ss:$8 sps:$4 sm:$0x3f]  }
 0x224   : > { %2317 = vmatpush1.bf16.msra.mxu0 %v2309_v16  ;;  %v2813_v16 = vsel %vm720_vm0, %v8788_v15, 0 }
 0x225   : > { %2414 = vmatprep.subr.bf16.mxu0 %v8761_v18  ;;  %v8791_v18 = vld [vmem:[#allocation2 + $0x2c4] ss:$8 sps:$4 sm:$0xff]  }
 0x227   : > { %7484 = vmatmul.mubr.msk.bf16.gmra.mrb[4].mxu0 %vm713_vm1, %v9789_v42  ;;  %v3207_v42 = vld [vmem:[%s10596_s21] sm:$0xff] }
 0x228   : > { %2346 = vmatprep.mubr.bf16.mxu0 %v9369_v0  ;;  %v8117_v30 = vpack.c.bf16 %v3208_v27, %v3207_v42  ;;  %v8798_v42 = vld [vmem:[#allocation2 + $0x2f4] ss:$8 sps:$4 sm:$0x3f]   ;;  %v8800_v27 = vld [vmem:[#allocation2 + $0x2f0] ss:$8 sps:$4 sm:$0x3f]  }
 0x229   : > { %v3013_v28 = vsel %vm720_vm0, %v8800_v27, 0 }
 0x22a   : > { %8118 = vmatpush1.bf16.msra.mxu1 %v8117_v30  ;;  %v8803_v30 = vld [vmem:[#allocation2 + $0x304] ss:$8 sps:$4 sm:$0xff]  }
 0x22b   : > { %8119 = vmatprep.subr.bf16.mxu1 %v9374_v29 }
 0x22e   : > { %8121 = vmatpush1.bf16.msra.mxu1 %v8120_v32 }
 0x22f   : > { %7490 = vmatmul.mubr.msk.bf16.vlgmr.msra.gmra.mrb[0].mxu0 %vm713_vm1, %v2281_v19  ;;  %8122 = vmatprep.subr.bf16.mxu1 %v9374_v29  ;;  %v2785_v19 = vpop.permute.xlu0 %2784 }
 0x230   : > { %2415 = vmatpush1.bf16.msra.mxu0 %v8759_v20  ;;  %2356 = vmatprep.mubr.bf16.mxu0 %v9369_v0  ;;  %v8789_v20 = vld [vmem:[#allocation2 + $0x2c0] ss:$8 sps:$4 sm:$0xff]  }
 0x231   : > { %7496 = vmatprep.subr.msk.bf16.mxu0 %vm720_vm0, %v8762_v22  ;;  %v8792_v22 = vld [vmem:[#allocation2 + $0x2d4] ss:$8 sps:$4 sm:$0x3f]  }
 0x232   : > { %8124 = vmatpush1.bf16.msra.mxu1 %v8123_v40 }
 0x233   : > { %8125 = vmatprep.subr.bf16.mxu1 %v9374_v29 }
 0x234   : > { %2417 = vmatpush1.bf16.msra.mxu0 %v2409_v34  ;;  %v8797_v34 = vld [vmem:[#allocation2 + $0x2e4] ss:$8 sps:$4 sm:$0xff]  }
 0x235   : > { %2514 = vmatprep.subr.bf16.mxu0 %v8767_v25  ;;  %v2787_v25 = vpop.permute.xlu1 %2786 }
 0x236   : > { %8127 = vmatpush1.bf16.msra.mxu1 %v8126_v46  ;;  %v3227_v46 = vld [vmem:[%s10597_s29 + $0xa0] sm:$0xff] }
 0x237   : > { %7491 = vmatmul.mubr.msk.bf16.gmra.mrb[4].mxu0 %vm713_vm1, %v2283_v26  ;;  %8128 = vmatprep.subr.bf16.mxu1 %v9374_v29  ;;  %v8795_v26 = vld [vmem:[#allocation2 + $0x2e0] ss:$8 sps:$4 sm:$0xff]  }
 0x238   : > { %2446 = vmatprep.mubr.bf16.mxu0 %v9369_v0 }
 0x239   : > { %v2887_v31 = vpop.permute.xlu1 %2886 }
 0x23a   : > { %8130 = vmatpush1.bf16.msra.mxu1 %v8129_v50  ;;  %v3179_v50 = vld [vmem:[%s10598_s0] sm:$0x3]  ;;  %s10600_s0 = sld [smem:[#allocation30_spill]] }
 0x23b   : > { %8131 = vmatprep.subr.bf16.mxu1 %v9374_v29 }
 0x23e   : > { %8133 = vmatpush1.bf16.msra.mxu1 %v8132_v21  ;;  %v3188_v21 = vrot.slane %v3179_v50, %v3187_v51 }
 0x23f   : > { %7497 = vmatmul.mubr.msk.bf16.vlgmr.msra.gmra.mrb[0].mxu0 %vm713_vm1, %v2381_v36  ;;  %8134 = vmatprep.subr.bf16.mxu1 %v9374_v29  ;;  %v8806_v36 = vld [vmem:[#allocation2 + $0x310] ss:$8 sps:$4 sm:$0x3f]  }
 0x240   : > { %2515 = vmatpush1.bf16.msra.mxu0 %v8765_v37  ;;  %2456 = vmatprep.mubr.bf16.mxu0 %v9369_v0  ;;  %v3113_v37 = vsel %vm720_vm0, %v8806_v36, 0  ;;  %v3340_v36 = vld [vmem:[#allocation5 + $0x70] sm:$0xff] }
 0x241   : > { %7503 = vmatprep.subr.msk.bf16.mxu0 %vm720_vm0, %v8768_v38  ;;  %v2987_v38 = vpop.permute.xlu1 %2986 }
 0x242   : > { %8136 = vmatpush1.bf16.msra.mxu1 %v8135_v58 }
 0x243   : > { %8137 = vmatprep.subr.bf16.mxu1 %v9374_v29 }
 0x244   : > { %2517 = vmatpush1.bf16.msra.mxu0 %v2509_v44  ;;  %v8144_v44 = vpack.c.bf16 %v3226_v43, %v3225_v41  ;;  %v3344_v43 = vld [vmem:[#allocation5 + $0x90] sm:$0xff] }
 0x245   : > { %2614 = vmatprep.subr.bf16.mxu0 %v8773_v45  ;;  %v3087_v40 = vpop.permute.xlu1 %3086  ;;  %v9375_v45 = vmov 0.0  }
 0x246   : > { %8139 = vmatpush1.bf16.msra.mxu1 %v8138_v63 }
 0x247   : > { %7498 = vmatmul.mubr.msk.bf16.gmra.mrb[4].mxu0 %vm713_vm1, %v2383_v49  ;;  %8140 = vmatprep.subr.bf16.mxu1 %v9374_v29  ;;  %v3183_v49 = vsub.s32 0, %v10049_v48 }
 0x248   : > { %2546 = vmatprep.mubr.bf16.mxu0 %v9369_v0 }
 0x249   : > { %v3184_v52 = vrot.slane %v3179_v50, %v3183_v49  ;;  %v3436_v50 = vld [vmem:[%s10533_s5] sm:$0xff] }
 0x24a   : > { %8142 = vmatpush1.bf16.msra.mxu1 %v8141_v4 }
 0x24b   : > { %8143 = vmatprep.subr.bf16.mxu1 %v9374_v29 }
 0x24e   : > { %8145 = vmatpush1.bf16.msra.mxu1 %v8144_v44  ;;  %v3345_v44 = vld [vmem:[#allocation5 + $0x98] sm:$0xff] }
 0x24f   : > { %7504 = vmatmul.mubr.msk.bf16.vlgmr.msra.gmra.mrb[0].mxu0 %vm713_vm1, %v2481_v24  ;;  %3281 = vmatprep.subr.mxu1 %v9375_v45 }
 0x250   : > { %2615 = vmatpush1.bf16.msra.mxu0 %v8771_v55  ;;  %2556 = vmatprep.mubr.bf16.mxu0 %v9369_v0  ;;  %v3326_v55 = vld [vmem:[#allocation5] sm:$0xff] }
 0x251   : > { %7510 = vmatprep.subr.msk.bf16.mxu0 %vm720_vm0, %v8774_v56  ;;  %v3327_v56 = vld [vmem:[#allocation5 + $0x8] sm:$0xff] }
 0x252   : > { %3282 = vmatpush1.msra.mxu1 %v3227_v46  ;;  %v8174_v46 = vpack.c.bf16 %v3345_v44, %v3344_v43  ;;  %v8822_v44 = vld [vmem:[#allocation7 + $0x10] ss:$8 sps:$4 sm:$0xff]  }
 0x253   : > { %8146 = vmatprep.subr.bf16.mxu1 %v9374_v29 }
 0x254   : > { %2617 = vmatpush1.bf16.msra.mxu0 %v2609_v61 }
 0x255   : > { %2716 = vmatprep.subr.bf16.mxu0 %v8779_v62  ;;  %v8147_v62 = vpack.c.bf16 %v3327_v56, %v3326_v55 }
 0x257   : > { %7505 = vmatmul.mubr.msk.bf16.gmra.mrb[4].mxu0 %vm713_vm1, %v2483_v3  ;;  %v3329_v3 = vld [vmem:[#allocation5 + $0x18] sm:$0xff] }
 0x258   : > { %2646 = vmatprep.mubr.bf16.mxu0 %v9369_v0 }
 0x25f   : > { %7511 = vmatmul.mubr.msk.bf16.vlgmr.msra.gmra.mrb[0].mxu0 %vm713_vm1, %v2581_v5 }
 0x260   : > { %2717 = vmatpush1.bf16.msra.mxu0 %v8777_v6  ;;  %2656 = vmatprep.mubr.bf16.mxu0 %v9369_v0  ;;  %v8150_v6 = vpack.c.bf16 %v3329_v3, %v3328_v2 }
 0x261   : > { %7517 = vmatprep.subr.msk.bf16.mxu0 %vm720_vm0, %v8780_v7 }
 0x264   : > { %2719 = vmatpush1.bf16.msra.mxu0 %v2711_v10 }
 0x265   : > { %2818 = vmatprep.subr.bf16.mxu0 %v8785_v11  ;;  %v3330_v11 = vld [vmem:[#allocation5 + $0x20] sm:$0xff] }
 0x267   : > { %7512 = vmatmul.mubr.msk.bf16.gmra.mrb[4].mxu0 %vm713_vm1, %v2583_v12  ;;  %v3331_v12 = vld [vmem:[#allocation5 + $0x28] sm:$0xff] }
 0x268   : > { %2748 = vmatprep.mubr.bf16.mxu0 %v9369_v0 }
 0x26f   : > { %7518 = vmatmul.mubr.msk.bf16.vlgmr.msra.gmra.mrb[0].mxu0 %vm713_vm1, %v9834_v8  ;;  %v2913_v8 = vsel %vm720_vm0, %v8794_v23, 0  ;;  %v3332_v23 = vld [vmem:[#allocation5 + $0x30] sm:$0xff] }
 0x270   : > { %2819 = vmatpush1.bf16.msra.mxu0 %v8783_v13  ;;  %2758 = vmatprep.mubr.bf16.mxu0 %v9369_v0 }
 0x271   : > { %7524 = vmatprep.subr.msk.bf16.mxu0 %vm720_vm0, %v8786_v14 }
 0x274   : > { %2821 = vmatpush1.bf16.msra.mxu0 %v2813_v16 }
 0x275   : > { %2918 = vmatprep.subr.bf16.mxu0 %v8791_v18 }
 0x277   : > { %7519 = vmatmul.mubr.msk.bf16.gmra.mrb[4].mxu0 %vm713_vm1, %v9846_v17  ;;  %v2885_v17 = vpop.permute.xlu0 %2884 }
 0x278   : > { %2850 = vmatprep.mubr.bf16.mxu0 %v9369_v0 }
 0x27b   : > { %v2985_v32 = vpop.permute.xlu0 %2984 }
 0x27f   : > { %7525 = vmatmul.mubr.msk.bf16.vlgmr.msra.gmra.mrb[0].mxu0 %vm713_vm1, %v2785_v19  ;;  %v3085_v39 = vpop.permute.xlu0 %3084  ;;  %v8153_v19 = vpack.c.bf16 %v3331_v12, %v3330_v11  ;;  %v3523_v11 = vld [vmem:[%s10534_s6] sm:$0xff]  ;;  %v3524_v12 = vld [vmem:[%s10534_s6 + $0x8] sm:$0x3f] }
 0x280   : > { %2919 = vmatpush1.bf16.msra.mxu0 %v8789_v20  ;;  %2860 = vmatprep.mubr.bf16.mxu0 %v9369_v0 }
 0x281   : > { %7531 = vmatprep.subr.msk.bf16.mxu0 %vm720_vm0, %v8792_v22 }
 0x284   : > { %2921 = vmatpush1.bf16.msra.mxu0 %v2913_v8  ;;  %v3333_v8 = vld [vmem:[#allocation5 + $0x38] sm:$0xff] }
 0x285   : > { %3018 = vmatprep.subr.bf16.mxu0 %v8797_v34 }
 0x287   : > { %7526 = vmatmul.mubr.msk.bf16.gmra.mrb[4].mxu0 %vm713_vm1, %v2787_v25  ;;  %v8156_v25 = vpack.c.bf16 %v3333_v8, %v3332_v23  ;;  %v8821_v8 = vld [vmem:[#allocation7 + $0x4] ss:$8 sps:$4 sm:$0xff]  }
 0x288   : > { %2950 = vmatprep.mubr.bf16.mxu0 %v9369_v0 }
 0x28f   : > { %7532 = vmatmul.mubr.msk.bf16.vlgmr.msra.gmra.mrb[0].mxu0 %vm713_vm1, %v2885_v17 }
 0x290   : > { %3019 = vmatpush1.bf16.msra.mxu0 %v8795_v26  ;;  %2960 = vmatprep.mubr.bf16.mxu0 %v9369_v0  ;;  %v3334_v26 = vld [vmem:[#allocation5 + $0x40] sm:$0xff] }
 0x291   : > { %7538 = vmatprep.subr.msk.bf16.mxu0 %vm720_vm0, %v8798_v42  ;;  %v3335_v42 = vld [vmem:[#allocation5 + $0x48] sm:$0xff] }
 0x292   : > { %v8159_v27 = vpack.c.bf16 %v3335_v42, %v3334_v26 }
 0x294   : > { %3021 = vmatpush1.bf16.msra.mxu0 %v3013_v28  ;;  %v3336_v28 = vld [vmem:[#allocation5 + $0x50] sm:$0xff] }
 0x295   : > { %3118 = vmatprep.subr.bf16.mxu0 %v8803_v30  ;;  %v3337_v30 = vld [vmem:[#allocation5 + $0x58] sm:$0xff] }
 0x297   : > { %7533 = vmatmul.mubr.msk.bf16.gmra.mrb[4].mxu0 %vm713_vm1, %v2887_v31  ;;  %v8162_v31 = vpack.c.bf16 %v3337_v30, %v3336_v28 }
 0x298   : > { %3050 = vmatprep.mubr.bf16.mxu0 %v9369_v0 }
 0x29f   : > { %7539 = vmatmul.mubr.msk.bf16.vlgmr.msra.gmra.mrb[0].mxu0 %vm713_vm1, %v2985_v32  ;;  %v3338_v32 = vld [vmem:[#allocation5 + $0x60] sm:$0xff] }
 0x2a0   : > { %3119 = vmatpush1.bf16.msra.mxu0 %v8801_v33  ;;  %3060 = vmatprep.mubr.bf16.mxu0 %v9369_v0  ;;  %v3339_v33 = vld [vmem:[#allocation5 + $0x68] sm:$0xff] }
 0x2a1   : > { %7545 = vmatprep.subr.msk.bf16.mxu0 %vm720_vm0, %v8804_v35  ;;  %v8165_v35 = vpack.c.bf16 %v3339_v33, %v3338_v32 }
 0x2a4   : > { %3121 = vmatpush1.bf16.msra.mxu0 %v3113_v37  ;;  %v3341_v37 = vld [vmem:[#allocation5 + $0x78] sm:$0xff] }
 0x2a5   : > { %8196 = vmatprep.subr.bf16.mxu0 %v9374_v29 }
 0x2a7   : > { %7540 = vmatmul.mubr.msk.bf16.gmra.mrb[4].mxu0 %vm713_vm1, %v2987_v38  ;;  %v8168_v38 = vpack.c.bf16 %v3341_v37, %v3340_v36 }
 0x2a8   : > { %3150 = vmatprep.mubr.bf16.mxu0 %v9369_v0 }
 0x2af   : > { %7546 = vmatmul.mubr.msk.bf16.vlgmr.msra.gmra.mrb[0].mxu0 %vm713_vm1, %v3085_v39  ;;  %v3342_v39 = vld [vmem:[#allocation5 + $0x80] sm:$0xff] }
 0x2b0   : > { %3160 = vmatprep.mubr.bf16.mxu0 %v9369_v0 }
 0x2b7   : > { %7547 = vmatmul.mubr.msk.bf16.gmra.mrb[4].mxu0 %vm713_vm1, %v3087_v40  ;;  %v3343_v40 = vld [vmem:[#allocation5 + $0x88] sm:$0xff] }
 0x2b8   : > { %v8171_v41 = vpack.c.bf16 %v3343_v40, %v3342_v39  ;;  %v8819_v40 = vld [vmem:[#allocation7] ss:$8 sps:$4 sm:$0xff]  }
 0x382   : > { %v3152_v53 = vpop.f32.mrb[0].mxu0 }
 0x383   : > { %v10060_v54 = vadd.f32 %v3184_v52, %v3152_v53  ;;  %v3154_v24 = vpop.f32.mrb[1].mxu0 }
 0x384   : > { %v3192_v57 = vadd.f32 %v3188_v21, %v3154_v24  ;;  %v3156_v58 = vpop.f32.mrb[2].mxu0 }
 0x385   : > { %v3158_v59 = vpop.f32.mrb[3].mxu0  ;;  %v3199_v63 = vmax.f32 %v10060_v54, 0.0  ;;  %v10065_v1 = vadd.f32 %v3184_v52, %v3156_v58 }
 0x386   : > { %v3200_v60 = vmax.f32 %v3192_v57, 0.0  ;;  %v10062_v61 = vadd.f32 %v3188_v21, %v3158_v59 }
 0x387   : > { %v3201_v7 = vmax.f32 %v10065_v1, 0.0 }
 0x388   : > { %v3202_v4 = vmax.f32 %v10062_v61, 0.0  ;;  %7548 = vmatprep.mubr.msk.f32.mxu1 %vm3228_vm2, %v3200_v60 }
 0x389   : > { %3306 = vmatmul.mubr.f32.vlgmr.msra.gmra.mrb[0].mxu1 %v3199_v63 }
 0x38a   : > { %8148 = vmatpush1.bf16.msra.mxu1 %v8147_v62  ;;  %v3162_v5 = vpop.f32.mrb[4].mxu0  ;;  %7549 = vmatprep.mubr.msk.f32.mxu1 %vm3228_vm2, %v3202_v4 }
 0x38b   : > { %v10075_v9 = vadd.f32 %v3184_v52, %v3162_v5  ;;  %v3164_v10 = vpop.f32.mrb[5].mxu0  ;;  %8149 = vmatprep.subr.bf16.mxu1 %v9374_v29 }
 0x38c   : > { %v3196_v13 = vadd.f32 %v3188_v21, %v3164_v10  ;;  %v3166_v14 = vpop.f32.mrb[6].mxu0  ;;  %v3437_v10 = vld [vmem:[%s10533_s5 + $0x8] sm:$0x3f] }
 0x38d   : > { %v3168_v15 = vpop.f32.mrb[7].mxu0  ;;  %3311 = vmatmul.mubr.f32.gmra.mrb[2].mxu1 %v3201_v7  ;;  %v3203_v20 = vmax.f32 %v10075_v9, 0.0  ;;  %v3197_v22 = vadd.f32 %v3184_v52, %v3166_v14  ;;  %v8809_v14 = vld [vmem:[#allocation7 + $0x44] ss:$8 sps:$4 sm:$0xff]  }
 0x38e   : > { %v3204_v16 = vmax.f32 %v3196_v13, 0.0  ;;  %v3198_v18 = vadd.f32 %v3188_v21, %v3168_v15  ;;  %8151 = vmatpush1.bf16.msra.mxu1 %v8150_v6  ;;  %v8807_v13 = vld [vmem:[#allocation7 + $0x40] ss:$8 sps:$4 sm:$0xff]   ;;  %v8812_v15 = vld [vmem:[#allocation7 + $0x54] ss:$8 sps:$4 sm:$0xff]  }
 0x38f   : > { %8152 = vmatprep.subr.bf16.mxu1 %v9374_v29  ;;  %v3205_v17 = vmax.f32 %v3197_v22, 0.0  ;;  %v8818_v22 = vld [vmem:[#allocation7 + $0x70] ss:$8 sps:$4 sm:$0x3f]  }
 0x390   : > { %v3206_v34 = vmax.f32 %v3198_v18, 0.0  ;;  %7550 = vmatprep.mubr.msk.f32.mxu1 %vm3228_vm2, %v3204_v16  ;;  %v8815_v18 = vld [vmem:[#allocation7 + $0x64] ss:$8 sps:$4 sm:$0xff]   ;;  %v3672_v23 = vsel %vm720_vm0, %v8818_v22, 0  ;;  %v8867_v22 = vld [vmem:[#allocation7 + $0x140] ss:$8 sps:$4 sm:$0xff]  }
 0x391   : > { %3316 = vmatmul.mubr.f32.gmra.mrb[4].mxu1 %v3203_v20 }
 0x392   : > { %8154 = vmatpush1.bf16.msra.mxu1 %v8153_v19  ;;  %7551 = vmatprep.mubr.msk.f32.mxu1 %vm3228_vm2, %v3206_v34  ;;  %v8813_v19 = vld [vmem:[#allocation7 + $0x60] ss:$8 sps:$4 sm:$0xff]  }
 0x393   : > { %8155 = vmatprep.subr.bf16.mxu1 %v9374_v29 }
 0x395   : > { %3321 = vmatmul.mubr.f32.gmra.mrb[6].mxu1 %v3205_v17 }
 0x396   : > { %8157 = vmatpush1.bf16.msra.mxu1 %v8156_v25  ;;  %7552 = vmatprep.mubr.msk.f32.mxu1 %vm3228_vm2, %v3200_v60 }
 0x397   : > { %8158 = vmatprep.subr.bf16.mxu1 %v9374_v29 }
 0x39a   : > { %8160 = vmatpush1.bf16.msra.mxu1 %v8159_v27 }
 0x39b   : > { %8161 = vmatprep.subr.bf16.mxu1 %v9374_v29 }
 0x39e   : > { %8163 = vmatpush1.bf16.msra.mxu1 %v8162_v31 }
 0x39f   : > { %8164 = vmatprep.subr.bf16.mxu1 %v9374_v29 }
 0x3a2   : > { %8166 = vmatpush1.bf16.msra.mxu1 %v8165_v35 }
 0x3a3   : > { %8167 = vmatprep.subr.bf16.mxu1 %v9374_v29 }
 0x3a6   : > { %8169 = vmatpush1.bf16.msra.mxu1 %v8168_v38 }
 0x3a7   : > { %8170 = vmatprep.subr.bf16.mxu1 %v9374_v29 }
 0x3aa   : > { %8172 = vmatpush1.bf16.msra.mxu1 %v8171_v41  ;;  %v8824_v41 = vld [vmem:[#allocation7 + $0x14] ss:$8 sps:$4 sm:$0xff]  }
 0x3ab   : > { %8173 = vmatprep.subr.bf16.mxu1 %v9374_v29 }
 0x3ae   : > { %8175 = vmatpush1.bf16.msra.mxu1 %v8174_v46  ;;  %v8827_v46 = vld [vmem:[#allocation7 + $0x24] ss:$8 sps:$4 sm:$0xff]  }
 0x3af   : > { %3387 = vmatprep.subr.mxu1 %v9375_v45 }
 0x3b2   : > { %3388 = vmatpush1.msra.mxu1 %v3346_v47  ;;  %v8825_v47 = vld [vmem:[#allocation7 + $0x20] ss:$8 sps:$4 sm:$0xff]  }
 0x3b3   : > { %3412 = vmatmul.mubr.f32.vlgmr.msra.gmra.mrb[8].mxu1 %v3199_v63 }
 0x3b4   : > { %7553 = vmatprep.mubr.msk.f32.mxu1 %vm3228_vm2, %v3202_v4 }
 0x3b7   : > { %3417 = vmatmul.mubr.f32.gmra.mrb[10].mxu1 %v3201_v7 }
 0x3b8   : > { %7554 = vmatprep.mubr.msk.f32.mxu1 %vm3228_vm2, %v3204_v16  ;;  %v8810_v16 = vld [vmem:[#allocation7 + $0x50] ss:$8 sps:$4 sm:$0xff]  }
 0x3bb   : > { %3422 = vmatmul.mubr.f32.gmra.mrb[12].mxu1 %v3203_v20  ;;  %v8816_v20 = vld [vmem:[#allocation7 + $0x74] ss:$8 sps:$4 sm:$0x3f]  }
 0x3bc   : > { %7555 = vmatprep.mubr.msk.f32.mxu1 %vm3228_vm2, %v3206_v34 }
 0x3bf   : > { %3427 = vmatmul.mubr.f32.gmra.mrb[14].mxu1 %v3205_v17 }
 0x3c0   : > { %7982 = vmatprep.mubr.msk.f32.mxu1 %vm713_vm1, %v3436_v50  ;;  %v8828_v50 = vld [vmem:[#allocation7 + $0x34] ss:$8 sps:$4 sm:$0x3f]  }
 0x45c   : > { %v3307_v52 = vpop.f32.mrb[0].mxu1 }
 0x45d   : > { %v3309_v21 = vpop.f32.mrb[1].mxu1 }
 0x460   : > { %v3312_v53 = vpop.f32.mrb[2].mxu1 }
 0x461   : > { %v3314_v54 = vpop.f32.mrb[3].mxu1 }
 0x462   : > { %v8831_v54 = vld [vmem:[#allocation7 + $0x80] ss:$8 sps:$4 sm:$0xff]  }
 0x464   : > { %v3317_v24 = vpop.f32.mrb[4].mxu1 }
 0x465   : > { %v3319_v55 = vpop.f32.mrb[5].mxu1 }
 0x466   : > { %v8834_v55 = vld [vmem:[#allocation7 + $0x90] ss:$8 sps:$4 sm:$0xff]  }
 0x468   : > { %v3322_v56 = vpop.f32.mrb[6].mxu1 }
 0x469   : > { %v3324_v57 = vpop.f32.mrb[7].mxu1 }
 0x46a   : > { %v8837_v57 = vld [vmem:[#allocation7 + $0xa0] ss:$8 sps:$4 sm:$0xff]  }
 0x486   : > { %v3413_v58 = vpop.f32.mrb[8].mxu1 }
 0x487   : > { %v3432_v59 = vmax.f32 %v3307_v52, %v3413_v58  ;;  %v3415_v60 = vpop.f32.mrb[9].mxu1  ;;  %v8830_v52 = vld [vmem:[#allocation7 + $0x30] ss:$8 sps:$4 sm:$0x3f]  }
 0x488   : > { %v3762_v21 = vsel %vm720_vm0, %v8830_v52, 0  ;;  %v8840_v58 = vld [vmem:[#allocation7 + $0xb4] ss:$8 sps:$4 sm:$0x3f]   ;;  %v8899_v52 = vld [vmem:[#allocation7 + $0x1e4] ss:$8 sps:$4 sm:$0xff]  }
 0x48a   : > { %v3418_v61 = vpop.f32.mrb[10].mxu1 }
 0x48b   : > { %v3433_v62 = vmax.f32 %v3312_v53, %v3418_v61  ;;  %v3420_v63 = vpop.f32.mrb[11].mxu1  ;;  %v8833_v53 = vld [vmem:[#allocation7 + $0x84] ss:$8 sps:$4 sm:$0xff]  }
 0x48c   : > { %v8845_v61 = vld [vmem:[#allocation7 + $0xc4] ss:$8 sps:$4 sm:$0xff]   ;;  %v8848_v63 = vld [vmem:[#allocation7 + $0xd4] ss:$8 sps:$4 sm:$0xff]  }
 0x48d   : > { %v8176_v1 = vpack.c.bf16 %v3433_v62, %v3432_v59  ;;  %v8842_v59 = vld [vmem:[#allocation7 + $0xb0] ss:$8 sps:$4 sm:$0x3f]   ;;  %v8843_v62 = vld [vmem:[#allocation7 + $0xc0] ss:$8 sps:$4 sm:$0xff]  }
 0x48e   : > { %v3423_v2 = vpop.f32.mrb[12].mxu1  ;;  %v3863_v60 = vsel %vm720_vm0, %v8842_v59, 0  ;;  %v8906_v59 = vld [vmem:[#allocation7 + $0x210] ss:$8 sps:$4 sm:$0xff]  }
 0x48f   : > { %v3434_v3 = vmax.f32 %v3317_v24, %v3423_v2  ;;  %v3425_v4 = vpop.f32.mrb[13].mxu1  ;;  %8177 = vmatprep.subr.bf16.mxu1 %v8176_v1  ;;  %v8836_v24 = vld [vmem:[#allocation7 + $0x94] ss:$8 sps:$4 sm:$0xff]   ;;  %v8846_v2 = vld [vmem:[#allocation7 + $0xd0] ss:$8 sps:$4 sm:$0xff]  }
 0x490   : > { %8179 = vmatpush3.bf16.msra.mxu1 %v8176_v1  ;;  %v8849_v4 = vld [vmem:[#allocation7 + $0xe0] ss:$8 sps:$4 sm:$0xff]  }
 0x492   : > { %v3428_v5 = vpop.f32.mrb[14].mxu1 }
 0x493   : > { %v3435_v6 = vmax.f32 %v3322_v56, %v3428_v5  ;;  %v3430_v7 = vpop.f32.mrb[15].mxu1  ;;  %v8839_v56 = vld [vmem:[#allocation7 + $0xa4] ss:$8 sps:$4 sm:$0xff]   ;;  %v8852_v5 = vld [vmem:[#allocation7 + $0xf4] ss:$8 sps:$4 sm:$0x3f]  }
 0x495   : > { %v8180_v9 = vpack.c.bf16 %v3435_v6, %v3434_v3  ;;  %v8851_v3 = vld [vmem:[#allocation7 + $0xe4] ss:$8 sps:$4 sm:$0xff]   ;;  %v8854_v6 = vld [vmem:[#allocation7 + $0xf0] ss:$8 sps:$4 sm:$0x3f]  }
 0x496   : > { %v3968_v7 = vsel %vm720_vm0, %v8854_v6, 0  ;;  %v8918_v6 = vld [vmem:[#allocation7 + $0x250] ss:$8 sps:$4 sm:$0xff]  }
 0x497   : > { %8182 = vmatprep.subr.msk.bf16.mxu1 %vm8181_vm5, %v8180_v9 }
 0x498   : > { %8185 = vmatpush3.bf16.msk.msra.mxu1 %vm8181_vm5, %v8180_v9 }
 0x499   : > { %8187 = vmatprep.subr.bf16.mxu1 %v8176_v1 }
 0x49b   : > { %7983 = vmatmul.mubr.msk.f32.vlgmr.msra.gmra.mrb[16].mxu1 %vm713_vm1, %v3437_v10  ;;  %v8855_v10 = vld [vmem:[#allocation7 + $0x100] ss:$8 sps:$4 sm:$0xff]  }
 0x49c   : > { %8189 = vmatpush3.bf16.msra.mxu1 %v8176_v1  ;;  %7993 = vmatprep.mubr.msk.f32.mxu1 %vm713_vm1, %v3523_v11  ;;  %v8860_v11 = vld [vmem:[#allocation7 + $0x114] ss:$8 sps:$4 sm:$0xff]  }
 0x49d   : > { %8192 = vmatprep.subr.msk.bf16.mxu1 %vm8181_vm5, %v8180_v9 }
 0x4a0   : > { %8195 = vmatpush3.bf16.msk.msra.mxu1 %vm8181_vm5, %v8180_v9  ;;  %v8857_v9 = vld [vmem:[#allocation7 + $0x104] ss:$8 sps:$4 sm:$0xff]  }
 0x4a1   : > { %3677 = vmatprep.subr.bf16.mxu1 %v8809_v14  ;;  %v8863_v14 = vld [vmem:[#allocation7 + $0x124] ss:$8 sps:$4 sm:$0xff]  }
 0x4a3   : > { %7994 = vmatmul.mubr.msk.f32.vlgmr.msra.gmra.mrb[18].mxu1 %vm713_vm1, %v3524_v12 }
 0x4a4   : > { %3709 = vmatprep.mubr.bf16.mxu1 %v9369_v0  ;;  %3678 = vmatpush1.bf16.msra.mxu1 %v8807_v13  ;;  %v8858_v13 = vld [vmem:[#allocation7 + $0x110] ss:$8 sps:$4 sm:$0xff]  }
 0x4a5   : > { %3679 = vmatprep.subr.bf16.mxu1 %v8812_v15  ;;  %v8861_v15 = vld [vmem:[#allocation7 + $0x120] ss:$8 sps:$4 sm:$0xff]  }
 0x4a8   : > { %3680 = vmatpush1.bf16.msra.mxu1 %v8810_v16  ;;  %v8864_v16 = vld [vmem:[#allocation7 + $0x134] ss:$8 sps:$4 sm:$0x3f]  }
 0x4a9   : > { %3681 = vmatprep.subr.bf16.mxu1 %v8815_v18  ;;  %v8866_v18 = vld [vmem:[#allocation7 + $0x130] ss:$8 sps:$4 sm:$0x3f]  }
 0x4ac   : > { %3682 = vmatpush1.bf16.msra.mxu1 %v8813_v19  ;;  %v4073_v19 = vsel %vm720_vm0, %v8866_v18, 0  ;;  %v8930_v18 = vld [vmem:[#allocation7 + $0x290] ss:$8 sps:$4 sm:$0xff]  }
 0x4ad   : > { %7570 = vmatprep.subr.msk.bf16.mxu1 %vm720_vm0, %v8816_v20  ;;  %v8869_v20 = vld [vmem:[#allocation7 + $0x144] ss:$8 sps:$4 sm:$0xff]  }
 0x4b0   : > { %3684 = vmatpush1.bf16.msra.mxu1 %v3672_v23  ;;  %v8872_v23 = vld [vmem:[#allocation7 + $0x154] ss:$8 sps:$4 sm:$0xff]  }
 0x4b1   : > { %3767 = vmatprep.subr.bf16.mxu1 %v8821_v8 }
 0x56e   : > { %v7984_v34 = vpop.f32.mrb[16].mxu1 }
 0x56f   : > { %v3514_v25 = vpop.f32.mrb[17].mxu1 }
 0x576   : > { %v7995_v17 = vpop.f32.mrb[18].mxu1 }
 0x577   : > { %v3607_v26 = vmax.f32 %v7984_v34, %v7995_v17  ;;  %v3597_v42 = vpop.f32.mrb[19].mxu1  ;;  %v8870_v34 = vld [vmem:[#allocation7 + $0x150] ss:$8 sps:$4 sm:$0xff]   ;;  %v8873_v17 = vld [vmem:[#allocation7 + $0x160] ss:$8 sps:$4 sm:$0xff]  }
 0x578   : > { %v3606_v27 = vmax.f32 %v3514_v25, %v3597_v42  ;;  %v8875_v25 = vld [vmem:[#allocation7 + $0x164] ss:$8 sps:$4 sm:$0xff]   ;;  %v8878_v42 = vld [vmem:[#allocation7 + $0x170] ss:$8 sps:$4 sm:$0x3f]  }
 0x57a   : > { %v3608_v28 = vpack.c.bf16 %v3607_v26, %v3606_v27  ;;  %v8876_v26 = vld [vmem:[#allocation7 + $0x174] ss:$8 sps:$4 sm:$0x3f]   ;;  %v4182_v27 = vsel %vm720_vm0, %v8878_v42, 0  ;;  %v8947_v42 = vld [vmem:[#allocation7 + $0x2e4] ss:$8 sps:$4 sm:$0xff]  }
 0x57c   : > { %3819 = vrot.lane.b32.xlu1 %v3608_v28, %s9377_s16  ;;  %3627 = vrot.lane.b32.xlu0 %v3608_v28, %s9378_s24  ;;  %v4136_v30 = vshll.u32 %v3608_v28, 16  ;;  %v4134_v32 = vshrl.u32 %v3608_v28, 16  ;;  %v10129_v35 = vrot.slane %v3608_v28, 1  ;;  %v10141_v39 = vrot.slane %v3608_v28, 2 }
 0x57e   : > { %v4138_v31 = vrot.slane %v4136_v30, 1  ;;  %v5187_v36 = vrot.slane %v4134_v32, 1  ;;  %v5188_v37 = vrot.slane %v4136_v30, 2  ;;  %v8879_v30 = vld [vmem:[#allocation7 + $0x180] ss:$8 sps:$4 sm:$0xff]  }
 0x580   : > { %4029 = vrot.lane.b32.xlu1 %v3608_v28, %s9379_s3  ;;  %3924 = vrot.lane.b32.xlu0 %v3608_v28, %s9380_s20  ;;  %v10123_v33 = vor.u32 %v4138_v31, %v4134_v32  ;;  %v10135_v38 = vor.u32 %v5188_v37, %v5187_v36  ;;  %v8884_v31 = vld [vmem:[#allocation7 + $0x194] ss:$8 sps:$4 sm:$0xff]   ;;  %v8882_v32 = vld [vmem:[#allocation7 + $0x190] ss:$8 sps:$4 sm:$0xff]   ;;  %v8887_v36 = vld [vmem:[#allocation7 + $0x1a4] ss:$8 sps:$4 sm:$0xff]  }
 0x581   : > { %v8885_v37 = vld [vmem:[#allocation7 + $0x1a0] ss:$8 sps:$4 sm:$0xff]  }
 0x584   : > { %4348 = vrot.lane.b32.xlu1 %v10123_v33, %s9377_s16  ;;  %4243 = vrot.lane.b32.xlu0 %v10123_v33, %s9378_s24 }
 0x588   : > { %4558 = vrot.lane.b32.xlu1 %v10123_v33, %s9379_s3  ;;  %4453 = vrot.lane.b32.xlu0 %v10123_v33, %s9380_s20 }
 0x58c   : > { %4872 = vrot.lane.b32.xlu1 %v10129_v35, %s9377_s16  ;;  %4767 = vrot.lane.b32.xlu0 %v10129_v35, %s9378_s24 }
 0x590   : > { %5082 = vrot.lane.b32.xlu1 %v10129_v35, %s9379_s3  ;;  %4977 = vrot.lane.b32.xlu0 %v10129_v35, %s9380_s20 }
 0x594   : > { %5398 = vrot.lane.b32.xlu1 %v10135_v38, %s9377_s16  ;;  %5293 = vrot.lane.b32.xlu0 %v10135_v38, %s9378_s24 }
 0x598   : > { %5608 = vrot.lane.b32.xlu1 %v10135_v38, %s9379_s3  ;;  %5503 = vrot.lane.b32.xlu0 %v10135_v38, %s9380_s20 }
 0x59c   : > { %5922 = vrot.lane.b32.xlu1 %v10141_v39, %s9377_s16  ;;  %5817 = vrot.lane.b32.xlu0 %v10141_v39, %s9378_s24 }
 0x5a0   : > { %6132 = vrot.lane.b32.xlu1 %v10141_v39, %s9379_s3  ;;  %6027 = vrot.lane.b32.xlu0 %v10141_v39, %s9380_s20  ;;  %s10599_s20 = sld [smem:[#allocation17_spill]]  ;;  %s10603_s3 = sld [smem:[#allocation32_spill]] }
 0x5a6   : > { %s666_s23 = sand.u32 1, %s10599_s20   ;;  %s10486_s19 = scalar_lea.hbm %s10603_s3, %s7906_s28 }
 0x5a7   : > { %s667_s25 = scalar_lea.vmem [#allocation11], %s666_s23  ;;  %s7240_s1 = scalar_lea.sflag [#allocation4], %s666_s23 }
 0x5a8   : > { %s7252_s21 = sshll.u32 %s667_s25, 4  ;;  %s10488_s21 = int_to_ptr.vmem [resolvable:$true] %s7252_s21 }
 0x5a9   : > { %s9286_s20 = scalar_lea.vmem %s10488_s21, 16  ;;  %p9293_p6 = scmp.lt.s32.totalorder %s10488_s21, %s9291_s22 }
 0x5aa   : > { %p9287_p8 = scmp.ne.s32.totalorder %s10488_s21, %s9286_s20  ;;  %p9294_p9 = scmp.lt.s32.totalorder %s9292_s2, %s9286_s20 }
 0x5ac   : > { %p9288_p13 = pnand %p9287_p8, %p10604_p11  ;;  %p9295_p5 = por %p9294_p9, %p9293_p6 }
 0x5ae   : > { %p9289_p1 = pneg %p9288_p13 }
 0x5b0   : > { %p9296_p0 = pnand %p9295_p5, %p9289_p1 }
 0x5ee   : > { %v3628_v43 = vpop.permute.xlu0 %3627  ;;  %v3820_v1 = vpop.permute.xlu1 %3819 }
 0x5ef   : > { %7571 = vmatmul.mubr.msk.bf16.vlgmr.msra.gmra.mrb[20].mxu1 %vm3667_vm6, %v3628_v43 }
 0x5f0   : > { %3768 = vmatpush1.bf16.msra.mxu1 %v8819_v40  ;;  %3799 = vmatprep.mubr.bf16.mxu1 %v9369_v0  ;;  %v8888_v40 = vld [vmem:[#allocation7 + $0x1b4] ss:$8 sps:$4 sm:$0x3f]  }
 0x5f1   : > { %3769 = vmatprep.subr.bf16.mxu1 %v8824_v41  ;;  %v8890_v41 = vld [vmem:[#allocation7 + $0x1b0] ss:$8 sps:$4 sm:$0x3f]  }
 0x5f2   : > { %v3925_v12 = vpop.permute.xlu0 %3924  ;;  %v4030_v8 = vpop.permute.xlu1 %4029  ;;  %v4287_v43 = vsel %vm720_vm0, %v8890_v41, 0  ;;  %v8959_v41 = vld [vmem:[#allocation7 + $0x324] ss:$8 sps:$4 sm:$0xff]  }
 0x5f4   : > { %3770 = vmatpush1.bf16.msra.mxu1 %v8822_v44  ;;  %v8893_v44 = vld [vmem:[#allocation7 + $0x1c4] ss:$8 sps:$4 sm:$0xff]  }
 0x5f5   : > { %3771 = vmatprep.subr.bf16.mxu1 %v8827_v46  ;;  %v8891_v46 = vld [vmem:[#allocation7 + $0x1c0] ss:$8 sps:$4 sm:$0xff]  }
 0x5f8   : > { %3772 = vmatpush1.bf16.msra.mxu1 %v8825_v47  ;;  %v4244_v47 = vpop.permute.xlu0 %4243 }
 0x5f9   : > { %7580 = vmatprep.subr.msk.bf16.mxu1 %vm720_vm0, %v8828_v50  ;;  %v8894_v50 = vld [vmem:[#allocation7 + $0x1d0] ss:$8 sps:$4 sm:$0xff]  }
 0x5fc   : > { %3774 = vmatpush1.bf16.msra.mxu1 %v3762_v21  ;;  %v8897_v21 = vld [vmem:[#allocation7 + $0x1e0] ss:$8 sps:$4 sm:$0xff]  }
 0x5fd   : > { %3868 = vmatprep.subr.bf16.mxu1 %v8833_v53  ;;  %v8900_v53 = vld [vmem:[#allocation7 + $0x1f4] ss:$8 sps:$4 sm:$0x3f]  }
 0x5ff   : > { %7581 = vmatmul.mubr.msk.bf16.vlgmr.msra.gmra.mrb[20].mxu1 %vm3667_vm6, %v3608_v28  ;;  %v8881_v28 = vld [vmem:[#allocation7 + $0x184] ss:$8 sps:$4 sm:$0xff]  }
 0x600   : > { %3869 = vmatpush1.bf16.msra.mxu1 %v8831_v54  ;;  %3900 = vmatprep.mubr.bf16.mxu1 %v9369_v0  ;;  %v8902_v54 = vld [vmem:[#allocation7 + $0x1f0] ss:$8 sps:$4 sm:$0x3f]  }
 0x601   : > { %3870 = vmatprep.subr.bf16.mxu1 %v8836_v24  ;;  %v4392_v24 = vsel %vm720_vm0, %v8902_v54, 0  ;;  %v8971_v54 = vld [vmem:[#allocation7 + $0x364] ss:$8 sps:$4 sm:$0xff]  }
 0x604   : > { %3871 = vmatpush1.bf16.msra.mxu1 %v8834_v55  ;;  %v8905_v55 = vld [vmem:[#allocation7 + $0x204] ss:$8 sps:$4 sm:$0xff]  }
 0x605   : > { %3872 = vmatprep.subr.bf16.mxu1 %v8839_v56  ;;  %v8903_v56 = vld [vmem:[#allocation7 + $0x200] ss:$8 sps:$4 sm:$0xff]  }
 0x608   : > { %3873 = vmatpush1.bf16.msra.mxu1 %v8837_v57  ;;  %v8908_v57 = vld [vmem:[#allocation7 + $0x214] ss:$8 sps:$4 sm:$0xff]  }
 0x609   : > { %7590 = vmatprep.subr.msk.bf16.mxu1 %vm720_vm0, %v8840_v58  ;;  %v4349_v58 = vpop.permute.xlu1 %4348 }
 0x60c   : > { %3875 = vmatpush1.bf16.msra.mxu1 %v3863_v60  ;;  %v8911_v60 = vld [vmem:[#allocation7 + $0x224] ss:$8 sps:$4 sm:$0xff]  }
 0x60d   : > { %3973 = vmatprep.subr.bf16.mxu1 %v8845_v61  ;;  %v8909_v61 = vld [vmem:[#allocation7 + $0x220] ss:$8 sps:$4 sm:$0xff]  }
 0x60f   : > { %7591 = vmatmul.mubr.msk.bf16.vlgmr.msra.gmra.mrb[20].mxu1 %vm3667_vm6, %v3820_v1 }
 0x610   : > { %3974 = vmatpush1.bf16.msra.mxu1 %v8843_v62  ;;  %4005 = vmatprep.mubr.bf16.mxu1 %v9369_v0  ;;  %v8912_v62 = vld [vmem:[#allocation7 + $0x234] ss:$8 sps:$4 sm:$0x3f]  }
 0x611   : > { %3975 = vmatprep.subr.bf16.mxu1 %v8848_v63  ;;  %v8914_v63 = vld [vmem:[#allocation7 + $0x230] ss:$8 sps:$4 sm:$0x3f]  }
 0x612   : > { %v4497_v1 = vsel %vm720_vm0, %v8914_v63, 0  ;;  %v8983_v63 = vld [vmem:[#allocation7 + $0x3a4] ss:$8 sps:$4 sm:$0xff]  }
 0x614   : > { %3976 = vmatpush1.bf16.msra.mxu1 %v8846_v2  ;;  %v8917_v2 = vld [vmem:[#allocation7 + $0x244] ss:$8 sps:$4 sm:$0xff]  }
 0x615   : > { %3977 = vmatprep.subr.bf16.mxu1 %v8851_v3  ;;  %v8915_v3 = vld [vmem:[#allocation7 + $0x240] ss:$8 sps:$4 sm:$0xff]  }
 0x618   : > { %3978 = vmatpush1.bf16.msra.mxu1 %v8849_v4  ;;  %v8920_v4 = vld [vmem:[#allocation7 + $0x254] ss:$8 sps:$4 sm:$0xff]  }
 0x619   : > { %7600 = vmatprep.subr.msk.bf16.mxu1 %vm720_vm0, %v8852_v5  ;;  %v4454_v5 = vpop.permute.xlu0 %4453 }
 0x61c   : > { %3980 = vmatpush1.bf16.msra.mxu1 %v3968_v7  ;;  %v8923_v7 = vld [vmem:[#allocation7 + $0x264] ss:$8 sps:$4 sm:$0xff]  }
 0x61d   : > { %4078 = vmatprep.subr.bf16.mxu1 %v8857_v9  ;;  %v8921_v9 = vld [vmem:[#allocation7 + $0x260] ss:$8 sps:$4 sm:$0xff]  }
 0x61f   : > { %7601 = vmatmul.mubr.msk.bf16.vlgmr.msra.gmra.mrb[20].mxu1 %vm3667_vm6, %v3925_v12 }
 0x620   : > { %4079 = vmatpush1.bf16.msra.mxu1 %v8855_v10  ;;  %4110 = vmatprep.mubr.bf16.mxu1 %v9369_v0  ;;  %v8924_v10 = vld [vmem:[#allocation7 + $0x274] ss:$8 sps:$4 sm:$0x3f]  }
 0x621   : > { %4080 = vmatprep.subr.bf16.mxu1 %v8860_v11  ;;  %v8926_v11 = vld [vmem:[#allocation7 + $0x270] ss:$8 sps:$4 sm:$0x3f]  }
 0x622   : > { %v4602_v12 = vsel %vm720_vm0, %v8926_v11, 0  ;;  %v8995_v11 = vld [vmem:[#allocation7 + $0x3e4] ss:$8 sps:$4 sm:$0xff]  }
 0x624   : > { %4081 = vmatpush1.bf16.msra.mxu1 %v8858_v13  ;;  %v8929_v13 = vld [vmem:[#allocation7 + $0x284] ss:$8 sps:$4 sm:$0xff]  }
 0x625   : > { %4082 = vmatprep.subr.bf16.mxu1 %v8863_v14  ;;  %v8927_v14 = vld [vmem:[#allocation7 + $0x280] ss:$8 sps:$4 sm:$0xff]  }
 0x628   : > { %4083 = vmatpush1.bf16.msra.mxu1 %v8861_v15  ;;  %v8932_v15 = vld [vmem:[#allocation7 + $0x294] ss:$8 sps:$4 sm:$0xff]  }
 0x629   : > { %7610 = vmatprep.subr.msk.bf16.mxu1 %vm720_vm0, %v8864_v16  ;;  %v4559_v16 = vpop.permute.xlu1 %4558 }
 0x62c   : > { %4085 = vmatpush1.bf16.msra.mxu1 %v4073_v19  ;;  %v8935_v19 = vld [vmem:[#allocation7 + $0x2a4] ss:$8 sps:$4 sm:$0xff]  }
 0x62d   : > { %4187 = vmatprep.subr.bf16.mxu1 %v8869_v20  ;;  %v8933_v20 = vld [vmem:[#allocation7 + $0x2a0] ss:$8 sps:$4 sm:$0xff]  }
 0x62f   : > { %7611 = vmatmul.mubr.msk.bf16.vlgmr.msra.gmra.mrb[20].mxu1 %vm3667_vm6, %v4030_v8 }
 0x630   : > { %4188 = vmatpush1.bf16.msra.mxu1 %v8867_v22  ;;  %4219 = vmatprep.mubr.bf16.mxu1 %v9369_v0  ;;  %v8936_v22 = vld [vmem:[#allocation7 + $0x2b4] ss:$8 sps:$4 sm:$0x3f]  }
 0x631   : > { %4189 = vmatprep.subr.bf16.mxu1 %v8872_v23  ;;  %v8938_v23 = vld [vmem:[#allocation7 + $0x2b0] ss:$8 sps:$4 sm:$0x3f]  }
 0x632   : > { %v4706_v8 = vsel %vm720_vm0, %v8938_v23, 0  ;;  %v9005_v23 = vld [vmem:[#allocation7 + $0x420] ss:$8 sps:$4 sm:$0xff]  }
 0x634   : > { %4190 = vmatpush1.bf16.msra.mxu1 %v8870_v34  ;;  %v8941_v34 = vld [vmem:[#allocation7 + $0x2c4] ss:$8 sps:$4 sm:$0xff]  }
 0x635   : > { %4191 = vmatprep.subr.bf16.mxu1 %v8875_v25  ;;  %v8939_v25 = vld [vmem:[#allocation7 + $0x2c0] ss:$8 sps:$4 sm:$0xff]  }
 0x638   : > { %4192 = vmatpush1.bf16.msra.mxu1 %v8873_v17  ;;  %v8944_v17 = vld [vmem:[#allocation7 + $0x2d4] ss:$8 sps:$4 sm:$0xff]  }
 0x639   : > { %7620 = vmatprep.subr.msk.bf16.mxu1 %vm720_vm0, %v8876_v26  ;;  %v8942_v26 = vld [vmem:[#allocation7 + $0x2d0] ss:$8 sps:$4 sm:$0xff]  }
 0x63c   : > { %4194 = vmatpush1.bf16.msra.mxu1 %v4182_v27  ;;  %v8945_v27 = vld [vmem:[#allocation7 + $0x2e0] ss:$8 sps:$4 sm:$0xff]  }
 0x63d   : > { %4292 = vmatprep.subr.bf16.mxu1 %v8881_v28  ;;  %v8948_v28 = vld [vmem:[#allocation7 + $0x2f4] ss:$8 sps:$4 sm:$0x3f]  }
 0x63f   : > { %7621 = vmatmul.mubr.msk.bf16.vlgmr.msra.gmra.mrb[20].mxu1 %vm3667_vm6, %v10123_v33  ;;  %v8896_v33 = vld [vmem:[#allocation7 + $0x1d4] ss:$8 sps:$4 sm:$0xff]  }
 0x640   : > { %4293 = vmatpush1.bf16.msra.mxu1 %v8879_v30  ;;  %4324 = vmatprep.mubr.bf16.mxu1 %v9369_v0  ;;  %v8950_v30 = vld [vmem:[#allocation7 + $0x2f0] ss:$8 sps:$4 sm:$0x3f]  }
 0x641   : > { %4294 = vmatprep.subr.bf16.mxu1 %v8884_v31  ;;  %v4811_v31 = vsel %vm720_vm0, %v8950_v30, 0  ;;  %v6250_v30 = vld [vmem:[#allocation8 + $0x10] sm:$0xff] }
 0x644   : > { %4295 = vmatpush1.bf16.msra.mxu1 %v8882_v32  ;;  %v8953_v32 = vld [vmem:[#allocation7 + $0x304] ss:$8 sps:$4 sm:$0xff]  }
 0x645   : > { %4296 = vmatprep.subr.bf16.mxu1 %v8887_v36  ;;  %v8951_v36 = vld [vmem:[#allocation7 + $0x300] ss:$8 sps:$4 sm:$0xff]  }
 0x648   : > { %4297 = vmatpush1.bf16.msra.mxu1 %v8885_v37  ;;  %v4768_v37 = vpop.permute.xlu0 %4767 }
 0x649   : > { %7630 = vmatprep.subr.msk.bf16.mxu1 %vm720_vm0, %v8888_v40  ;;  %v8954_v40 = vld [vmem:[#allocation7 + $0x310] ss:$8 sps:$4 sm:$0xff]  }
 0x64c   : > { %4299 = vmatpush1.bf16.msra.mxu1 %v4287_v43  ;;  %v8957_v43 = vld [vmem:[#allocation7 + $0x320] ss:$8 sps:$4 sm:$0xff]  }
 0x64d   : > { %4397 = vmatprep.subr.bf16.mxu1 %v8893_v44  ;;  %v8960_v44 = vld [vmem:[#allocation7 + $0x334] ss:$8 sps:$4 sm:$0x3f]  }
 0x64f   : > { %7631 = vmatmul.mubr.msk.bf16.vlgmr.msra.gmra.mrb[20].mxu1 %vm3667_vm6, %v4244_v47  ;;  %v8965_v47 = vld [vmem:[#allocation7 + $0x344] ss:$8 sps:$4 sm:$0xff]  }
 0x650   : > { %4398 = vmatpush1.bf16.msra.mxu1 %v8891_v46  ;;  %4429 = vmatprep.mubr.bf16.mxu1 %v9369_v0  ;;  %v8962_v46 = vld [vmem:[#allocation7 + $0x330] ss:$8 sps:$4 sm:$0x3f]  }
 0x651   : > { %4399 = vmatprep.subr.bf16.mxu1 %v8896_v33  ;;  %v4916_v33 = vsel %vm720_vm0, %v8962_v46, 0  ;;  %v9022_v46 = vld [vmem:[#allocation7 + $0x470] ss:$8 sps:$4 sm:$0x3f]  }
 0x654   : > { %4400 = vmatpush1.bf16.msra.mxu1 %v8894_v50  ;;  %v8963_v50 = vld [vmem:[#allocation7 + $0x340] ss:$8 sps:$4 sm:$0xff]  }
 0x655   : > { %4401 = vmatprep.subr.bf16.mxu1 %v8899_v52  ;;  %v8968_v52 = vld [vmem:[#allocation7 + $0x354] ss:$8 sps:$4 sm:$0xff]  }
 0x658   : > { %4402 = vmatpush1.bf16.msra.mxu1 %v8897_v21  ;;  %v4873_v21 = vpop.permute.xlu1 %4872 }
 0x659   : > { %7640 = vmatprep.subr.msk.bf16.mxu1 %vm720_vm0, %v8900_v53  ;;  %v8966_v53 = vld [vmem:[#allocation7 + $0x350] ss:$8 sps:$4 sm:$0xff]  }
 0x65c   : > { %4404 = vmatpush1.bf16.msra.mxu1 %v4392_v24  ;;  %v8969_v24 = vld [vmem:[#allocation7 + $0x360] ss:$8 sps:$4 sm:$0xff]  }
 0x65d   : > { %4502 = vmatprep.subr.bf16.mxu1 %v8905_v55  ;;  %v8972_v55 = vld [vmem:[#allocation7 + $0x374] ss:$8 sps:$4 sm:$0x3f]  }
 0x65f   : > { %7641 = vmatmul.mubr.msk.bf16.vlgmr.msra.gmra.mrb[20].mxu1 %vm3667_vm6, %v4349_v58  ;;  %v8977_v58 = vld [vmem:[#allocation7 + $0x384] ss:$8 sps:$4 sm:$0xff]  }
 0x660   : > { %4503 = vmatpush1.bf16.msra.mxu1 %v8903_v56  ;;  %4534 = vmatprep.mubr.bf16.mxu1 %v9369_v0  ;;  %v8974_v56 = vld [vmem:[#allocation7 + $0x370] ss:$8 sps:$4 sm:$0x3f]  }
 0x661   : > { %4504 = vmatprep.subr.bf16.mxu1 %v8908_v57  ;;  %v5021_v57 = vsel %vm720_vm0, %v8974_v56, 0  ;;  %v9028_v56 = vld [vmem:[#allocation7 + $0x494] ss:$8 sps:$4 sm:$0xff]  }
 0x664   : > { %4505 = vmatpush1.bf16.msra.mxu1 %v8906_v59  ;;  %v8975_v59 = vld [vmem:[#allocation7 + $0x380] ss:$8 sps:$4 sm:$0xff]  }
 0x665   : > { %4506 = vmatprep.subr.bf16.mxu1 %v8911_v60  ;;  %v8980_v60 = vld [vmem:[#allocation7 + $0x394] ss:$8 sps:$4 sm:$0xff]  }
 0x668   : > { %4507 = vmatpush1.bf16.msra.mxu1 %v8909_v61  ;;  %v4978_v61 = vpop.permute.xlu0 %4977 }
 0x669   : > { %7650 = vmatprep.subr.msk.bf16.mxu1 %vm720_vm0, %v8912_v62  ;;  %v8978_v62 = vld [vmem:[#allocation7 + $0x390] ss:$8 sps:$4 sm:$0xff]  }
 0x66c   : > { %4509 = vmatpush1.bf16.msra.mxu1 %v4497_v1  ;;  %v8981_v1 = vld [vmem:[#allocation7 + $0x3a0] ss:$8 sps:$4 sm:$0xff]  }
 0x66d   : > { %4607 = vmatprep.subr.bf16.mxu1 %v8917_v2  ;;  %v8984_v2 = vld [vmem:[#allocation7 + $0x3b4] ss:$8 sps:$4 sm:$0x3f]  }
 0x66f   : > { %7651 = vmatmul.mubr.msk.bf16.vlgmr.msra.gmra.mrb[20].mxu1 %vm3667_vm6, %v4454_v5  ;;  %v8989_v5 = vld [vmem:[#allocation7 + $0x3c4] ss:$8 sps:$4 sm:$0xff]  }
 0x670   : > { %4608 = vmatpush1.bf16.msra.mxu1 %v8915_v3  ;;  %4639 = vmatprep.mubr.bf16.mxu1 %v9369_v0  ;;  %v8986_v3 = vld [vmem:[#allocation7 + $0x3b0] ss:$8 sps:$4 sm:$0x3f]  }
 0x671   : > { %4609 = vmatprep.subr.bf16.mxu1 %v8920_v4  ;;  %v5126_v4 = vsel %vm720_vm0, %v8986_v3, 0  ;;  %v9029_v3 = vld [vmem:[#allocation7 + $0x4a0] ss:$8 sps:$4 sm:$0xff]  }
 0x674   : > { %4610 = vmatpush1.bf16.msra.mxu1 %v8918_v6  ;;  %v8987_v6 = vld [vmem:[#allocation7 + $0x3c0] ss:$8 sps:$4 sm:$0xff]  }
 0x675   : > { %4611 = vmatprep.subr.bf16.mxu1 %v8923_v7  ;;  %v8992_v7 = vld [vmem:[#allocation7 + $0x3d4] ss:$8 sps:$4 sm:$0xff]  }
 0x678   : > { %4612 = vmatpush1.bf16.msra.mxu1 %v8921_v9  ;;  %v5083_v9 = vpop.permute.xlu1 %5082 }
 0x679   : > { %7660 = vmatprep.subr.msk.bf16.mxu1 %vm720_vm0, %v8924_v10  ;;  %v8990_v10 = vld [vmem:[#allocation7 + $0x3d0] ss:$8 sps:$4 sm:$0xff]  }
 0x67c   : > { %4614 = vmatpush1.bf16.msra.mxu1 %v4602_v12  ;;  %v8993_v12 = vld [vmem:[#allocation7 + $0x3e0] ss:$8 sps:$4 sm:$0xff]  }
 0x67d   : > { %4711 = vmatprep.subr.bf16.mxu1 %v8929_v13  ;;  %v8996_v13 = vld [vmem:[#allocation7 + $0x3f4] ss:$8 sps:$4 sm:$0x3f]  }
 0x67f   : > { %7661 = vmatmul.mubr.msk.bf16.vlgmr.msra.gmra.mrb[20].mxu1 %vm3667_vm6, %v4559_v16  ;;  %v9001_v16 = vld [vmem:[#allocation7 + $0x404] ss:$8 sps:$4 sm:$0xff]  }
 0x680   : > { %4712 = vmatpush1.bf16.msra.mxu1 %v8927_v14  ;;  %4743 = vmatprep.mubr.bf16.mxu1 %v9369_v0  ;;  %v8998_v14 = vld [vmem:[#allocation7 + $0x3f0] ss:$8 sps:$4 sm:$0x3f]  }
 0x681   : > { %4713 = vmatprep.subr.bf16.mxu1 %v8932_v15  ;;  %v5232_v15 = vsel %vm720_vm0, %v8998_v14, 0  ;;  %v6265_v14 = vld [vmem:[#allocation8 + $0x88] sm:$0xff] }
 0x684   : > { %4714 = vmatpush1.bf16.msra.mxu1 %v8930_v18  ;;  %v8999_v18 = vld [vmem:[#allocation7 + $0x400] ss:$8 sps:$4 sm:$0xff]  }
 0x685   : > { %4715 = vmatprep.subr.bf16.mxu1 %v8935_v19  ;;  %v9004_v19 = vld [vmem:[#allocation7 + $0x414] ss:$8 sps:$4 sm:$0xff]  }
 0x688   : > { %4716 = vmatpush1.bf16.msra.mxu1 %v8933_v20  ;;  %v9002_v20 = vld [vmem:[#allocation7 + $0x410] ss:$8 sps:$4 sm:$0xff]  }
 0x689   : > { %7670 = vmatprep.subr.msk.bf16.mxu1 %vm720_vm0, %v8936_v22  ;;  %v9007_v22 = vld [vmem:[#allocation7 + $0x424] ss:$8 sps:$4 sm:$0xff]  }
 0x68c   : > { %4718 = vmatpush1.bf16.msra.mxu1 %v4706_v8  ;;  %v9008_v8 = vld [vmem:[#allocation7 + $0x434] ss:$8 sps:$4 sm:$0x3f]  }
 0x68d   : > { %4816 = vmatprep.subr.bf16.mxu1 %v8941_v34  ;;  %v9010_v34 = vld [vmem:[#allocation7 + $0x430] ss:$8 sps:$4 sm:$0x3f]  }
 0x68f   : > { %7671 = vmatmul.mubr.msk.bf16.vlgmr.msra.gmra.mrb[20].mxu1 %vm3667_vm6, %v10129_v35  ;;  %v8956_v35 = vld [vmem:[#allocation7 + $0x314] ss:$8 sps:$4 sm:$0xff]  }
 0x690   : > { %4817 = vmatpush1.bf16.msra.mxu1 %v8939_v25  ;;  %4848 = vmatprep.mubr.bf16.mxu1 %v9369_v0  ;;  %v5337_v25 = vsel %vm720_vm0, %v9010_v34, 0  ;;  %v9046_v34 = vld [vmem:[#allocation7 + $0x4f0] ss:$8 sps:$4 sm:$0x3f]  }
 0x691   : > { %4818 = vmatprep.subr.bf16.mxu1 %v8944_v17  ;;  %v9013_v17 = vld [vmem:[#allocation7 + $0x444] ss:$8 sps:$4 sm:$0xff]  }
 0x694   : > { %4819 = vmatpush1.bf16.msra.mxu1 %v8942_v26  ;;  %v9011_v26 = vld [vmem:[#allocation7 + $0x440] ss:$8 sps:$4 sm:$0xff]  }
 0x695   : > { %4820 = vmatprep.subr.bf16.mxu1 %v8947_v42  ;;  %v5294_v42 = vpop.permute.xlu0 %5293 }
 0x698   : > { %4821 = vmatpush1.bf16.msra.mxu1 %v8945_v27  ;;  %v6248_v27 = vld [vmem:[#allocation8] sm:$0xff] }
 0x699   : > { %7680 = vmatprep.subr.msk.bf16.mxu1 %vm720_vm0, %v8948_v28  ;;  %v6249_v28 = vld [vmem:[#allocation8 + $0x8] sm:$0xff] }
 0x69c   : > { %4823 = vmatpush1.bf16.msra.mxu1 %v4811_v31  ;;  %v9014_v31 = vld [vmem:[#allocation7 + $0x450] ss:$8 sps:$4 sm:$0xff]  }
 0x69d   : > { %4921 = vmatprep.subr.bf16.mxu1 %v8953_v32  ;;  %v8197_v32 = vpack.c.bf16 %v6249_v28, %v6248_v27  ;;  %v9050_v27 = vld [vmem:[#allocation7 + $0x510] ss:$8 sps:$4 sm:$0xff]   ;;  %v9055_v28 = vld [vmem:[#allocation7 + $0x524] ss:$8 sps:$4 sm:$0xff]  }
 0x69f   : > { %7681 = vmatmul.mubr.msk.bf16.vlgmr.msra.gmra.mrb[20].mxu1 %vm3667_vm6, %v4768_v37  ;;  %8198 = vmatpush1.bf16.msra.mxu0 %v8197_v32  ;;  %v9058_v32 = vld [vmem:[#allocation7 + $0x530] ss:$8 sps:$4 sm:$0x3f]  }
 0x6a0   : > { %4922 = vmatpush1.bf16.msra.mxu1 %v8951_v36  ;;  %4953 = vmatprep.mubr.bf16.mxu1 %v9369_v0  ;;  %v6251_v36 = vld [vmem:[#allocation8 + $0x18] sm:$0xff] }
 0x6a1   : > { %4923 = vmatprep.subr.bf16.mxu1 %v8956_v35  ;;  %v9019_v35 = vld [vmem:[#allocation7 + $0x464] ss:$8 sps:$4 sm:$0xff]   ;;  %v8200_v37 = vpack.c.bf16 %v6251_v36, %v6250_v30  ;;  %8199 = vmatprep.subr.bf16.mxu0 %v9374_v29  ;;  %v9053_v30 = vld [vmem:[#allocation7 + $0x520] ss:$8 sps:$4 sm:$0xff]   ;;  %v5756_v36 = vsel %vm720_vm0, %v9058_v32, 0 }
 0x6a3   : > { %8201 = vmatpush1.bf16.msra.mxu0 %v8200_v37  ;;  %v9059_v37 = vld [vmem:[#allocation7 + $0x540] ss:$8 sps:$4 sm:$0xff]  }
 0x6a4   : > { %4924 = vmatpush1.bf16.msra.mxu1 %v8954_v40  ;;  %v6252_v40 = vld [vmem:[#allocation8 + $0x20] sm:$0xff]  ;;  %8202 = vmatprep.subr.bf16.mxu0 %v9374_v29 }
 0x6a5   : > { %4925 = vmatprep.subr.bf16.mxu1 %v8959_v41  ;;  %v6253_v41 = vld [vmem:[#allocation8 + $0x28] sm:$0xff] }
 0x6a8   : > { %4926 = vmatpush1.bf16.msra.mxu1 %v8957_v43  ;;  %v9017_v43 = vld [vmem:[#allocation7 + $0x460] ss:$8 sps:$4 sm:$0xff]  }
 0x6a9   : > { %7690 = vmatprep.subr.msk.bf16.mxu1 %vm720_vm0, %v8960_v44  ;;  %v9020_v44 = vld [vmem:[#allocation7 + $0x474] ss:$8 sps:$4 sm:$0x3f]  }
 0x6ac   : > { %4928 = vmatpush1.bf16.msra.mxu1 %v4916_v33  ;;  %v8203_v33 = vpack.c.bf16 %v6253_v41, %v6252_v40  ;;  %v9064_v40 = vld [vmem:[#allocation7 + $0x554] ss:$8 sps:$4 sm:$0xff]   ;;  %v9062_v41 = vld [vmem:[#allocation7 + $0x550] ss:$8 sps:$4 sm:$0xff]  }
 0x6ad   : > { %5026 = vmatprep.subr.bf16.mxu1 %v8965_v47  ;;  %v6254_v47 = vld [vmem:[#allocation8 + $0x30] sm:$0xff] }
 0x6ae   : > { %8204 = vmatpush1.bf16.msra.mxu0 %v8203_v33  ;;  %v9070_v33 = vld [vmem:[#allocation7 + $0x570] ss:$8 sps:$4 sm:$0x3f]  }
 0x6af   : > { %7691 = vmatmul.mubr.msk.bf16.vlgmr.msra.gmra.mrb[20].mxu1 %vm3667_vm6, %v4873_v21  ;;  %v9025_v21 = vld [vmem:[#allocation7 + $0x484] ss:$8 sps:$4 sm:$0xff]   ;;  %8205 = vmatprep.subr.bf16.mxu0 %v9374_v29 }
 0x6b0   : > { %5027 = vmatpush1.bf16.msra.mxu1 %v8963_v50  ;;  %5058 = vmatprep.mubr.bf16.mxu1 %v9369_v0  ;;  %v6255_v50 = vld [vmem:[#allocation8 + $0x38] sm:$0xff] }
 0x6b1   : > { %5028 = vmatprep.subr.bf16.mxu1 %v8968_v52  ;;  %v5442_v52 = vsel %vm720_vm0, %v9022_v46, 0  ;;  %v9068_v46 = vld [vmem:[#allocation7 + $0x574] ss:$8 sps:$4 sm:$0x3f]  }
 0x6b4   : > { %5029 = vmatpush1.bf16.msra.mxu1 %v8966_v53  ;;  %v8206_v53 = vpack.c.bf16 %v6255_v50, %v6254_v47  ;;  %v5861_v47 = vsel %vm720_vm0, %v9070_v33, 0  ;;  %v9073_v50 = vld [vmem:[#allocation7 + $0x584] ss:$8 sps:$4 sm:$0xff]  }
 0x6b5   : > { %5030 = vmatprep.subr.bf16.mxu1 %v8971_v54  ;;  %v6256_v54 = vld [vmem:[#allocation8 + $0x40] sm:$0xff] }
 0x6b6   : > { %8207 = vmatpush1.bf16.msra.mxu0 %v8206_v53  ;;  %v9074_v53 = vld [vmem:[#allocation7 + $0x590] ss:$8 sps:$4 sm:$0xff]  }
 0x6b7   : > { %8208 = vmatprep.subr.bf16.mxu0 %v9374_v29 }
 0x6b8   : > { %5031 = vmatpush1.bf16.msra.mxu1 %v8969_v24  ;;  %v6257_v24 = vld [vmem:[#allocation8 + $0x48] sm:$0xff] }
 0x6b9   : > { %7700 = vmatprep.subr.msk.bf16.mxu1 %vm720_vm0, %v8972_v55  ;;  %v9023_v55 = vld [vmem:[#allocation7 + $0x480] ss:$8 sps:$4 sm:$0xff]  }
 0x6bc   : > { %5033 = vmatpush1.bf16.msra.mxu1 %v5021_v57  ;;  %v5399_v57 = vpop.permute.xlu1 %5398 }
 0x6bd   : > { %5131 = vmatprep.subr.bf16.mxu1 %v8977_v58  ;;  %v8209_v58 = vpack.c.bf16 %v6257_v24, %v6256_v54  ;;  %v9079_v54 = vld [vmem:[#allocation7 + $0x5a4] ss:$8 sps:$4 sm:$0xff]   ;;  %v9077_v24 = vld [vmem:[#allocation7 + $0x5a0] ss:$8 sps:$4 sm:$0xff]  }
 0x6bf   : > { %7701 = vmatmul.mubr.msk.bf16.vlgmr.msra.gmra.mrb[20].mxu1 %vm3667_vm6, %v4978_v61  ;;  %v9026_v61 = vld [vmem:[#allocation7 + $0x490] ss:$8 sps:$4 sm:$0xff]   ;;  %8210 = vmatpush1.bf16.msra.mxu0 %v8209_v58  ;;  %v9085_v58 = vld [vmem:[#allocation7 + $0x5c4] ss:$8 sps:$4 sm:$0xff]  }
 0x6c0   : > { %5132 = vmatpush1.bf16.msra.mxu1 %v8975_v59  ;;  %5163 = vmatprep.mubr.bf16.mxu1 %v9369_v0  ;;  %v6258_v59 = vld [vmem:[#allocation8 + $0x50] sm:$0xff] }
 0x6c1   : > { %5133 = vmatprep.subr.bf16.mxu1 %v8980_v60  ;;  %v6259_v60 = vld [vmem:[#allocation8 + $0x58] sm:$0xff]  ;;  %8211 = vmatprep.subr.bf16.mxu0 %v9374_v29 }
 0x6c4   : > { %5134 = vmatpush1.bf16.msra.mxu1 %v8978_v62  ;;  %v9031_v62 = vld [vmem:[#allocation7 + $0x4a4] ss:$8 sps:$4 sm:$0xff]  }
 0x6c5   : > { %5135 = vmatprep.subr.bf16.mxu1 %v8983_v63  ;;  %v8212_v63 = vpack.c.bf16 %v6259_v60, %v6258_v59  ;;  %v9083_v59 = vld [vmem:[#allocation7 + $0x5c0] ss:$8 sps:$4 sm:$0xff]   ;;  %v9088_v60 = vld [vmem:[#allocation7 + $0x5d4] ss:$8 sps:$4 sm:$0xff]  }
 0x6c7   : > { %8213 = vmatpush1.bf16.msra.mxu0 %v8212_v63  ;;  %v9091_v63 = vld [vmem:[#allocation7 + $0x5e4] ss:$8 sps:$4 sm:$0xff]  }
 0x6c8   : > { %5136 = vmatpush1.bf16.msra.mxu1 %v8981_v1  ;;  %v6260_v1 = vld [vmem:[#allocation8 + $0x60] sm:$0xff]  ;;  %8214 = vmatprep.subr.bf16.mxu0 %v9374_v29 }
 0x6c9   : > { %7710 = vmatprep.subr.msk.bf16.mxu1 %vm720_vm0, %v8984_v2  ;;  %v6261_v2 = vld [vmem:[#allocation8 + $0x68] sm:$0xff] }
 0x6cc   : > { %5138 = vmatpush1.bf16.msra.mxu1 %v5126_v4  ;;  %v9032_v4 = vld [vmem:[#allocation7 + $0x4b4] ss:$8 sps:$4 sm:$0x3f]  }
 0x6cd   : > { %5237 = vmatprep.subr.bf16.mxu1 %v8989_v5  ;;  %v9034_v5 = vld [vmem:[#allocation7 + $0x4b0] ss:$8 sps:$4 sm:$0x3f]  }
 0x6cf   : > { %7711 = vmatmul.mubr.msk.bf16.vlgmr.msra.gmra.mrb[20].mxu1 %vm3667_vm6, %v5083_v9  ;;  %v6263_v9 = vld [vmem:[#allocation8 + $0x78] sm:$0xff] }
 0x6d0   : > { %5238 = vmatpush1.bf16.msra.mxu1 %v8987_v6  ;;  %5269 = vmatprep.mubr.bf16.mxu1 %v9369_v0  ;;  %v8215_v6 = vpack.c.bf16 %v6261_v2, %v6260_v1  ;;  %v9089_v1 = vld [vmem:[#allocation7 + $0x5e0] ss:$8 sps:$4 sm:$0xff]   ;;  %v9092_v2 = vld [vmem:[#allocation7 + $0x5f4] ss:$8 sps:$4 sm:$0x3f]  }
 0x6d1   : > { %5239 = vmatprep.subr.bf16.mxu1 %v8992_v7  ;;  %v6262_v7 = vld [vmem:[#allocation8 + $0x70] sm:$0xff] }
 0x6d2   : > { %8216 = vmatpush1.bf16.msra.mxu0 %v8215_v6  ;;  %v9095_v6 = vld [vmem:[#allocation7 + $0x600] ss:$8 sps:$4 sm:$0xff]  }
 0x6d3   : > { %8217 = vmatprep.subr.bf16.mxu0 %v9374_v29 }
 0x6d4   : > { %5240 = vmatpush1.bf16.msra.mxu1 %v8990_v10  ;;  %v5547_v10 = vsel %vm720_vm0, %v9034_v5, 0  ;;  %v9097_v5 = vld [vmem:[#allocation7 + $0x604] ss:$8 sps:$4 sm:$0xff]  }
 0x6d5   : > { %5241 = vmatprep.subr.bf16.mxu1 %v8995_v11  ;;  %v9037_v11 = vld [vmem:[#allocation7 + $0x4c4] ss:$8 sps:$4 sm:$0xff]  }
 0x6d8   : > { %5242 = vmatpush1.bf16.msra.mxu1 %v8993_v12  ;;  %v8218_v12 = vpack.c.bf16 %v6263_v9, %v6262_v7  ;;  %v9100_v7 = vld [vmem:[#allocation7 + $0x614] ss:$8 sps:$4 sm:$0xff]  }
 0x6d9   : > { %7720 = vmatprep.subr.msk.bf16.mxu1 %vm720_vm0, %v8996_v13  ;;  %v6264_v13 = vld [vmem:[#allocation8 + $0x80] sm:$0xff] }
 0x6da   : > { %8219 = vmatpush1.bf16.msra.mxu0 %v8218_v12  ;;  %v9101_v12 = vld [vmem:[#allocation7 + $0x620] ss:$8 sps:$4 sm:$0xff]  }
 0x6db   : > { %8220 = vmatprep.subr.bf16.mxu0 %v9374_v29 }
 0x6dc   : > { %5244 = vmatpush1.bf16.msra.mxu1 %v5232_v15  ;;  %v9035_v15 = vld [vmem:[#allocation7 + $0x4c0] ss:$8 sps:$4 sm:$0xff]  }
 0x6dd   : > { %5342 = vmatprep.subr.bf16.mxu1 %v9001_v16  ;;  %v9040_v16 = vld [vmem:[#allocation7 + $0x4d4] ss:$8 sps:$4 sm:$0xff]  }
 0x6df   : > { %7721 = vmatmul.mubr.msk.bf16.vlgmr.msra.gmra.mrb[20].mxu1 %vm3667_vm6, %v10135_v38  ;;  %v9016_v38 = vld [vmem:[#allocation7 + $0x454] ss:$8 sps:$4 sm:$0xff]  }
 0x6e0   : > { %5343 = vmatpush1.bf16.msra.mxu1 %v8999_v18  ;;  %5374 = vmatprep.mubr.bf16.mxu1 %v9369_v0  ;;  %v5504_v18 = vpop.permute.xlu0 %5503 }
 0x6e1   : > { %5344 = vmatprep.subr.bf16.mxu1 %v9004_v19  ;;  %v8221_v19 = vpack.c.bf16 %v6265_v14, %v6264_v13  ;;  %v9104_v13 = vld [vmem:[#allocation7 + $0x634] ss:$8 sps:$4 sm:$0x3f]   ;;  %v9106_v14 = vld [vmem:[#allocation7 + $0x630] ss:$8 sps:$4 sm:$0x3f]  }
 0x6e3   : > { %8222 = vmatpush1.bf16.msra.mxu0 %v8221_v19 }
 0x6e4   : > { %5345 = vmatpush1.bf16.msra.mxu1 %v9002_v20  ;;  %v9038_v20 = vld [vmem:[#allocation7 + $0x4d0] ss:$8 sps:$4 sm:$0xff]   ;;  %8223 = vmatprep.subr.bf16.mxu0 %v9374_v29 }
 0x6e5   : > { %5346 = vmatprep.subr.bf16.mxu1 %v9007_v22  ;;  %v9043_v22 = vld [vmem:[#allocation7 + $0x4e4] ss:$8 sps:$4 sm:$0xff]  }
 0x6e8   : > { %5347 = vmatpush1.bf16.msra.mxu1 %v9005_v23  ;;  %v9041_v23 = vld [vmem:[#allocation7 + $0x4e0] ss:$8 sps:$4 sm:$0xff]  }
 0x6e9   : > { %7730 = vmatprep.subr.msk.bf16.mxu1 %vm720_vm0, %v9008_v8  ;;  %v9044_v8 = vld [vmem:[#allocation7 + $0x4f4] ss:$8 sps:$4 sm:$0x3f]  }
 0x6ec   : > { %5349 = vmatpush1.bf16.msra.mxu1 %v5337_v25  ;;  %v5652_v25 = vsel %vm720_vm0, %v9046_v34, 0 }
 0x6ed   : > { %5447 = vmatprep.subr.bf16.mxu1 %v9013_v17  ;;  %v9049_v17 = vld [vmem:[#allocation7 + $0x504] ss:$8 sps:$4 sm:$0xff]  }
 0x6ef   : > { %7731 = vmatmul.mubr.msk.bf16.vlgmr.msra.gmra.mrb[20].mxu1 %vm3667_vm6, %v5294_v42  ;;  %v5609_v42 = vpop.permute.xlu1 %5608 }
 0x6f0   : > { %5448 = vmatpush1.bf16.msra.mxu1 %v9011_v26  ;;  %5479 = vmatprep.mubr.bf16.mxu1 %v9369_v0  ;;  %v9047_v26 = vld [vmem:[#allocation7 + $0x500] ss:$8 sps:$4 sm:$0xff]  }
 0x6f1   : > { %5449 = vmatprep.subr.bf16.mxu1 %v9016_v38  ;;  %v9052_v38 = vld [vmem:[#allocation7 + $0x514] ss:$8 sps:$4 sm:$0xff]  }
 0x6f4   : > { %5450 = vmatpush1.bf16.msra.mxu1 %v9014_v31  ;;  %v9056_v31 = vld [vmem:[#allocation7 + $0x534] ss:$8 sps:$4 sm:$0x3f]  }
 0x6f5   : > { %5451 = vmatprep.subr.bf16.mxu1 %v9019_v35  ;;  %v9061_v35 = vld [vmem:[#allocation7 + $0x544] ss:$8 sps:$4 sm:$0xff]  }
 0x6f8   : > { %5452 = vmatpush1.bf16.msra.mxu1 %v9017_v43  ;;  %v9067_v43 = vld [vmem:[#allocation7 + $0x564] ss:$8 sps:$4 sm:$0xff]  }
 0x6f9   : > { %7740 = vmatprep.subr.msk.bf16.mxu1 %vm720_vm0, %v9020_v44  ;;  %v9065_v44 = vld [vmem:[#allocation7 + $0x560] ss:$8 sps:$4 sm:$0xff]  }
 0x6fc   : > { %5454 = vmatpush1.bf16.msra.mxu1 %v5442_v52  ;;  %v9071_v52 = vld [vmem:[#allocation7 + $0x580] ss:$8 sps:$4 sm:$0xff]  }
 0x6fd   : > { %5552 = vmatprep.subr.bf16.mxu1 %v9025_v21  ;;  %v5818_v21 = vpop.permute.xlu0 %5817 }
 0x6ff   : > { %7741 = vmatmul.mubr.msk.bf16.vlgmr.msra.gmra.mrb[20].mxu1 %vm3667_vm6, %v5399_v57 }
 0x700   : > { %5553 = vmatpush1.bf16.msra.mxu1 %v9023_v55  ;;  %5584 = vmatprep.mubr.bf16.mxu1 %v9369_v0  ;;  %v9080_v55 = vld [vmem:[#allocation7 + $0x5b4] ss:$8 sps:$4 sm:$0x3f]  }
 0x701   : > { %5554 = vmatprep.subr.bf16.mxu1 %v9028_v56  ;;  %v9082_v56 = vld [vmem:[#allocation7 + $0x5b0] ss:$8 sps:$4 sm:$0x3f]   ;;  %v6028_v9 = vpop.permute.xlu0 %6027 }
 0x702   : > { %v5966_v57 = vsel %vm720_vm0, %v9082_v56, 0  ;;  %v6364_v56 = vld [vmem:[#allocation10 + $0x70] sm:$0xff] }
 0x704   : > { %5555 = vmatpush1.bf16.msra.mxu1 %v9026_v61  ;;  %v5923_v61 = vpop.permute.xlu1 %5922 }
 0x705   : > { %5556 = vmatprep.subr.bf16.mxu1 %v9031_v62  ;;  %v9086_v62 = vld [vmem:[#allocation7 + $0x5d0] ss:$8 sps:$4 sm:$0xff]  }
 0x708   : > { %5557 = vmatpush1.bf16.msra.mxu1 %v9029_v3  ;;  %v9094_v3 = vld [vmem:[#allocation7 + $0x5f0] ss:$8 sps:$4 sm:$0x3f]  }
 0x709   : > { %7750 = vmatprep.subr.msk.bf16.mxu1 %vm720_vm0, %v9032_v4  ;;  %v6071_v4 = vsel %vm720_vm0, %v9094_v3, 0  ;;  %v9110_v3 = vld [vmem:[%s10541_s13 + $0x58] sm:$0xff]  }
 0x70c   : > { %5559 = vmatpush1.bf16.msra.mxu1 %v5547_v10  ;;  %v9098_v10 = vld [vmem:[#allocation7 + $0x610] ss:$8 sps:$4 sm:$0xff]  }
 0x70d   : > { %5657 = vmatprep.subr.bf16.mxu1 %v9037_v11  ;;  %v9103_v11 = vld [vmem:[#allocation7 + $0x624] ss:$8 sps:$4 sm:$0xff]  }
 0x70f   : > { %7751 = vmatmul.mubr.msk.bf16.vlgmr.msra.gmra.mrb[20].mxu1 %vm3667_vm6, %v5504_v18  ;;  %v6266_v18 = vld [vmem:[#allocation8 + $0x90] sm:$0xff] }
 0x710   : > { %5658 = vmatpush1.bf16.msra.mxu1 %v9035_v15  ;;  %5689 = vmatprep.mubr.bf16.mxu1 %v9369_v0  ;;  %v6176_v15 = vsel %vm720_vm0, %v9106_v14, 0 }
 0x711   : > { %5659 = vmatprep.subr.bf16.mxu1 %v9040_v16  ;;  %v6133_v16 = vpop.permute.xlu1 %6132 }
 0x714   : > { %5660 = vmatpush1.bf16.msra.mxu1 %v9038_v20  ;;  %v6228_v20 = vld [vmem:[%s10536_s8] sm:$0x3] }
 0x715   : > { %5661 = vmatprep.subr.bf16.mxu1 %v9043_v22  ;;  %v6233_v22 = vrot.slane %v6228_v20, %v3183_v49  ;;  %v6352_v49 = vld [vmem:[#allocation10 + $0x10] sm:$0xff] }
 0x718   : > { %5662 = vmatpush1.bf16.msra.mxu1 %v9041_v23  ;;  %v6237_v23 = vrot.slane %v6228_v20, %v3187_v51  ;;  %v9111_v20 = vld [vmem:[%s10541_s13 + $0x38] sm:$0xff]  }
 0x719   : > { %7760 = vmatprep.subr.msk.bf16.mxu1 %vm720_vm0, %v9044_v8 }
 0x71c   : > { %5664 = vmatpush1.bf16.msra.mxu1 %v5652_v25 }
 0x71d   : > { %5761 = vmatprep.subr.bf16.mxu1 %v9049_v17  ;;  %v6350_v17 = vld [vmem:[#allocation10] sm:$0xff] }
 0x71f   : > { %7761 = vmatmul.mubr.msk.bf16.vlgmr.msra.gmra.mrb[20].mxu1 %vm3667_vm6, %v5609_v42 }
 0x720   : > { %5762 = vmatpush1.bf16.msra.mxu1 %v9047_v26  ;;  %5793 = vmatprep.mubr.bf16.mxu1 %v9369_v0  ;;  %v6351_v26 = vld [vmem:[#allocation10 + $0x8] sm:$0xff] }
 0x721   : > { %5763 = vmatprep.subr.bf16.mxu1 %v9052_v38 }
 0x724   : > { %5764 = vmatpush1.bf16.msra.mxu1 %v9050_v27 }
 0x725   : > { %5765 = vmatprep.subr.bf16.mxu1 %v9055_v28 }
 0x728   : > { %5766 = vmatpush1.bf16.msra.mxu1 %v9053_v30 }
 0x729   : > { %7770 = vmatprep.subr.msk.bf16.mxu1 %vm720_vm0, %v9056_v31  ;;  %v8227_v31 = vpack.c.bf16 %v6351_v26, %v6350_v17 }
 0x72c   : > { %5768 = vmatpush1.bf16.msra.mxu1 %v5756_v36 }
 0x72d   : > { %5866 = vmatprep.subr.bf16.mxu1 %v9061_v35  ;;  %v6353_v35 = vld [vmem:[#allocation10 + $0x18] sm:$0xff] }
 0x72e   : > { %v8230_v51 = vpack.c.bf16 %v6353_v35, %v6352_v49  ;;  %v9120_v49 = vld [vmem:[%s10541_s13 + $0xa8] sm:$0xff]   ;;  %v9121_v35 = vld [vmem:[%s10541_s13 + $0x10] sm:$0xff]  }
 0x72f   : > { %7771 = vmatmul.mubr.msk.bf16.vlgmr.msra.gmra.mrb[20].mxu1 %vm3667_vm6, %v10141_v39  ;;  %v9076_v39 = vld [vmem:[#allocation7 + $0x594] ss:$8 sps:$4 sm:$0xff]  }
 0x730   : > { %5867 = vmatpush1.bf16.msra.mxu1 %v9059_v37  ;;  %5898 = vmatprep.mubr.bf16.mxu1 %v9369_v0 }
 0x731   : > { %5868 = vmatprep.subr.bf16.mxu1 %v9064_v40  ;;  %v6354_v40 = vld [vmem:[#allocation10 + $0x20] sm:$0xff] }
 0x734   : > { %5869 = vmatpush1.bf16.msra.mxu1 %v9062_v41  ;;  %v6355_v41 = vld [vmem:[#allocation10 + $0x28] sm:$0xff] }
 0x735   : > { %5870 = vmatprep.subr.bf16.mxu1 %v9067_v43  ;;  %v8233_v43 = vpack.c.bf16 %v6355_v41, %v6354_v40  ;;  %v9125_v40 = vld [vmem:[%s10541_s13 + $0x20] sm:$0xff]  }
 0x736   : > { %v9126_v41 = vld [vmem:[%s10541_s13 + $0xc0] sm:$0xff]  }
 0x738   : > { %5871 = vmatpush1.bf16.msra.mxu1 %v9065_v44  ;;  %v6356_v44 = vld [vmem:[#allocation10 + $0x30] sm:$0xff] }
 0x739   : > { %7780 = vmatprep.subr.msk.bf16.mxu1 %vm720_vm0, %v9068_v46  ;;  %v6357_v46 = vld [vmem:[#allocation10 + $0x38] sm:$0xff] }
 0x73a   : > { %v8236_v33 = vpack.c.bf16 %v6357_v46, %v6356_v44  ;;  %v9128_v46 = vld [vmem:[%s10541_s13 + $0x80] sm:$0xff]  }
 0x73c   : > { %5873 = vmatpush1.bf16.msra.mxu1 %v5861_v47  ;;  %v6358_v47 = vld [vmem:[#allocation10 + $0x40] sm:$0xff] }
 0x73d   : > { %5971 = vmatprep.subr.bf16.mxu1 %v9073_v50  ;;  %v6359_v50 = vld [vmem:[#allocation10 + $0x48] sm:$0xff] }
 0x73f   : > { %7781 = vmatmul.mubr.msk.bf16.vlgmr.msra.gmra.mrb[20].mxu1 %vm3667_vm6, %v5818_v21  ;;  %v6361_v21 = vld [vmem:[#allocation10 + $0x58] sm:$0xff] }
 0x740   : > { %5972 = vmatpush1.bf16.msra.mxu1 %v9071_v52  ;;  %6003 = vmatprep.mubr.bf16.mxu1 %v9369_v0  ;;  %v8239_v52 = vpack.c.bf16 %v6359_v50, %v6358_v47  ;;  %v9130_v47 = vld [vmem:[%s10541_s13 + $0x90] sm:$0xff]   ;;  %v9131_v50 = vld [vmem:[%s10541_s13 + $0x98] sm:$0xff]  }
 0x741   : > { %5973 = vmatprep.subr.bf16.mxu1 %v9076_v39  ;;  %v6360_v39 = vld [vmem:[#allocation10 + $0x50] sm:$0xff] }
 0x744   : > { %5974 = vmatpush1.bf16.msra.mxu1 %v9074_v53  ;;  %v8242_v53 = vpack.c.bf16 %v6361_v21, %v6360_v39  ;;  %v9132_v39 = vld [vmem:[%s10543_s15] sm:$0xff]   ;;  %v9133_v21 = vld [vmem:[%s10543_s15 + $0x8] sm:$0xff]  }
 0x745   : > { %5975 = vmatprep.subr.bf16.mxu1 %v9079_v54  ;;  %v6362_v54 = vld [vmem:[#allocation10 + $0x60] sm:$0xff] }
 0x748   : > { %5976 = vmatpush1.bf16.msra.mxu1 %v9077_v24  ;;  %v6363_v24 = vld [vmem:[#allocation10 + $0x68] sm:$0xff] }
 0x749   : > { %7790 = vmatprep.subr.msk.bf16.mxu1 %vm720_vm0, %v9080_v55  ;;  %v8245_v55 = vpack.c.bf16 %v6363_v24, %v6362_v54  ;;  %v9135_v54 = vld [vmem:[%s10543_s15 + $0x18] sm:$0xff]   ;;  %v9136_v24 = vld [vmem:[%s10543_s15 + $0x20] sm:$0xff]  }
 0x74c   : > { %5978 = vmatpush1.bf16.msra.mxu1 %v5966_v57  ;;  %v6365_v57 = vld [vmem:[#allocation10 + $0x78] sm:$0xff] }
 0x74d   : > { %6076 = vmatprep.subr.bf16.mxu1 %v9085_v58  ;;  %v8248_v58 = vpack.c.bf16 %v6365_v57, %v6364_v56  ;;  %v9138_v56 = vld [vmem:[%s10543_s15 + $0x30] sm:$0xff]   ;;  %v9139_v57 = vld [vmem:[%s10543_s15 + $0x38] ss:$0 sps:$4 sm:$0xff]  }
 0x74f   : > { %7791 = vmatmul.mubr.msk.bf16.vlgmr.msra.gmra.mrb[20].mxu1 %vm3667_vm6, %v5923_v61 }
 0x750   : > { %6077 = vmatpush1.bf16.msra.mxu1 %v9083_v59  ;;  %6108 = vmatprep.mubr.bf16.mxu1 %v9369_v0  ;;  %v6366_v59 = vld [vmem:[#allocation10 + $0x80] sm:$0xff] }
 0x751   : > { %6078 = vmatprep.subr.bf16.mxu1 %v9088_v60  ;;  %v6367_v60 = vld [vmem:[#allocation10 + $0x88] sm:$0xff] }
 0x752   : > { %v8251_v61 = vpack.c.bf16 %v6367_v60, %v6366_v59  ;;  %v9140_v59 = vld [vmem:[%s10545_s17] sm:$0xff]   ;;  %v9141_v60 = vld [vmem:[%s10545_s17 + $0x8] sm:$0xff]  }
 0x754   : > { %6079 = vmatpush1.bf16.msra.mxu1 %v9086_v62  ;;  %v6368_v62 = vld [vmem:[#allocation10 + $0x90] sm:$0xff] }
 0x755   : > { %6080 = vmatprep.subr.bf16.mxu1 %v9091_v63  ;;  %v6369_v63 = vld [vmem:[#allocation10 + $0x98] sm:$0xff] }
 0x758   : > { %6081 = vmatpush1.bf16.msra.mxu1 %v9089_v1  ;;  %v8254_v1 = vpack.c.bf16 %v6369_v63, %v6368_v62  ;;  %v9143_v62 = vld [vmem:[%s10545_s17 + $0x18] sm:$0xff]  }
 0x759   : > { %7800 = vmatprep.subr.msk.bf16.mxu1 %vm720_vm0, %v9092_v2  ;;  %v9108_v2 = vld [vmem:[%s10541_s13 + $0x50] sm:$0xff]  }
 0x75c   : > { %6083 = vmatpush1.bf16.msra.mxu1 %v6071_v4  ;;  %v9112_v4 = vld [vmem:[%s10541_s13 + $0x60] sm:$0xff]  }
 0x75d   : > { %6181 = vmatprep.subr.bf16.mxu1 %v9097_v5 }
 0x75f   : > { %7801 = vmatmul.mubr.msk.bf16.vlgmr.msra.gmra.mrb[20].mxu1 %vm3667_vm6, %v6028_v9 }
 0x760   : > { %6182 = vmatpush1.bf16.msra.mxu1 %v9095_v6  ;;  %6213 = vmatprep.mubr.bf16.mxu1 %v9369_v0  ;;  %v6267_v0 = vld [vmem:[#allocation8 + $0x98] sm:$0xff] }
 0x761   : > { %6183 = vmatprep.subr.bf16.mxu1 %v9100_v7  ;;  %v8224_v19 = vpack.c.bf16 %v6267_v0, %v6266_v18  ;;  %v6447_v18 = vld [vmem:[%s10539_s11] sm:$0x1f] }
 0x762   : > { %v6526_v0 = vld [vmem:[%s10540_s12] sm:$0x1f] }
 0x763   : > { %8225 = vmatpush1.bf16.msra.mxu0 %v8224_v19  ;;  %v9107_v19 = vld [vmem:[%s10541_s13 + $0x28] sm:$0xff]  }
 0x764   : > { %6184 = vmatpush1.bf16.msra.mxu1 %v9098_v10  ;;  %8226 = vmatprep.subr.bf16.mxu0 %v9374_v29 }
 0x765   : > { %6185 = vmatprep.subr.bf16.mxu1 %v9103_v11 }
 0x768   : > { %6186 = vmatpush1.bf16.msra.mxu1 %v9101_v12 }
 0x769   : > { %7810 = vmatprep.subr.msk.bf16.mxu1 %vm720_vm0, %v9104_v13 }
 0x76c   : > { %6188 = vmatpush1.bf16.msra.mxu1 %v6176_v15 }
 0x76d   : > { %8038 = vmatprep.subr.bf16.mxu1 %v9375_v45 }
 0x76f   : > { %7811 = vmatmul.mubr.msk.bf16.vlgmr.msra.gmra.mrb[20].mxu1 %vm3667_vm6, %v6133_v16 }
 0x770   : > { %8048 = vmatprep.mubr.msk.bf16.mxu1 %vm9381_vm8, %v9375_v45  ;;  %8039 = vmatpush3.bf16.msra.mxu1 %v9108_v2 }
 0x771   : > { %8040 = vmatprep.subr.bf16.mxu1 %v9375_v45 }
 0x774   : > { %8041 = vmatpush3.bf16.msra.mxu1 %v9110_v3 }
 0x775   : > { %8042 = vmatprep.subr.bf16.mxu1 %v9375_v45 }
 0x778   : > { %8043 = vmatpush3.bf16.msra.mxu1 %v9112_v4 }
 0x779   : > { %8044 = vmatprep.subr.bf16.mxu1 %v9375_v45 }
 0x842   : > { %v6215_v8 = vpop.f32.mrb[20].mxu1 }
 0x843   : > { %v10266_v34 = vadd.f32 %v6233_v22, %v6215_v8  ;;  %v6217_v25 = vpop.f32.mrb[21].mxu1  ;;  %v9115_v8 = vld [vmem:[%s10541_s13 + $0x48] sm:$0xff]  }
 0x844   : > { %v6241_v38 = vadd.f32 %v6237_v23, %v6217_v25  ;;  %v6219_v42 = vpop.f32.mrb[22].mxu1 }
 0x845   : > { %v6221_v27 = vpop.f32.mrb[23].mxu1  ;;  %v6244_v32 = vmax.f32 %v10266_v34, 0.0  ;;  %v6242_v36 = vadd.f32 %v6233_v22, %v6219_v42  ;;  %v9113_v22 = vld [vmem:[%s10541_s13 + $0x40] sm:$0xff]   ;;  %v9116_v34 = vld [vmem:[%s10541_s13 + $0x70] sm:$0xff]  }
 0x846   : > { %v6245_v28 = vmax.f32 %v6241_v38, 0.0  ;;  %v6243_v30 = vadd.f32 %v6237_v23, %v6221_v27  ;;  %v9114_v23 = vld [vmem:[%s10541_s13 + $0x68] sm:$0xff]  }
 0x847   : > { %v6246_v37 = vmax.f32 %v6242_v36, 0.0  ;;  %8045 = vmatpush3.bf16.msra.mxu1 %v9114_v23  ;;  %v9119_v36 = vld [vmem:[%s10541_s13 + $0x8] sm:$0xff]  }
 0x848   : > { %v6247_v48 = vmax.f32 %v6243_v30, 0.0  ;;  %7812 = vmatprep.mubr.msk.f32.mxu0 %vm6268_vm7, %v6245_v28  ;;  %8046 = vmatprep.subr.bf16.mxu1 %v9375_v45  ;;  %v9118_v30 = vld [vmem:[%s10541_s13 + $0xa0] sm:$0xff]  }
 0x849   : > { %6340 = vmatmul.mubr.f32.vlgmr.msra.gmra.mrb[8].mxu0 %v6244_v32 }
 0x84a   : > { %8228 = vmatpush1.bf16.msra.mxu0 %v8227_v31  ;;  %7813 = vmatprep.mubr.msk.f32.mxu0 %vm6268_vm7, %v6247_v48 }
 0x84b   : > { %8229 = vmatprep.subr.bf16.mxu0 %v9374_v29  ;;  %8047 = vmatpush3.bf16.msra.mxu1 %v9116_v34 }
 0x84c   : > { %8066 = vmatprep.subr.bf16.mxu1 %v9375_v45 }
 0x84d   : > { %6345 = vmatmul.mubr.f32.gmra.mrb[10].mxu0 %v6246_v37 }
 0x84e   : > { %8231 = vmatpush1.bf16.msra.mxu0 %v8230_v51  ;;  %7814 = vmatprep.mubr.msk.f32.mxu0 %vm6268_vm7, %v6245_v28  ;;  %v9117_v28 = vld [vmem:[%s10541_s13] sm:$0xff]   ;;  %v9123_v51 = vld [vmem:[%s10541_s13 + $0x18] sm:$0xff]  }
 0x84f   : > { %8232 = vmatprep.subr.bf16.mxu0 %v9374_v29 }
 0x852   : > { %8234 = vmatpush1.bf16.msra.mxu0 %v8233_v43  ;;  %v9127_v43 = vld [vmem:[%s10541_s13 + $0x78] sm:$0xff]  }
 0x853   : > { %8235 = vmatprep.subr.bf16.mxu0 %v9374_v29 }
 0x856   : > { %8237 = vmatpush1.bf16.msra.mxu0 %v8236_v33  ;;  %v9129_v33 = vld [vmem:[%s10541_s13 + $0x88] sm:$0xff]  }
 0x857   : > { %8238 = vmatprep.subr.bf16.mxu0 %v9374_v29 }
 0x85a   : > { %8240 = vmatpush1.bf16.msra.mxu0 %v8239_v52 }
 0x85b   : > { %8241 = vmatprep.subr.bf16.mxu0 %v9374_v29 }
 0x85e   : > { %8243 = vmatpush1.bf16.msra.mxu0 %v8242_v53  ;;  %v9134_v53 = vld [vmem:[%s10543_s15 + $0x10] sm:$0xff]  }
 0x85f   : > { %8244 = vmatprep.subr.bf16.mxu0 %v9374_v29 }
 0x862   : > { %8246 = vmatpush1.bf16.msra.mxu0 %v8245_v55  ;;  %v9137_v55 = vld [vmem:[%s10543_s15 + $0x28] sm:$0xff]  }
 0x863   : > { %8247 = vmatprep.subr.bf16.mxu0 %v9374_v29 }
 0x866   : > { %8249 = vmatpush1.bf16.msra.mxu0 %v8248_v58  ;;  %v7101_v58 = vsel %vm3444_vm3, %v9139_v57, 0 }
 0x867   : > { %8250 = vmatprep.subr.bf16.mxu0 %v9374_v29 }
 0x86a   : > { %8252 = vmatpush1.bf16.msra.mxu0 %v8251_v61  ;;  %v9142_v61 = vld [vmem:[%s10545_s17 + $0x10] sm:$0xff]  }
 0x86b   : > { %8253 = vmatprep.subr.bf16.mxu0 %v9374_v29 }
 0x86e   : > { %8255 = vmatpush1.bf16.msra.mxu0 %v8254_v1 }
 0x86f   : > { %8256 = vmatprep.subr.bf16.mxu0 %v9374_v29 }
 0x871   : > { %6435 = vmatmul.mubr.f32.vlgmr.msra.gmra.mrb[12].mxu0 %v6244_v32 }
 0x872   : > { %7815 = vmatprep.mubr.msk.f32.mxu0 %vm6268_vm7, %v6247_v48  ;;  %v9122_v48 = vld [vmem:[%s10541_s13 + $0xb0] sm:$0xff]  }
 0x875   : > { %6440 = vmatmul.mubr.f32.gmra.mrb[14].mxu0 %v6246_v37  ;;  %v9124_v37 = vld [vmem:[%s10541_s13 + $0xb8] sm:$0xff]  }
 0x876   : > { %8000 = vmatprep.mubr.msk.f32.mxu0 %vm9381_vm8, %v9375_v45 }
 0x91c   : > { %v6341_v5 = vpop.f32.mrb[8].mxu0 }
 0x91d   : > { %v6343_v6 = vpop.f32.mrb[9].mxu0 }
 0x920   : > { %v6346_v7 = vpop.f32.mrb[10].mxu0 }
 0x921   : > { %v6348_v9 = vpop.f32.mrb[11].mxu0 }
 0x944   : > { %v6436_v10 = vpop.f32.mrb[12].mxu0 }
 0x945   : > { %v6445_v11 = vmax.f32 %v6341_v5, %v6436_v10  ;;  %v6438_v12 = vpop.f32.mrb[13].mxu0 }
 0x948   : > { %v6441_v13 = vpop.f32.mrb[14].mxu0 }
 0x949   : > { %v6446_v14 = vmax.f32 %v6346_v7, %v6441_v13  ;;  %v6443_v15 = vpop.f32.mrb[15].mxu0 }
 0x94b   : > { %v8257_v16 = vpack.c.bf16 %v6446_v14, %v6445_v11 }
 0x94d   : > { %8259 = vmatpush3.bf16.msk.msra.mxu0 %vm8258_vm10, %v8257_v16 }
 0x94e   : > { %8260 = vmatprep.subr.bf16.mxu0 %v9374_v29  ;;  %v9109_v29 = vld [vmem:[%s10541_s13 + $0x30] sm:$0xff]  }
 0x950   : > { %8001 = vmatmul.mubr.msk.f32.vlgmr.msra.gmra.mrb[16].mxu0 %vm6448_vm11, %v6447_v18 }
 0x951   : > { %8263 = vmatpush3.bf16.msk.msra.mxu0 %vm8258_vm10, %v8257_v16  ;;  %8007 = vmatprep.mubr.msk.f32.mxu0 %vm9381_vm8, %v9375_v45 }
 0x952   : > { %8010 = vmatprep.subr.bf16.mxu0 %v9375_v45 }
 0x954   : > { %8008 = vmatmul.mubr.msk.f32.vlgmr.msra.gmra.mrb[18].mxu0 %vm6448_vm11, %v6526_v0 }
 0x955   : > { %8011 = vmatpush3.bf16.msra.mxu0 %v9107_v19  ;;  %8020 = vmatprep.mubr.msk.bf16.mxu0 %vm9381_vm8, %v9375_v45 }
 0x956   : > { %8012 = vmatprep.subr.bf16.mxu0 %v9375_v45 }
 0x959   : > { %8013 = vmatpush3.bf16.msra.mxu0 %v9109_v29 }
 0x95a   : > { %8014 = vmatprep.subr.bf16.mxu0 %v9375_v45 }
 0x95d   : > { %8015 = vmatpush3.bf16.msra.mxu0 %v9111_v20 }
 0x95e   : > { %8016 = vmatprep.subr.bf16.mxu0 %v9375_v45 }
 0x961   : > { %8017 = vmatpush3.bf16.msra.mxu0 %v9113_v22  ;;  %v7031_v22 = vld [vmem:[%s10542_s14] sm:$0x1] }
 0x962   : > { %8018 = vmatprep.subr.bf16.mxu0 %v9375_v45 }
 0x965   : > { %8019 = vmatpush3.bf16.msra.mxu0 %v9115_v8 }
 0x966   : > { %8024 = vmatprep.subr.bf16.mxu0 %v9375_v45 }
 0xa23   : > { %v6522_v25 = vpop.f32.mrb[16].mxu0 }
 0xa24   : > { %v8002_v17 = vpop.f32.mrb[17].mxu0 }
 0xa27   : > { %v6596_v26 = vpop.f32.mrb[18].mxu0 }
 0xa28   : > { %v6600_v38 = vmax.f32 %v6522_v25, %v6596_v26  ;;  %v8009_v42 = vpop.f32.mrb[19].mxu0 }
 0xa29   : > { %v9145_v42 = vld [vmem:[%s10545_s17 + $0x28] ss:$0 sps:$4 sm:$0x33]  }
 0xa2a   : > { %v6601_v27 = vpack.c.bf16 %v6600_v38, %v6600_v38  ;;  %v9144_v38 = vld [vmem:[%s10545_s17 + $0x20] sm:$0xff]  }
 0xa2c   : > { %v6624_v31 = vshrl.u32 %v6601_v27, 16  ;;  %v6784_v32 = vrot.slane %v6601_v27, 1  ;;  %v6956_v44 = vrot.slane %v6601_v27, 2 }
 0xa2e   : > { %8021 = vmatmul.mubr.msk.bf16.vlgmr.msra.gmra.mrb[20].mxu0 %vm6656_vm12, %v6624_v31  ;;  %8049 = vmatmul.mubr.msk.bf16.vlgmr.msra.gmra.mrb[24].mxu1 %vm6656_vm12, %v6784_v32  ;;  %v6870_v52 = vrot.slane %v6624_v31, 1 }
 0xa2f   : > { %8025 = vmatpush3.bf16.msra.mxu0 %v9117_v28  ;;  %8067 = vmatpush3.bf16.msra.mxu1 %v9118_v30  ;;  %v7050_v28 = vld [vmem:[%s10600_s0] sm:$0x1] }
 0xa30   : > { %8026 = vmatprep.subr.bf16.mxu0 %v9375_v45  ;;  %8068 = vmatprep.subr.bf16.mxu1 %v9375_v45 }
 0xa31   : > { %8034 = vmatprep.mubr.msk.bf16.mxu0 %vm9381_vm8, %v9375_v45  ;;  %8076 = vmatprep.mubr.msk.bf16.mxu1 %vm9381_vm8, %v9375_v45 }
 0xa33   : > { %8027 = vmatpush3.bf16.msra.mxu0 %v9119_v36  ;;  %8069 = vmatpush3.bf16.msra.mxu1 %v9120_v49 }
 0xa34   : > { %8028 = vmatprep.subr.bf16.mxu0 %v9375_v45  ;;  %8070 = vmatprep.subr.bf16.mxu1 %v9375_v45 }
 0xa37   : > { %8029 = vmatpush3.bf16.msra.mxu0 %v9121_v35  ;;  %8071 = vmatpush3.bf16.msra.mxu1 %v9122_v48  ;;  %v7156_v48 = vld [vmem:[%s10601_s18] sm:$0x1] }
 0xa38   : > { %8030 = vmatprep.subr.bf16.mxu0 %v9375_v45  ;;  %8072 = vmatprep.subr.bf16.mxu1 %v9375_v45 }
 0xa3b   : > { %8031 = vmatpush3.bf16.msra.mxu0 %v9123_v51  ;;  %8073 = vmatpush3.bf16.msra.mxu1 %v9124_v37 }
 0xa3c   : > { %8032 = vmatprep.subr.bf16.mxu0 %v9375_v45  ;;  %8074 = vmatprep.subr.bf16.mxu1 %v9375_v45 }
 0xa3f   : > { %8033 = vmatpush3.bf16.msra.mxu0 %v9125_v40  ;;  %8075 = vmatpush3.bf16.msra.mxu1 %v9126_v41 }
 0xa40   : > { %8052 = vmatprep.subr.bf16.mxu0 %v9375_v45  ;;  %8100 = vmatprep.subr.bf16.mxu1 %v9375_v45 }
 0xa42   : > { %8035 = vmatmul.mubr.msk.bf16.vlgmr.msra.gmra.mrb[24].mxu0 %vm6656_vm12, %v6601_v27  ;;  %8077 = vmatmul.mubr.msk.bf16.vlgmr.msra.gmra.mrb[28].mxu1 %vm6656_vm12, %v6956_v44  ;;  %v7195_v27 = vsel %vm6452_vm9, %v9145_v42, 0 }
 0xa43   : > { %8053 = vmatpush3.bf16.msra.mxu0 %v9127_v43  ;;  %8062 = vmatprep.mubr.msk.bf16.mxu0 %vm9381_vm8, %v9375_v45 }
 0xa44   : > { %8054 = vmatprep.subr.bf16.mxu0 %v9375_v45  ;;  %8112 = vmatprep.mubr.msk.bf16.mxu1 %vm9381_vm8, %v9375_v45 }
 0xa45   : > { %8101 = vmatpush3.bf16.msra.mxu1 %v9140_v59 }
 0xa46   : > { %8102 = vmatprep.subr.bf16.mxu1 %v9375_v45 }
 0xa47   : > { %8055 = vmatpush3.bf16.msra.mxu0 %v9128_v46 }
 0xa48   : > { %8056 = vmatprep.subr.bf16.mxu0 %v9375_v45 }
 0xa49   : > { %8103 = vmatpush3.bf16.msra.mxu1 %v9141_v60 }
 0xa4a   : > { %8104 = vmatprep.subr.bf16.mxu1 %v9375_v45 }
 0xa4b   : > { %8057 = vmatpush3.bf16.msra.mxu0 %v9129_v33 }
 0xa4c   : > { %8058 = vmatprep.subr.bf16.mxu0 %v9375_v45 }
 0xa4d   : > { %8105 = vmatpush3.bf16.msra.mxu1 %v9142_v61 }
 0xa4e   : > { %8106 = vmatprep.subr.bf16.mxu1 %v9375_v45 }
 0xa4f   : > { %8059 = vmatpush3.bf16.msra.mxu0 %v9130_v47 }
 0xa50   : > { %8060 = vmatprep.subr.bf16.mxu0 %v9375_v45 }
 0xa51   : > { %8107 = vmatpush3.bf16.msra.mxu1 %v9143_v62 }
 0xa52   : > { %8108 = vmatprep.subr.bf16.mxu1 %v9375_v45 }
 0xa53   : > { %8061 = vmatpush3.bf16.msra.mxu0 %v9131_v50 }
 0xa54   : > { %8080 = vmatprep.subr.bf16.mxu0 %v9375_v45 }
 0xa55   : > { %8109 = vmatpush3.bf16.msra.mxu1 %v9144_v38 }
 0xa56   : > { %8063 = vmatmul.mubr.msk.bf16.vlgmr.msra.gmra.mrb[28].mxu0 %vm6656_vm12, %v6870_v52  ;;  %8110 = vmatprep.subr.bf16.mxu1 %v9375_v45 }
 0xa57   : > { %8096 = vmatprep.mubr.msk.bf16.mxu0 %vm9381_vm8, %v9375_v45  ;;  %8081 = vmatpush3.bf16.msra.mxu0 %v9132_v39 }
 0xa58   : > { %8082 = vmatprep.subr.bf16.mxu0 %v9375_v45 }
 0xa59   : > { %8111 = vmatpush3.bf16.msra.mxu1 %v7195_v27 }
 0xa5b   : > { %8083 = vmatpush3.bf16.msra.mxu0 %v9133_v21 }
 0xa5c   : > { %8084 = vmatprep.subr.bf16.mxu0 %v9375_v45 }
 0xa5f   : > { %8085 = vmatpush3.bf16.msra.mxu0 %v9134_v53 }
 0xa60   : > { %8086 = vmatprep.subr.bf16.mxu0 %v9375_v45 }
 0xa63   : > { %8087 = vmatpush3.bf16.msra.mxu0 %v9135_v54 }
 0xa64   : > { %8088 = vmatprep.subr.bf16.mxu0 %v9375_v45 }
 0xa67   : > { %8089 = vmatpush3.bf16.msra.mxu0 %v9136_v24 }
 0xa68   : > { %8090 = vmatprep.subr.bf16.mxu0 %v9375_v45 }
 0xa6b   : > { %8091 = vmatpush3.bf16.msra.mxu0 %v9137_v55 }
 0xa6c   : > { %8092 = vmatprep.subr.bf16.mxu0 %v9375_v45 }
 0xa6f   : > { %8093 = vmatpush3.bf16.msra.mxu0 %v9138_v56 }
 0xa70   : > { %8094 = vmatprep.subr.bf16.mxu0 %v9375_v45 }
 0xa73   : > { %8095 = vmatpush3.bf16.msra.mxu0 %v7101_v58 }
 0xb01   : > { %v6694_v63 = vpop.f32.mrb[20].mxu0  ;;  %v6852_v1 = vpop.f32.mrb[24].mxu1 }
 0xb02   : > { %v8022_v2 = vpop.f32.mrb[21].mxu0  ;;  %v8050_v3 = vpop.f32.mrb[25].mxu1 }
 0xb03   : > { %v6697_v4 = vpop.f32.mrb[22].mxu0  ;;  %v6855_v5 = vpop.f32.mrb[26].mxu1 }
 0xb04   : > { %v8023_v6 = vpop.f32.mrb[23].mxu0  ;;  %v8051_v7 = vpop.f32.mrb[27].mxu1 }
 0xb15   : > { %v6766_v9 = vpop.f32.mrb[24].mxu0  ;;  %v7024_v10 = vpop.f32.mrb[28].mxu1 }
 0xb16   : > { %v6767_v11 = vadd.f32 %v6766_v9, %v6694_v63  ;;  %v8036_v12 = vpop.f32.mrb[25].mxu0  ;;  %v8078_v13 = vpop.f32.mrb[29].mxu1 }
 0xb17   : > { %v6769_v14 = vpop.f32.mrb[26].mxu0  ;;  %v7027_v15 = vpop.f32.mrb[30].mxu1 }
 0xb18   : > { %v8037_v16 = vpop.f32.mrb[27].mxu0  ;;  %v8079_v18 = vpop.f32.mrb[31].mxu1  ;;  %v6858_v0 = vadd.f32 %v6852_v1, %v6767_v11 }
 0xb29   : > { %v6938_v19 = vpop.f32.mrb[28].mxu0 }
 0xb2a   : > { %v6944_v29 = vadd.f32 %v6938_v19, %v6858_v0  ;;  %v8064_v20 = vpop.f32.mrb[29].mxu0 }
 0xb2b   : > { %v6941_v23 = vpop.f32.mrb[30].mxu0 }
 0xb2c   : > { %v7030_v8 = vadd.f32 %v7024_v10, %v6944_v29  ;;  %v8065_v34 = vpop.f32.mrb[31].mxu0 }
 0xb2e   : > { %v7032_v25 = vadd.f32 %v7031_v22, %v7030_v8 }
 0xb30   : > { %v7033_v17 = vmax.f32 %v7032_v25, 0.0 }
 0xb32   : > { %v7034_v26 = vpack.c.bf16 %v7033_v17, %v7033_v17 }
 0xb34   : > { %8097 = vmatmul.mubr.msk.bf16.vlgmr.msra.gmra.mrb[32].mxu0 %vm7096_vm13, %v7034_v26 }
 0xc07   : > { %v7137_v30 = vpop.f32.mrb[32].mxu0 }
 0xc08   : > { %v7138_v31 = vadd.f32 %v7137_v30, %v7050_v28  ;;  %v8098_v32 = vpop.f32.mrb[33].mxu0 }
 0xc09   : > { %v7140_v36 = vpop.f32.mrb[34].mxu0 }
 0xc0a   : > { %v7143_v49 = vmax.f32 %v7138_v31, 0.0  ;;  %v8099_v35 = vpop.f32.mrb[35].mxu0 }
 0xc0c   : > { %v7144_v45 = vpack.c.bf16 %v7143_v49, %v7143_v49 }
 0xc0e   : > { %8113 = vmatmul.mubr.msk.bf16.vlgmr.msra.gmra.mrb[32].mxu1 %vm7190_vm14, %v7144_v45 }
 0xce1   : > { %v7231_v51 = vpop.f32.mrb[32].mxu1 }
 0xce2   : > { %v7232_v37 = vadd.f32 %v7231_v51, %v7156_v48  ;;  %v8114_v40 = vpop.f32.mrb[33].mxu1 }
 0xce3   : > { %v7234_v41 = vpop.f32.mrb[34].mxu1 }
 0xce4   : > { %v8115_v43 = vpop.f32.mrb[35].mxu1  ;;  %7238 = vst.msk [vmem:[%s667_s25] sm:$0x1] %vm7237_vm15, %v7232_v37 }
 0xce5   : > { %9299 = shalt.err (!%p9296_p0)
}
 0xce6   : > { %s9300_s0 = scalar_lea.hbm %s10486_s19, 16  ;;  %s9304_s9 = scalar_lea.hbm %s10603_s3, 32 }
 0xce7   : > { %p9301_p10 = scmp.ne.s32.totalorder %s10486_s19, %s9300_s0  ;;  %p9305_p4 = scmp.lt.u32.totalorder %s10486_s19, %s10603_s3 }
 0xce8   : > { %p9306_p12 = scmp.lt.u32.totalorder %s9304_s9, %s9300_s0  ;;  %p9308_p8 = scmp.lt.u32.totalorder %s9300_s0, %s10486_s19 }
 0xce9   : > { %p9302_p2 = pnand %p9301_p10, %p10604_p11 }
 0xcea   : > { %p9307_p7 = por %p9306_p12, %p9305_p4 }
 0xceb   : > { %p9303_p3 = pneg %p9302_p2 }
 0xcec   : > { %p9309_p13 = por %p9308_p8, %p9307_p7 }
 0xcee   : > { %p9310_p1 = pnand %p9309_p13, %p9303_p3 }
 0xcf0   : > { %9313 = shalt.err (!%p9310_p1)
}
 0xcf1   : > { %8572 = dma.vmem_to_hbm [thread:$0]  (%p10604_p11), %s10488_s21, 16, %s10486_s19, %s7240_s1  }
 0xcf2 PF: > { %s10605_s25 = sld [smem:[#allocation19_spill]]  ;;  %s10606_s16 = sld [smem:[#allocation16_spill]] }
 0xcf3   : > { %s10607_s24 = sld [smem:[#allocation23_spill]] }
 0xcf8   : > { %p8604_p6 = scmp.ge.s32.totalorder %s10605_s25, 2  ;;  %s7264_s20 = sand.u32 1, %s10606_s16  }
 0xcf9   : > { %p10608_p9 = scmp.ne.s32.totalorder %s10607_s24, 0  ;;  %s7265_s27 = scalar_lea.sflag [#allocation4], %s7264_s20 }
 0xcfb   : > { %p8591_p5 = pnand %p8604_p6, %p10608_p9 }
 0xcfd   : > { %9343 = dma.done.wait (!%p8591_p5), %s7265_s27, 16  }
 0xcfe   : > { %9345 = vsyncadd (!%p8591_p5), %s7265_s27, 4294967280  ;;  %s10609_s21 = sld [smem:[#allocation20_spill]]  ;;  %s10610_s0 = sld [smem:[#allocation17_spill]] }
 0xcff   : > { %s10611_s30 = sld [smem:[#allocation18_spill]]  ;;  %s10612_s20 = sld [smem:[#allocation21_spill]] }
 0xd04   : > { %p32_p0 = scmp.ge.s32.totalorder %s10609_s21, 4  }
 0xd06   :  { %34 = sbr.rel (!%p32_p0) target bundleno = 16 (0x10), region = 204 }
 0xd0d   :  { %7269 = vsyncpa [#allocation3], 1 }
 0xd0e   :  { %7271 = vsyncpa [#allocation3 + $0x1], 1 }
 0xd0f   :  { %7272 = vsyncpa [#allocation6], 1 }
 0xd10   :  { %7273 = vsyncpa [#allocation9], 1 }
 0xd11   :  { %7274 = vsyncpa [#allocation4], 1 }
 0xd12   :  { %7276 = vsyncpa [#allocation4 + $0x1], 1 }

</bundles_post_ra>
